<compile_context>
chip_gen: v7x
topology: tpu7x:2x2x1
jax: 0.10.0
libtpu: 0.0.40
codegen_flags: <defaults>
</compile_context>

<pallas_src>
import functools

import jax
import jax.numpy as jnp
from jax.experimental import pallas as pl
from jax.experimental.pallas import tpu as pltpu


_EPS = 1e-5


# ---------------------------------------------------------------------------
# Small helpers
# ---------------------------------------------------------------------------
def _round_up(a, b):
    return ((a + b - 1) // b) * b


def _vmem_limit_bytes():
    # Generation-aware VMEM budget: leave headroom on v7x (64 MiB physical),
    # allow more on the 128 MiB parts (v5e/v6e).  Fall back to a safe 48 MiB.
    try:
        cap = int(pltpu.get_tpu_info().vmem_capacity_bytes)
    except Exception:
        return 48 * 1024 * 1024
    return max(32 * 1024 * 1024, min(cap - 16 * 1024 * 1024, 100 * 1024 * 1024))


def _fold_bn_3x3(w, gamma, beta, mean, var, cin_pad, cout_pad):
    # w: (Cout, Cin, 3, 3) -> (9, cin_pad, cout_pad) bf16 with the BN scale
    # folded into the output-channel columns; bias (1, cout_pad) f32.
    cout, cin = w.shape[0], w.shape[1]
    scale = gamma / jnp.sqrt(var + _EPS)
    shift = beta - mean * scale
    wm = jnp.transpose(w, (2, 3, 1, 0)).reshape(9, cin, cout).astype(jnp.float32)
    wm = wm * scale[None, None, :]
    wm = jnp.pad(wm, ((0, 0), (0, cin_pad - cin), (0, cout_pad - cout)))
    bias = jnp.pad(shift, (0, cout_pad - cout)).reshape(1, cout_pad)
    return wm.astype(jnp.bfloat16), bias.astype(jnp.float32)


def _fold_bn_1x1(w, gamma, beta, mean, var, cin_pad, cout_pad):
    # w: (Cout, Cin, 1, 1) -> (cin_pad, cout_pad) bf16; bias (1, cout_pad) f32.
    cout, cin = w.shape[0], w.shape[1]
    scale = gamma / jnp.sqrt(var + _EPS)
    shift = beta - mean * scale
    wm = jnp.transpose(w.reshape(cout, cin), (1, 0)).astype(jnp.float32) * scale[None, :]
    wm = jnp.pad(wm, ((0, cin_pad - cin), (0, cout_pad - cout)))
    bias = jnp.pad(shift, (0, cout_pad - cout)).reshape(1, cout_pad)
    return wm.astype(jnp.bfloat16), bias.astype(jnp.float32)


# ---------------------------------------------------------------------------
# Fused residual-block kernel (one grid step = one batch element)
# ---------------------------------------------------------------------------
def _make_fused_residual_kernel(*, stride, Ho, Wo, Hps, cin_pad, cout_pad, proj):
    s = stride
    taps = [(di, dj) for di in range(3) for dj in range(3)]
    M = Ho * Wo

    def x_window(x_ref, di, dj):
        # Input window feeding conv tap (di, dj).  The stride is absorbed by
        # the phase decomposition done in the wrapper, so this is a plain
        # static (stride-1) slice of the VMEM-resident block.
        ph, pw = di % s, dj % s
        oa, ob = di // s, dj // s
        r0 = (ph * s + pw) * Hps + oa
        return x_ref[0, r0:r0 + Ho, ob:ob + Wo, :]

    def body(x_ref, w1_ref, b1_ref, w2_ref, b2_ref, ws_ref, bs_ref, o_ref, hpad_ref):
        # ---- conv1 (3x3, stride s) + BN1 + ReLU: 9 tap matmuls, f32 accum ----
        acc = None
        for t, (di, dj) in enumerate(taps):
            tap = x_window(x_ref, di, dj).reshape(M, cin_pad)            # bf16
            part = jnp.dot(tap, w1_ref[t], preferred_element_type=jnp.float32)
            acc = part if acc is None else acc + part
        h = jnp.maximum(acc + b1_ref[...], 0.0)                          # (M, Cp) f32

        # Keep h resident in VMEM with a 1-pixel zero halo (conv2's padding);
        # padded channels of h are exactly zero (zero weight cols, zero bias).
        hpad_ref[...] = jnp.zeros_like(hpad_ref)
        hpad_ref[1:Ho + 1, 1:Wo + 1, :] = h.reshape(Ho, Wo, cout_pad)

        # ---- conv2 (3x3, stride 1) + BN2: 9 tap matmuls, f32 accum ----
        acc = None
        for t, (di, dj) in enumerate(taps):
            tap = hpad_ref[di:di + Ho, dj:dj + Wo, :].reshape(M, cout_pad)
            part = jnp.dot(tap.astype(jnp.bfloat16), w2_ref[t],
                           preferred_element_type=jnp.float32)
            acc = part if acc is None else acc + part
        out = acc + b2_ref[...]

        # ---- skip branch (x sampled at the output positions) ----
        xc = x_window(x_ref, 1, 1).reshape(M, cin_pad)
        if proj:
            out = out + jnp.dot(xc, ws_ref[...],
                                preferred_element_type=jnp.float32) + bs_ref[...]
        else:
            out = out + xc.astype(jnp.float32)      # identity: cin_pad == cout_pad

        o_ref[0] = jnp.maximum(out, 0.0).reshape(Ho, Wo, cout_pad)

    if proj:
        def kernel(x_ref, w1_ref, b1_ref, w2_ref, b2_ref, ws_ref, bs_ref, o_ref, hpad_ref):
            body(x_ref, w1_ref, b1_ref, w2_ref, b2_ref, ws_ref, bs_ref, o_ref, hpad_ref)
    else:
        def kernel(x_ref, w1_ref, b1_ref, w2_ref, b2_ref, o_ref, hpad_ref):
            body(x_ref, w1_ref, b1_ref, w2_ref, b2_ref, None, None, o_ref, hpad_ref)
    return kernel


# ---------------------------------------------------------------------------
# ResidualBlock forward (NCHW in/out, like the PyTorch module)
# ---------------------------------------------------------------------------
def residual_block_forward(x_nchw, params, stride=1):
    # TODO(synk): add output-row tiling with halo rows (extra grid axis) so large
    # feature maps get >=4 grid steps (2 per v7x TensorCore) and bounded VMEM.
    # TODO(synk): pad the matmul K dim to 256 on v6e/v7x when channels exceed 128.
    s = int(stride)
    x = jnp.transpose(x_nchw, (0, 2, 3, 1))                 # NHWC
    N, H, W, Cin = x.shape
    Cout = params["w1"].shape[0]
    cin_pad = _round_up(Cin, 128)                           # lane-dense channels
    cout_pad = _round_up(Cout, 128)
    Ho = (H - 1) // s + 1
    Wo = (W - 1) // s + 1
    Hps = Ho + 2 // s                                       # rows per stride phase (incl. halo)
    Wps = Wo + 2 // s

    # Spatial pad (=1) + channel pad + stride-phase decomposition.  Total HBM
    # traffic stays ~1x the input (vs the 9x-expanded im2col patch matrices).
    xpad = jnp.pad(x.astype(jnp.bfloat16),
                   ((0, 0),
                    (1, s * Hps - H - 1),
                    (1, s * Wps - W - 1),
                    (0, cin_pad - Cin)))
    xph = xpad.reshape(N, Hps, s, Wps, s, cin_pad).transpose(0, 2, 4, 1, 3, 5)
    xph = xph.reshape(N, s * s * Hps, Wps, cin_pad)

    w1, b1 = _fold_bn_3x3(params["w1"], params["bn1_gamma"], params["bn1_beta"],
                          params["bn1_mean"], params["bn1_var"], cin_pad, cout_pad)
    w2, b2 = _fold_bn_3x3(params["w2"], params["bn2_gamma"], params["bn2_beta"],
                          params["bn2_mean"], params["bn2_var"], cout_pad, cout_pad)

    proj = (s != 1) or (Cin != Cout)
    kernel = _make_fused_residual_kernel(stride=s, Ho=Ho, Wo=Wo, Hps=Hps,
                                         cin_pad=cin_pad, cout_pad=cout_pad, proj=proj)

    wmode = pl.Buffered(1)                                  # grid-invariant operands
    in_specs = [
        pl.BlockSpec((1, s * s * Hps, Wps, cin_pad), lambda n: (n, 0, 0, 0)),
        pl.BlockSpec((9, cin_pad, cout_pad), lambda n: (0, 0, 0), pipeline_mode=wmode),
        pl.BlockSpec((1, cout_pad), lambda n: (0, 0), pipeline_mode=wmode),
        pl.BlockSpec((9, cout_pad, cout_pad), lambda n: (0, 0, 0), pipeline_mode=wmode),
        pl.BlockSpec((1, cout_pad), lambda n: (0, 0), pipeline_mode=wmode),
    ]
    args = [xph, w1, b1, w2, b2]
    if proj:
        ws, bs = _fold_bn_1x1(params["wskip"], params["bns_gamma"], params["bns_beta"],
                              params["bns_mean"], params["bns_var"], cin_pad, cout_pad)
        in_specs += [
            pl.BlockSpec((cin_pad, cout_pad), lambda n: (0, 0), pipeline_mode=wmode),
            pl.BlockSpec((1, cout_pad), lambda n: (0, 0), pipeline_mode=wmode),
        ]
        args += [ws, bs]

    m_total = N * Ho * Wo
    flops = 2 * m_total * cout_pad * (9 * cin_pad + 9 * cout_pad
                                      + (cin_pad if proj else 0))
    bytes_accessed = int(xph.size * 2
                         + sum(int(a.size) * a.dtype.itemsize for a in args[1:])
                         + m_total * cout_pad * 4)

    out = pl.pallas_call(
        kernel,
        out_shape=jax.ShapeDtypeStruct((N, Ho, Wo, cout_pad), jnp.float32),
        grid=(N,),
        in_specs=in_specs,
        out_specs=pl.BlockSpec((1, Ho, Wo, cout_pad), lambda n: (n, 0, 0, 0)),
        scratch_shapes=[pltpu.VMEM((Ho + 2, Wo + 2, cout_pad), jnp.float32)],
        compiler_params=pltpu.CompilerParams(
            dimension_semantics=("parallel",),
            vmem_limit_bytes=_vmem_limit_bytes()),
        cost_estimate=pl.CostEstimate(flops=flops, transcendentals=0,
                                      bytes_accessed=bytes_accessed),
    )(*args)

    out = out[:, :, :, :Cout]                               # drop channel padding
    return jnp.transpose(out, (0, 3, 1, 2))                 # back to NCHW


# ---------------------------------------------------------------------------
# Deterministic parameter init (shapes from ResidualBlock.__init__)
# ---------------------------------------------------------------------------
def init_params(key, cin, cout, stride):
    ks = jax.random.split(key, 16)
    p = {
        "w1": jax.random.normal(ks[0], (cout, cin, 3, 3), jnp.float32) * 0.1,
        "w2": jax.random.normal(ks[1], (cout, cout, 3, 3), jnp.float32) * 0.1,
        "bn1_gamma": 1.0 + 0.1 * jax.random.normal(ks[2], (cout,), jnp.float32),
        "bn1_beta": 0.1 * jax.random.normal(ks[3], (cout,), jnp.float32),
        "bn1_mean": 0.05 * jax.random.normal(ks[4], (cout,), jnp.float32),
        "bn1_var": jnp.abs(jax.random.normal(ks[5], (cout,), jnp.float32)) + 0.5,
        "bn2_gamma": 1.0 + 0.1 * jax.random.normal(ks[6], (cout,), jnp.float32),
        "bn2_beta": 0.1 * jax.random.normal(ks[7], (cout,), jnp.float32),
        "bn2_mean": 0.05 * jax.random.normal(ks[8], (cout,), jnp.float32),
        "bn2_var": jnp.abs(jax.random.normal(ks[9], (cout,), jnp.float32)) + 0.5,
    }
    if stride != 1 or cin != cout:
        p.update({
            "wskip": jax.random.normal(ks[10], (cout, cin, 1, 1), jnp.float32) * 0.1,
            "bns_gamma": 1.0 + 0.1 * jax.random.normal(ks[11], (cout,), jnp.float32),
            "bns_beta": 0.1 * jax.random.normal(ks[12], (cout,), jnp.float32),
            "bns_mean": 0.05 * jax.random.normal(ks[13], (cout,), jnp.float32),
            "bns_var": jnp.abs(jax.random.normal(ks[14], (cout,), jnp.float32)) + 0.5,
        })
    return p


# ---------------------------------------------------------------------------
# Plain-JAX reference (mirrors the PyTorch forward, NCHW) for a sanity check
# ---------------------------------------------------------------------------
def reference_forward(x, params, stride=1, eps=_EPS):
    def conv(x, w, s, pad):
        return jax.lax.conv_general_dilated(
            x, w, (s, s), ((pad, pad), (pad, pad)),
            dimension_numbers=("NCHW", "OIHW", "NCHW"))

    def bn(x, g, b, m, v):
        rs = lambda a: a.reshape(1, -1, 1, 1)
        return (x - rs(m)) / jnp.sqrt(rs(v) + eps) * rs(g) + rs(b)

    h = jax.nn.relu(bn(conv(x, params["w1"], stride, 1),
                       params["bn1_gamma"], params["bn1_beta"],
                       params["bn1_mean"], params["bn1_var"]))
    out = bn(conv(h, params["w2"], 1, 1),
             params["bn2_gamma"], params["bn2_beta"],
             params["bn2_mean"], params["bn2_var"])
    cin, cout = x.shape[1], params["w1"].shape[0]
    if stride != 1 or cin != cout:
        iden = bn(conv(x, params["wskip"], stride, 0),
                  params["bns_gamma"], params["bns_beta"],
                  params["bns_mean"], params["bns_var"])
    else:
        iden = x
    return jax.nn.relu(out + iden)


# ---------------------------------------------------------------------------
if __name__ == "__main__":
    key = jax.random.PRNGKey(0)

    # (batch, cin, cout, H, W, stride): projection skip, identity skip, strided skip
    configs = [
        (2, 4, 8, 16, 16, 1),
        (2, 8, 8, 16, 16, 1),
        (2, 4, 8, 16, 16, 2),
    ]

    for batch, cin, cout, H, W, stride in configs:
        key, kx, kp = jax.random.split(key, 3)
        x = jax.random.normal(kx, (batch, cin, H, W), jnp.float32)   # NCHW input
        params = init_params(kp, cin, cout, stride)

        fwd = jax.jit(functools.partial(residual_block_forward, stride=stride))
        out = jax.block_until_ready(fwd(x, params))

        ref = reference_forward(x, params, stride=stride)
        assert out.shape == ref.shape == (batch, cout, H // stride, W // stride)
        # bf16 activations/weights on the MXU path loosen the tolerance vs f32.
        assert jnp.allclose(out, ref, atol=5e-2, rtol=5e-2), \
            f"cfg={(batch, cin, cout, H, W, stride)} max abs diff = " \
            f"{jnp.max(jnp.abs(out - ref))}"

    print("KERNEL_OK")
</pallas_src>

<mosaic_0001>
module attributes {stable_mosaic.version = 11 : i64} {
  func.func @kernel(%arg0: i32, %arg1: memref<1x18x18x128xbf16, #tpu.memory_space<vmem>>, %arg2: memref<9x128x128xbf16, #tpu.memory_space<vmem>>, %arg3: memref<1x128xf32, #tpu.memory_space<vmem>>, %arg4: memref<9x128x128xbf16, #tpu.memory_space<vmem>>, %arg5: memref<1x128xf32, #tpu.memory_space<vmem>>, %arg6: memref<128x128xbf16, #tpu.memory_space<vmem>>, %arg7: memref<1x128xf32, #tpu.memory_space<vmem>>, %arg8: memref<1x16x16x128xf32, #tpu.memory_space<vmem>>, %arg9: memref<18x18x128xf32, #tpu.memory_space<vmem>>) attributes {dimension_semantics = [#tpu.dimension_semantics<parallel>], iteration_bounds = array<i64: 2>, scalar_prefetch = 0 : i64, scratch_operands = 1 : i64, tpu.core_type = #tpu.core_type<tc>, window_params = [{transform_indices = @transform_0, window_bounds = array<i64: 1, 18, 18, 128>}, {pipeline_mode = #tpu.pipeline_mode<synchronous>, transform_indices = @transform_1, window_bounds = array<i64: 9, 128, 128>}, {pipeline_mode = #tpu.pipeline_mode<synchronous>, transform_indices = @transform_2, window_bounds = array<i64: 1, 128>}, {pipeline_mode = #tpu.pipeline_mode<synchronous>, transform_indices = @transform_3, window_bounds = array<i64: 9, 128, 128>}, {pipeline_mode = #tpu.pipeline_mode<synchronous>, transform_indices = @transform_4, window_bounds = array<i64: 1, 128>}, {pipeline_mode = #tpu.pipeline_mode<synchronous>, transform_indices = @transform_5, window_bounds = array<i64: 128, 128>}, {pipeline_mode = #tpu.pipeline_mode<synchronous>, transform_indices = @transform_6, window_bounds = array<i64: 1, 128>}, {transform_indices = @transform_7, window_bounds = array<i64: 1, 16, 16, 128>}]} {
    %c0 = arith.constant 0 : index
    %c0_0 = arith.constant 0 : index
    %c0_1 = arith.constant 0 : index
    %c0_2 = arith.constant 0 : index
    %0 = vector.load %arg1[%c0, %c0_0, %c0_1, %c0_2] : memref<1x18x18x128xbf16, #tpu.memory_space<vmem>>, vector<1x16x16x128xbf16>
    %1 = vector.shape_cast %0 : vector<1x16x16x128xbf16> to vector<16x16x128xbf16>
    %2 = vector.shape_cast %1 : vector<16x16x128xbf16> to vector<256x128xbf16>
    %c0_3 = arith.constant 0 : index
    %c0_4 = arith.constant 0 : index
    %c0_5 = arith.constant 0 : index
    %3 = vector.load %arg2[%c0_3, %c0_4, %c0_5] : memref<9x128x128xbf16, #tpu.memory_space<vmem>>, vector<1x128x128xbf16>
    %4 = vector.shape_cast %3 : vector<1x128x128xbf16> to vector<128x128xbf16>
    %cst = arith.constant dense<0.000000e+00> : vector<256x128xf32>
    %5 = tpu.matmul %2, %4, %cst {dimension_numbers = #tpu.dot_dimension_numbers<[1], [0], [0], [1], [0, 0, 1, 1], [], []>} : vector<256x128xbf16>, vector<128x128xbf16>, vector<256x128xf32> -> vector<256x128xf32>
    %c0_6 = arith.constant 0 : index
    %c0_7 = arith.constant 0 : index
    %c1 = arith.constant 1 : index
    %c0_8 = arith.constant 0 : index
    %6 = vector.load %arg1[%c0_6, %c0_7, %c1, %c0_8] : memref<1x18x18x128xbf16, #tpu.memory_space<vmem>>, vector<1x16x16x128xbf16>
    %7 = vector.shape_cast %6 : vector<1x16x16x128xbf16> to vector<16x16x128xbf16>
    %8 = vector.shape_cast %7 : vector<16x16x128xbf16> to vector<256x128xbf16>
    %c1_9 = arith.constant 1 : index
    %c0_10 = arith.constant 0 : index
    %c0_11 = arith.constant 0 : index
    %9 = vector.load %arg2[%c1_9, %c0_10, %c0_11] : memref<9x128x128xbf16, #tpu.memory_space<vmem>>, vector<1x128x128xbf16>
    %10 = vector.shape_cast %9 : vector<1x128x128xbf16> to vector<128x128xbf16>
    %cst_12 = arith.constant dense<0.000000e+00> : vector<256x128xf32>
    %11 = tpu.matmul %8, %10, %cst_12 {dimension_numbers = #tpu.dot_dimension_numbers<[1], [0], [0], [1], [0, 0, 1, 1], [], []>} : vector<256x128xbf16>, vector<128x128xbf16>, vector<256x128xf32> -> vector<256x128xf32>
    %12 = arith.addf %5, %11 : vector<256x128xf32>
    %c0_13 = arith.constant 0 : index
    %c0_14 = arith.constant 0 : index
    %c2 = arith.constant 2 : index
    %c0_15 = arith.constant 0 : index
    %13 = vector.load %arg1[%c0_13, %c0_14, %c2, %c0_15] : memref<1x18x18x128xbf16, #tpu.memory_space<vmem>>, vector<1x16x16x128xbf16>
    %14 = vector.shape_cast %13 : vector<1x16x16x128xbf16> to vector<16x16x128xbf16>
    %15 = vector.shape_cast %14 : vector<16x16x128xbf16> to vector<256x128xbf16>
    %c2_16 = arith.constant 2 : index
    %c0_17 = arith.constant 0 : index
    %c0_18 = arith.constant 0 : index
    %16 = vector.load %arg2[%c2_16, %c0_17, %c0_18] : memref<9x128x128xbf16, #tpu.memory_space<vmem>>, vector<1x128x128xbf16>
    %17 = vector.shape_cast %16 : vector<1x128x128xbf16> to vector<128x128xbf16>
    %cst_19 = arith.constant dense<0.000000e+00> : vector<256x128xf32>
    %18 = tpu.matmul %15, %17, %cst_19 {dimension_numbers = #tpu.dot_dimension_numbers<[1], [0], [0], [1], [0, 0, 1, 1], [], []>} : vector<256x128xbf16>, vector<128x128xbf16>, vector<256x128xf32> -> vector<256x128xf32>
    %19 = arith.addf %12, %18 : vector<256x128xf32>
    %c0_20 = arith.constant 0 : index
    %c1_21 = arith.constant 1 : index
    %c0_22 = arith.constant 0 : index
    %c0_23 = arith.constant 0 : index
    %20 = vector.load %arg1[%c0_20, %c1_21, %c0_22, %c0_23] : memref<1x18x18x128xbf16, #tpu.memory_space<vmem>>, vector<1x16x16x128xbf16>
    %21 = vector.shape_cast %20 : vector<1x16x16x128xbf16> to vector<16x16x128xbf16>
    %22 = vector.shape_cast %21 : vector<16x16x128xbf16> to vector<256x128xbf16>
    %c3 = arith.constant 3 : index
    %c0_24 = arith.constant 0 : index
    %c0_25 = arith.constant 0 : index
    %23 = vector.load %arg2[%c3, %c0_24, %c0_25] : memref<9x128x128xbf16, #tpu.memory_space<vmem>>, vector<1x128x128xbf16>
    %24 = vector.shape_cast %23 : vector<1x128x128xbf16> to vector<128x128xbf16>
    %cst_26 = arith.constant dense<0.000000e+00> : vector<256x128xf32>
    %25 = tpu.matmul %22, %24, %cst_26 {dimension_numbers = #tpu.dot_dimension_numbers<[1], [0], [0], [1], [0, 0, 1, 1], [], []>} : vector<256x128xbf16>, vector<128x128xbf16>, vector<256x128xf32> -> vector<256x128xf32>
    %26 = arith.addf %19, %25 : vector<256x128xf32>
    %c0_27 = arith.constant 0 : index
    %c1_28 = arith.constant 1 : index
    %c1_29 = arith.constant 1 : index
    %c0_30 = arith.constant 0 : index
    %27 = vector.load %arg1[%c0_27, %c1_28, %c1_29, %c0_30] : memref<1x18x18x128xbf16, #tpu.memory_space<vmem>>, vector<1x16x16x128xbf16>
    %28 = vector.shape_cast %27 : vector<1x16x16x128xbf16> to vector<16x16x128xbf16>
    %29 = vector.shape_cast %28 : vector<16x16x128xbf16> to vector<256x128xbf16>
    %c4 = arith.constant 4 : index
    %c0_31 = arith.constant 0 : index
    %c0_32 = arith.constant 0 : index
    %30 = vector.load %arg2[%c4, %c0_31, %c0_32] : memref<9x128x128xbf16, #tpu.memory_space<vmem>>, vector<1x128x128xbf16>
    %31 = vector.shape_cast %30 : vector<1x128x128xbf16> to vector<128x128xbf16>
    %cst_33 = arith.constant dense<0.000000e+00> : vector<256x128xf32>
    %32 = tpu.matmul %29, %31, %cst_33 {dimension_numbers = #tpu.dot_dimension_numbers<[1], [0], [0], [1], [0, 0, 1, 1], [], []>} : vector<256x128xbf16>, vector<128x128xbf16>, vector<256x128xf32> -> vector<256x128xf32>
    %33 = arith.addf %26, %32 : vector<256x128xf32>
    %c0_34 = arith.constant 0 : index
    %c1_35 = arith.constant 1 : index
    %c2_36 = arith.constant 2 : index
    %c0_37 = arith.constant 0 : index
    %34 = vector.load %arg1[%c0_34, %c1_35, %c2_36, %c0_37] : memref<1x18x18x128xbf16, #tpu.memory_space<vmem>>, vector<1x16x16x128xbf16>
    %35 = vector.shape_cast %34 : vector<1x16x16x128xbf16> to vector<16x16x128xbf16>
    %36 = vector.shape_cast %35 : vector<16x16x128xbf16> to vector<256x128xbf16>
    %c5 = arith.constant 5 : index
    %c0_38 = arith.constant 0 : index
    %c0_39 = arith.constant 0 : index
    %37 = vector.load %arg2[%c5, %c0_38, %c0_39] : memref<9x128x128xbf16, #tpu.memory_space<vmem>>, vector<1x128x128xbf16>
    %38 = vector.shape_cast %37 : vector<1x128x128xbf16> to vector<128x128xbf16>
    %cst_40 = arith.constant dense<0.000000e+00> : vector<256x128xf32>
    %39 = tpu.matmul %36, %38, %cst_40 {dimension_numbers = #tpu.dot_dimension_numbers<[1], [0], [0], [1], [0, 0, 1, 1], [], []>} : vector<256x128xbf16>, vector<128x128xbf16>, vector<256x128xf32> -> vector<256x128xf32>
    %40 = arith.addf %33, %39 : vector<256x128xf32>
    %c0_41 = arith.constant 0 : index
    %c2_42 = arith.constant 2 : index
    %c0_43 = arith.constant 0 : index
    %c0_44 = arith.constant 0 : index
    %41 = vector.load %arg1[%c0_41, %c2_42, %c0_43, %c0_44] : memref<1x18x18x128xbf16, #tpu.memory_space<vmem>>, vector<1x16x16x128xbf16>
    %42 = vector.shape_cast %41 : vector<1x16x16x128xbf16> to vector<16x16x128xbf16>
    %43 = vector.shape_cast %42 : vector<16x16x128xbf16> to vector<256x128xbf16>
    %c6 = arith.constant 6 : index
    %c0_45 = arith.constant 0 : index
    %c0_46 = arith.constant 0 : index
    %44 = vector.load %arg2[%c6, %c0_45, %c0_46] : memref<9x128x128xbf16, #tpu.memory_space<vmem>>, vector<1x128x128xbf16>
    %45 = vector.shape_cast %44 : vector<1x128x128xbf16> to vector<128x128xbf16>
    %cst_47 = arith.constant dense<0.000000e+00> : vector<256x128xf32>
    %46 = tpu.matmul %43, %45, %cst_47 {dimension_numbers = #tpu.dot_dimension_numbers<[1], [0], [0], [1], [0, 0, 1, 1], [], []>} : vector<256x128xbf16>, vector<128x128xbf16>, vector<256x128xf32> -> vector<256x128xf32>
    %47 = arith.addf %40, %46 : vector<256x128xf32>
    %c0_48 = arith.constant 0 : index
    %c2_49 = arith.constant 2 : index
    %c1_50 = arith.constant 1 : index
    %c0_51 = arith.constant 0 : index
    %48 = vector.load %arg1[%c0_48, %c2_49, %c1_50, %c0_51] : memref<1x18x18x128xbf16, #tpu.memory_space<vmem>>, vector<1x16x16x128xbf16>
    %49 = vector.shape_cast %48 : vector<1x16x16x128xbf16> to vector<16x16x128xbf16>
    %50 = vector.shape_cast %49 : vector<16x16x128xbf16> to vector<256x128xbf16>
    %c7 = arith.constant 7 : index
    %c0_52 = arith.constant 0 : index
    %c0_53 = arith.constant 0 : index
    %51 = vector.load %arg2[%c7, %c0_52, %c0_53] : memref<9x128x128xbf16, #tpu.memory_space<vmem>>, vector<1x128x128xbf16>
    %52 = vector.shape_cast %51 : vector<1x128x128xbf16> to vector<128x128xbf16>
    %cst_54 = arith.constant dense<0.000000e+00> : vector<256x128xf32>
    %53 = tpu.matmul %50, %52, %cst_54 {dimension_numbers = #tpu.dot_dimension_numbers<[1], [0], [0], [1], [0, 0, 1, 1], [], []>} : vector<256x128xbf16>, vector<128x128xbf16>, vector<256x128xf32> -> vector<256x128xf32>
    %54 = arith.addf %47, %53 : vector<256x128xf32>
    %c0_55 = arith.constant 0 : index
    %c2_56 = arith.constant 2 : index
    %c2_57 = arith.constant 2 : index
    %c0_58 = arith.constant 0 : index
    %55 = vector.load %arg1[%c0_55, %c2_56, %c2_57, %c0_58] : memref<1x18x18x128xbf16, #tpu.memory_space<vmem>>, vector<1x16x16x128xbf16>
    %56 = vector.shape_cast %55 : vector<1x16x16x128xbf16> to vector<16x16x128xbf16>
    %57 = vector.shape_cast %56 : vector<16x16x128xbf16> to vector<256x128xbf16>
    %c8 = arith.constant 8 : index
    %c0_59 = arith.constant 0 : index
    %c0_60 = arith.constant 0 : index
    %58 = vector.load %arg2[%c8, %c0_59, %c0_60] : memref<9x128x128xbf16, #tpu.memory_space<vmem>>, vector<1x128x128xbf16>
    %59 = vector.shape_cast %58 : vector<1x128x128xbf16> to vector<128x128xbf16>
    %cst_61 = arith.constant dense<0.000000e+00> : vector<256x128xf32>
    %60 = tpu.matmul %57, %59, %cst_61 {dimension_numbers = #tpu.dot_dimension_numbers<[1], [0], [0], [1], [0, 0, 1, 1], [], []>} : vector<256x128xbf16>, vector<128x128xbf16>, vector<256x128xf32> -> vector<256x128xf32>
    %61 = arith.addf %54, %60 : vector<256x128xf32>
    %c0_62 = arith.constant 0 : index
    %c0_63 = arith.constant 0 : index
    %62 = vector.load %arg3[%c0_62, %c0_63] : memref<1x128xf32, #tpu.memory_space<vmem>>, vector<1x128xf32>
    %63 = vector.broadcast %62 : vector<1x128xf32> to vector<256x128xf32>
    %64 = arith.addf %61, %63 : vector<256x128xf32>
    %cst_64 = arith.constant 0.000000e+00 : f32
    %65 = vector.broadcast %cst_64 : f32 to vector<256x128xf32>
    %66 = arith.maximumf %64, %65 : vector<256x128xf32>
    %cst_65 = arith.constant 0.000000e+00 : f32
    %67 = vector.broadcast %cst_65 : f32 to vector<18x18x128xf32>
    %c0_66 = arith.constant 0 : index
    %c0_67 = arith.constant 0 : index
    %c0_68 = arith.constant 0 : index
    %68 = vector.load %arg9[%c0_66, %c0_67, %c0_68] : memref<18x18x128xf32, #tpu.memory_space<vmem>>, vector<18x18x128xf32>
    tpu.vector_store %arg9[%c0_66, %c0_67, %c0_68], %67 {strides = array<i32>} : memref<18x18x128xf32, #tpu.memory_space<vmem>>, vector<18x18x128xf32>,
    %69 = vector.shape_cast %66 : vector<256x128xf32> to vector<16x16x128xf32>
    %c1_69 = arith.constant 1 : index
    %c1_70 = arith.constant 1 : index
    %c0_71 = arith.constant 0 : index
    %70 = vector.load %arg9[%c1_69, %c1_70, %c0_71] : memref<18x18x128xf32, #tpu.memory_space<vmem>>, vector<16x16x128xf32>
    tpu.vector_store %arg9[%c1_69, %c1_70, %c0_71], %69 {strides = array<i32>} : memref<18x18x128xf32, #tpu.memory_space<vmem>>, vector<16x16x128xf32>,
    %c0_72 = arith.constant 0 : index
    %c0_73 = arith.constant 0 : index
    %c0_74 = arith.constant 0 : index
    %71 = vector.load %arg9[%c0_72, %c0_73, %c0_74] : memref<18x18x128xf32, #tpu.memory_space<vmem>>, vector<16x16x128xf32>
    %72 = vector.shape_cast %71 : vector<16x16x128xf32> to vector<256x128xf32>
    %73 = arith.truncf %72 : vector<256x128xf32> to vector<256x128xbf16>
    %c0_75 = arith.constant 0 : index
    %c0_76 = arith.constant 0 : index
    %c0_77 = arith.constant 0 : index
    %74 = vector.load %arg4[%c0_75, %c0_76, %c0_77] : memref<9x128x128xbf16, #tpu.memory_space<vmem>>, vector<1x128x128xbf16>
    %75 = vector.shape_cast %74 : vector<1x128x128xbf16> to vector<128x128xbf16>
    %cst_78 = arith.constant dense<0.000000e+00> : vector<256x128xf32>
    %76 = tpu.matmul %73, %75, %cst_78 {dimension_numbers = #tpu.dot_dimension_numbers<[1], [0], [0], [1], [0, 0, 1, 1], [], []>} : vector<256x128xbf16>, vector<128x128xbf16>, vector<256x128xf32> -> vector<256x128xf32>
    %c0_79 = arith.constant 0 : index
    %c1_80 = arith.constant 1 : index
    %c0_81 = arith.constant 0 : index
    %77 = vector.load %arg9[%c0_79, %c1_80, %c0_81] : memref<18x18x128xf32, #tpu.memory_space<vmem>>, vector<16x16x128xf32>
    %78 = vector.shape_cast %77 : vector<16x16x128xf32> to vector<256x128xf32>
    %79 = arith.truncf %78 : vector<256x128xf32> to vector<256x128xbf16>
    %c1_82 = arith.constant 1 : index
    %c0_83 = arith.constant 0 : index
    %c0_84 = arith.constant 0 : index
    %80 = vector.load %arg4[%c1_82, %c0_83, %c0_84] : memref<9x128x128xbf16, #tpu.memory_space<vmem>>, vector<1x128x128xbf16>
    %81 = vector.shape_cast %80 : vector<1x128x128xbf16> to vector<128x128xbf16>
    %cst_85 = arith.constant dense<0.000000e+00> : vector<256x128xf32>
    %82 = tpu.matmul %79, %81, %cst_85 {dimension_numbers = #tpu.dot_dimension_numbers<[1], [0], [0], [1], [0, 0, 1, 1], [], []>} : vector<256x128xbf16>, vector<128x128xbf16>, vector<256x128xf32> -> vector<256x128xf32>
    %83 = arith.addf %76, %82 : vector<256x128xf32>
    %c0_86 = arith.constant 0 : index
    %c2_87 = arith.constant 2 : index
    %c0_88 = arith.constant 0 : index
    %84 = vector.load %arg9[%c0_86, %c2_87, %c0_88] : memref<18x18x128xf32, #tpu.memory_space<vmem>>, vector<16x16x128xf32>
    %85 = vector.shape_cast %84 : vector<16x16x128xf32> to vector<256x128xf32>
    %86 = arith.truncf %85 : vector<256x128xf32> to vector<256x128xbf16>
    %c2_89 = arith.constant 2 : index
    %c0_90 = arith.constant 0 : index
    %c0_91 = arith.constant 0 : index
    %87 = vector.load %arg4[%c2_89, %c0_90, %c0_91] : memref<9x128x128xbf16, #tpu.memory_space<vmem>>, vector<1x128x128xbf16>
    %88 = vector.shape_cast %87 : vector<1x128x128xbf16> to vector<128x128xbf16>
    %cst_92 = arith.constant dense<0.000000e+00> : vector<256x128xf32>
    %89 = tpu.matmul %86, %88, %cst_92 {dimension_numbers = #tpu.dot_dimension_numbers<[1], [0], [0], [1], [0, 0, 1, 1], [], []>} : vector<256x128xbf16>, vector<128x128xbf16>, vector<256x128xf32> -> vector<256x128xf32>
    %90 = arith.addf %83, %89 : vector<256x128xf32>
    %c1_93 = arith.constant 1 : index
    %c0_94 = arith.constant 0 : index
    %c0_95 = arith.constant 0 : index
    %91 = vector.load %arg9[%c1_93, %c0_94, %c0_95] : memref<18x18x128xf32, #tpu.memory_space<vmem>>, vector<16x16x128xf32>
    %92 = vector.shape_cast %91 : vector<16x16x128xf32> to vector<256x128xf32>
    %93 = arith.truncf %92 : vector<256x128xf32> to vector<256x128xbf16>
    %c3_96 = arith.constant 3 : index
    %c0_97 = arith.constant 0 : index
    %c0_98 = arith.constant 0 : index
    %94 = vector.load %arg4[%c3_96, %c0_97, %c0_98] : memref<9x128x128xbf16, #tpu.memory_space<vmem>>, vector<1x128x128xbf16>
    %95 = vector.shape_cast %94 : vector<1x128x128xbf16> to vector<128x128xbf16>
    %cst_99 = arith.constant dense<0.000000e+00> : vector<256x128xf32>
    %96 = tpu.matmul %93, %95, %cst_99 {dimension_numbers = #tpu.dot_dimension_numbers<[1], [0], [0], [1], [0, 0, 1, 1], [], []>} : vector<256x128xbf16>, vector<128x128xbf16>, vector<256x128xf32> -> vector<256x128xf32>
    %97 = arith.addf %90, %96 : vector<256x128xf32>
    %c1_100 = arith.constant 1 : index
    %c1_101 = arith.constant 1 : index
    %c0_102 = arith.constant 0 : index
    %98 = vector.load %arg9[%c1_100, %c1_101, %c0_102] : memref<18x18x128xf32, #tpu.memory_space<vmem>>, vector<16x16x128xf32>
    %99 = vector.shape_cast %98 : vector<16x16x128xf32> to vector<256x128xf32>
    %100 = arith.truncf %99 : vector<256x128xf32> to vector<256x128xbf16>
    %c4_103 = arith.constant 4 : index
    %c0_104 = arith.constant 0 : index
    %c0_105 = arith.constant 0 : index
    %101 = vector.load %arg4[%c4_103, %c0_104, %c0_105] : memref<9x128x128xbf16, #tpu.memory_space<vmem>>, vector<1x128x128xbf16>
    %102 = vector.shape_cast %101 : vector<1x128x128xbf16> to vector<128x128xbf16>
    %cst_106 = arith.constant dense<0.000000e+00> : vector<256x128xf32>
    %103 = tpu.matmul %100, %102, %cst_106 {dimension_numbers = #tpu.dot_dimension_numbers<[1], [0], [0], [1], [0, 0, 1, 1], [], []>} : vector<256x128xbf16>, vector<128x128xbf16>, vector<256x128xf32> -> vector<256x128xf32>
    %104 = arith.addf %97, %103 : vector<256x128xf32>
    %c1_107 = arith.constant 1 : index
    %c2_108 = arith.constant 2 : index
    %c0_109 = arith.constant 0 : index
    %105 = vector.load %arg9[%c1_107, %c2_108, %c0_109] : memref<18x18x128xf32, #tpu.memory_space<vmem>>, vector<16x16x128xf32>
    %106 = vector.shape_cast %105 : vector<16x16x128xf32> to vector<256x128xf32>
    %107 = arith.truncf %106 : vector<256x128xf32> to vector<256x128xbf16>
    %c5_110 = arith.constant 5 : index
    %c0_111 = arith.constant 0 : index
    %c0_112 = arith.constant 0 : index
    %108 = vector.load %arg4[%c5_110, %c0_111, %c0_112] : memref<9x128x128xbf16, #tpu.memory_space<vmem>>, vector<1x128x128xbf16>
    %109 = vector.shape_cast %108 : vector<1x128x128xbf16> to vector<128x128xbf16>
    %cst_113 = arith.constant dense<0.000000e+00> : vector<256x128xf32>
    %110 = tpu.matmul %107, %109, %cst_113 {dimension_numbers = #tpu.dot_dimension_numbers<[1], [0], [0], [1], [0, 0, 1, 1], [], []>} : vector<256x128xbf16>, vector<128x128xbf16>, vector<256x128xf32> -> vector<256x128xf32>
    %111 = arith.addf %104, %110 : vector<256x128xf32>
    %c2_114 = arith.constant 2 : index
    %c0_115 = arith.constant 0 : index
    %c0_116 = arith.constant 0 : index
    %112 = vector.load %arg9[%c2_114, %c0_115, %c0_116] : memref<18x18x128xf32, #tpu.memory_space<vmem>>, vector<16x16x128xf32>
    %113 = vector.shape_cast %112 : vector<16x16x128xf32> to vector<256x128xf32>
    %114 = arith.truncf %113 : vector<256x128xf32> to vector<256x128xbf16>
    %c6_117 = arith.constant 6 : index
    %c0_118 = arith.constant 0 : index
    %c0_119 = arith.constant 0 : index
    %115 = vector.load %arg4[%c6_117, %c0_118, %c0_119] : memref<9x128x128xbf16, #tpu.memory_space<vmem>>, vector<1x128x128xbf16>
    %116 = vector.shape_cast %115 : vector<1x128x128xbf16> to vector<128x128xbf16>
    %cst_120 = arith.constant dense<0.000000e+00> : vector<256x128xf32>
    %117 = tpu.matmul %114, %116, %cst_120 {dimension_numbers = #tpu.dot_dimension_numbers<[1], [0], [0], [1], [0, 0, 1, 1], [], []>} : vector<256x128xbf16>, vector<128x128xbf16>, vector<256x128xf32> -> vector<256x128xf32>
    %118 = arith.addf %111, %117 : vector<256x128xf32>
    %c2_121 = arith.constant 2 : index
    %c1_122 = arith.constant 1 : index
    %c0_123 = arith.constant 0 : index
    %119 = vector.load %arg9[%c2_121, %c1_122, %c0_123] : memref<18x18x128xf32, #tpu.memory_space<vmem>>, vector<16x16x128xf32>
    %120 = vector.shape_cast %119 : vector<16x16x128xf32> to vector<256x128xf32>
    %121 = arith.truncf %120 : vector<256x128xf32> to vector<256x128xbf16>
    %c7_124 = arith.constant 7 : index
    %c0_125 = arith.constant 0 : index
    %c0_126 = arith.constant 0 : index
    %122 = vector.load %arg4[%c7_124, %c0_125, %c0_126] : memref<9x128x128xbf16, #tpu.memory_space<vmem>>, vector<1x128x128xbf16>
    %123 = vector.shape_cast %122 : vector<1x128x128xbf16> to vector<128x128xbf16>
    %cst_127 = arith.constant dense<0.000000e+00> : vector<256x128xf32>
    %124 = tpu.matmul %121, %123, %cst_127 {dimension_numbers = #tpu.dot_dimension_numbers<[1], [0], [0], [1], [0, 0, 1, 1], [], []>} : vector<256x128xbf16>, vector<128x128xbf16>, vector<256x128xf32> -> vector<256x128xf32>
    %125 = arith.addf %118, %124 : vector<256x128xf32>
    %c2_128 = arith.constant 2 : index
    %c2_129 = arith.constant 2 : index
    %c0_130 = arith.constant 0 : index
    %126 = vector.load %arg9[%c2_128, %c2_129, %c0_130] : memref<18x18x128xf32, #tpu.memory_space<vmem>>, vector<16x16x128xf32>
    %127 = vector.shape_cast %126 : vector<16x16x128xf32> to vector<256x128xf32>
    %128 = arith.truncf %127 : vector<256x128xf32> to vector<256x128xbf16>
    %c8_131 = arith.constant 8 : index
    %c0_132 = arith.constant 0 : index
    %c0_133 = arith.constant 0 : index
    %129 = vector.load %arg4[%c8_131, %c0_132, %c0_133] : memref<9x128x128xbf16, #tpu.memory_space<vmem>>, vector<1x128x128xbf16>
    %130 = vector.shape_cast %129 : vector<1x128x128xbf16> to vector<128x128xbf16>
    %cst_134 = arith.constant dense<0.000000e+00> : vector<256x128xf32>
    %131 = tpu.matmul %128, %130, %cst_134 {dimension_numbers = #tpu.dot_dimension_numbers<[1], [0], [0], [1], [0, 0, 1, 1], [], []>} : vector<256x128xbf16>, vector<128x128xbf16>, vector<256x128xf32> -> vector<256x128xf32>
    %132 = arith.addf %125, %131 : vector<256x128xf32>
    %c0_135 = arith.constant 0 : index
    %c0_136 = arith.constant 0 : index
    %133 = vector.load %arg5[%c0_135, %c0_136] : memref<1x128xf32, #tpu.memory_space<vmem>>, vector<1x128xf32>
    %134 = vector.broadcast %133 : vector<1x128xf32> to vector<256x128xf32>
    %135 = arith.addf %132, %134 : vector<256x128xf32>
    %c0_137 = arith.constant 0 : index
    %c1_138 = arith.constant 1 : index
    %c1_139 = arith.constant 1 : index
    %c0_140 = arith.constant 0 : index
    %136 = vector.load %arg1[%c0_137, %c1_138, %c1_139, %c0_140] : memref<1x18x18x128xbf16, #tpu.memory_space<vmem>>, vector<1x16x16x128xbf16>
    %137 = vector.shape_cast %136 : vector<1x16x16x128xbf16> to vector<16x16x128xbf16>
    %138 = vector.shape_cast %137 : vector<16x16x128xbf16> to vector<256x128xbf16>
    %c0_141 = arith.constant 0 : index
    %c0_142 = arith.constant 0 : index
    %139 = vector.load %arg6[%c0_141, %c0_142] : memref<128x128xbf16, #tpu.memory_space<vmem>>, vector<128x128xbf16>
    %cst_143 = arith.constant dense<0.000000e+00> : vector<256x128xf32>
    %140 = tpu.matmul %138, %139, %cst_143 {dimension_numbers = #tpu.dot_dimension_numbers<[1], [0], [0], [1], [0, 0, 1, 1], [], []>} : vector<256x128xbf16>, vector<128x128xbf16>, vector<256x128xf32> -> vector<256x128xf32>
    %141 = arith.addf %135, %140 : vector<256x128xf32>
    %c0_144 = arith.constant 0 : index
    %c0_145 = arith.constant 0 : index
    %142 = vector.load %arg7[%c0_144, %c0_145] : memref<1x128xf32, #tpu.memory_space<vmem>>, vector<1x128xf32>
    %143 = vector.broadcast %142 : vector<1x128xf32> to vector<256x128xf32>
    %144 = arith.addf %141, %143 : vector<256x128xf32>
    %cst_146 = arith.constant 0.000000e+00 : f32
    %145 = vector.broadcast %cst_146 : f32 to vector<256x128xf32>
    %146 = arith.maximumf %144, %145 : vector<256x128xf32>
    %147 = vector.shape_cast %146 : vector<256x128xf32> to vector<16x16x128xf32>
    %c0_147 = arith.constant 0 : index
    %c0_148 = arith.constant 0 : index
    %c0_149 = arith.constant 0 : index
    %c0_150 = arith.constant 0 : index
    %148 = vector.load %arg8[%c0_147, %c0_148, %c0_149, %c0_150] : memref<1x16x16x128xf32, #tpu.memory_space<vmem>>, vector<1x16x16x128xf32>
    %149 = vector.shape_cast %148 : vector<1x16x16x128xf32> to vector<16x16x128xf32>
    %150 = vector.shape_cast %147 : vector<16x16x128xf32> to vector<1x16x16x128xf32>
    tpu.vector_store %arg8[%c0_147, %c0_148, %c0_149, %c0_150], %150 {strides = array<i32>} : memref<1x16x16x128xf32, #tpu.memory_space<vmem>>, vector<1x16x16x128xf32>,
    return
  }
  func.func @transform_0(%arg0: i32) -> (i32, i32, i32, i32) {
    %c0_i32 = arith.constant 0 : i32
    %c0_i32_0 = arith.constant 0 : i32
    %c0_i32_1 = arith.constant 0 : i32
    %c0_i32_2 = arith.constant 0 : i32
    return %arg0, %c0_i32, %c0_i32_0, %c0_i32_1 : i32, i32, i32, i32
  }
  func.func @transform_1(%arg0: i32) -> (i32, i32, i32) {
    %c0_i32 = arith.constant 0 : i32
    %c0_i32_0 = arith.constant 0 : i32
    %c0_i32_1 = arith.constant 0 : i32
    %c0_i32_2 = arith.constant 0 : i32
    return %c0_i32, %c0_i32_0, %c0_i32_1 : i32, i32, i32
  }
  func.func @transform_2(%arg0: i32) -> (i32, i32) {
    %c0_i32 = arith.constant 0 : i32
    %c0_i32_0 = arith.constant 0 : i32
    %c0_i32_1 = arith.constant 0 : i32
    return %c0_i32, %c0_i32_0 : i32, i32
  }
  func.func @transform_3(%arg0: i32) -> (i32, i32, i32) {
    %c0_i32 = arith.constant 0 : i32
    %c0_i32_0 = arith.constant 0 : i32
    %c0_i32_1 = arith.constant 0 : i32
    %c0_i32_2 = arith.constant 0 : i32
    return %c0_i32, %c0_i32_0, %c0_i32_1 : i32, i32, i32
  }
  func.func @transform_4(%arg0: i32) -> (i32, i32) {
    %c0_i32 = arith.constant 0 : i32
    %c0_i32_0 = arith.constant 0 : i32
    %c0_i32_1 = arith.constant 0 : i32
    return %c0_i32, %c0_i32_0 : i32, i32
  }
  func.func @transform_5(%arg0: i32) -> (i32, i32) {
    %c0_i32 = arith.constant 0 : i32
    %c0_i32_0 = arith.constant 0 : i32
    %c0_i32_1 = arith.constant 0 : i32
    return %c0_i32, %c0_i32_0 : i32, i32
  }
  func.func @transform_6(%arg0: i32) -> (i32, i32) {
    %c0_i32 = arith.constant 0 : i32
    %c0_i32_0 = arith.constant 0 : i32
    %c0_i32_1 = arith.constant 0 : i32
    return %c0_i32, %c0_i32_0 : i32, i32
  }
  func.func @transform_7(%arg0: i32) -> (i32, i32, i32, i32) {
    %c0_i32 = arith.constant 0 : i32
    %c0_i32_0 = arith.constant 0 : i32
    %c0_i32_1 = arith.constant 0 : i32
    %c0_i32_2 = arith.constant 0 : i32
    return %arg0, %c0_i32, %c0_i32_0, %c0_i32_1 : i32, i32, i32, i32
  }
}

</mosaic_0001>

<bundles_post_ra>
// kernel: residual_block_forward.1
= control target key start
LH: loop header
LB: loop body
LE: loop exit
PB: predicated region body
PF: predicated region fallthrough
CT: control target
= control target key end

     0   :  { %s11992_s24 = smov 0   ;;  %s14755_s0 = inlined_call_operand.vmem [shape: bf16[2,18,18,128], index: 0, kind: input, shape index: {}]   ;;  %s14756_s1 = inlined_call_operand.vmem [shape: bf16[9,128,128], index: 1, kind: input, shape index: {}]   ;;  %s14757_s2 = inlined_call_operand.vmem [shape: f32[1,128], index: 2, kind: input, shape index: {}]   ;;  %s14758_s3 = inlined_call_operand.vmem [shape: bf16[9,128,128], index: 3, kind: input, shape index: {}]   ;;  %s14759_s4 = inlined_call_operand.vmem [shape: f32[1,128], index: 4, kind: input, shape index: {}]   ;;  %s14760_s5 = inlined_call_operand.vmem [shape: bf16[128,128], index: 5, kind: input, shape index: {}]   ;;  %s14761_s6 = inlined_call_operand.vmem [shape: f32[1,128], index: 6, kind: input, shape index: {}]   ;;  %s14762_s7 = inlined_call_operand.vmem [shape: f32[2,16,16,128], index: 7, kind: output, shape index: {}]  }
   0x1 LB: > { %s8887_s25 = sadd.s32 4294967295, %s11948_s24   ;;  %p8891_p0 = scmp.ge.s32.totalorder %s11948_s24, 1  ;;  %s11948_s24 = sphi %s11992_s24, %s17_s24  }
   0x2   : > { %p237_p1 = scmp.lt.s32.totalorder %s11948_s24, 3 }
   0x4   : > { %p238_p2 = pnand %p8891_p0, %p237_p1 }
   0x6   : > { %241 = sbr.rel (%p238_p2) target bundleno = 1633 (0x661), region = 48 }
   0xd   : > { %v11727_v0 = vld [vmem:[%s14756_s1 + $0x40] sm:$0xff]   ;;  %p269_p3 = scmp.lt.s32.totalorder %s8887_s25, 1  ;;  %v11728_v1 = vld [vmem:[%s14756_s1 + $0x48] sm:$0xff]   ;;  %v11729_v2 = vld [vmem:[%s14756_s1 + $0x50] sm:$0xff]   ;;  %vm344_vm0 = vsmask.f32 3328 }
   0xe   : > { %10213 = vmatprep.subr.bf16.mxu0 %v11727_v0  ;;  %v11730_v3 = vld [vmem:[%s14756_s1 + $0x58] sm:$0xff]   ;;  %vm345_vm1 = vsmask.f32 7440  ;;  %v11731_v17 = vld [vmem:[%s14756_s1 + $0x60] sm:$0xff]   ;;  %v14808_v25 = vmov 0  ;;  %v11732_v36 = vld [vmem:[%s14756_s1 + $0x68] sm:$0xff]  }
   0xf   : > { %s14945_s25 = smov (!%p269_p3, %s8887_s25), 1  ;;  %10214 = vmatpush3.bf16.msra.mxu0 %v11727_v0  ;;  %vm12047_vm2 = vmor %vm344_vm0, %vm345_vm1  ;;  %v11733_v56 = vld [vmem:[%s14756_s1 + $0x70] sm:$0xff]   ;;  %vm1374_vm3 = vcmask 1042432   ;;  %vm1375_vm4 = vcmask 1046532  }
  0x10   : > { %10215 = vmatprep.subr.bf16.mxu0 %v11728_v1  ;;  %s11717_s9 = smul.u32 216, %s14945_s25  ;;  %v14809_v25 = vsel %vm12047_vm2, 4294967295, %v14808_v25  ;;  %vm12380_vm5 = vmor %vm1374_vm3, %vm1375_vm4  ;;  %s9756_s16 = sshll.u32 %s14945_s25, 8 }
  0x11   : > { %14810 = vst [vmem:[#allocation3_spill] sm:$0xff] %v14809_v25  ;;  %s14647_s19 = scalar_lea.vmem %s14762_s7, %s9756_s16 }
  0x12   : > { %s12015_s12 = scalar_lea.vmem %s14755_s0, %s11717_s9 }
  0x13   : > { %10216 = vmatpush3.bf16.msra.mxu0 %v11728_v1  ;;  %v12021_v4 = vld [vmem:[%s12015_s12] sm:$0xf]  ;;  %v12024_v5 = vld [vmem:[%s12015_s12 + $0x4] sm:$0xf]  ;;  %v328_v6 = vld [vmem:[%s12015_s12 + $0x8] sm:$0x1] }
  0x14   : > { %10217 = vmatprep.subr.bf16.mxu0 %v11729_v2  ;;  %v348_v7 = vshrl.u32 %v12021_v4, 16  ;;  %v351_v8 = vshll.u32 %v12021_v4, 16  ;;  %v357_v9 = vshll.u32 %v12024_v5, 16  ;;  %v361_v10 = vshrl.u32 %v12024_v5, 16  ;;  %v12032_v12 = vld [vmem:[%s12015_s12 + $0xc] sm:$0xf] }
  0x15   : > { %v367_v11 = vshll.u32 %v328_v6, 16  ;;  %v12035_v15 = vld [vmem:[%s12015_s12 + $0x10] sm:$0xf]  ;;  %v329_v16 = vld [vmem:[%s12015_s12 + $0x14] sm:$0x1]  ;;  %v372_v20 = vshrl.u32 %v12032_v12, 16 }
  0x16   : > { %v350_v13 = vrot.slane %v348_v7, 4  ;;  %v353_v14 = vrot.slane %v351_v8, 5  ;;  %v359_v18 = vrot.slane %v357_v9, 5  ;;  %v363_v19 = vrot.slane %v361_v10, 4  ;;  %v12052_v30 = vld [vmem:[%s12015_s12 + $0x18] sm:$0xf] }
  0x17   : > { %10218 = vmatpush3.bf16.msra.mxu0 %v11729_v2  ;;  %v375_v22 = vshll.u32 %v12032_v12, 16  ;;  %v381_v23 = vshll.u32 %v12035_v15, 16  ;;  %v385_v24 = vshrl.u32 %v12035_v15, 16  ;;  %v369_v27 = vrot.slane %v367_v11, 5  ;;  %v12055_v35 = vld [vmem:[%s12015_s12 + $0x1c] sm:$0xf] }
  0x18   : > { %10219 = vmatprep.subr.bf16.mxu0 %v11730_v3  ;;  %v354_v21 = vor.u32 %v353_v14, %v350_v13  ;;  %v364_v26 = vor.u32 %v363_v19, %v359_v18  ;;  %v374_v28 = vrot.slane %v372_v20, 4  ;;  %v391_v29 = vshll.u32 %v329_v16, 16  ;;  %v330_v44 = vld [vmem:[%s12015_s12 + $0x20] sm:$0x1]  ;;  %v12067_v46 = vld [vmem:[%s12015_s12 + $0x24] sm:$0xf] }
  0x19   : > { %v377_v32 = vrot.slane %v375_v22, 5  ;;  %v383_v33 = vrot.slane %v381_v23, 5  ;;  %v387_v34 = vrot.slane %v385_v24, 4  ;;  %v396_v39 = vshrl.u32 %v12052_v30, 16  ;;  %v12073_v51 = vld [vmem:[%s12015_s12 + $0x28] sm:$0xf] }
  0x1a   : > { %v355_v31 = vrot.slane %v354_v21, 4  ;;  %v365_v37 = vrot.slane %v364_v26, 4  ;;  %v393_v38 = vrot.slane %v391_v29, 5  ;;  %v399_v40 = vshll.u32 %v12052_v30, 16  ;;  %v12084_v63 = vld [vmem:[%s12015_s12 + $0x2c] sm:$0x1] }
  0x1b   : > { %10220 = vmatpush3.bf16.msra.mxu0 %v11730_v3  ;;  %v378_v42 = vor.u32 %v377_v32, %v374_v28  ;;  %v388_v43 = vor.u32 %v387_v34, %v383_v33  ;;  %v405_v45 = vshll.u32 %v12055_v35, 16  ;;  %v398_v48 = vrot.slane %v396_v39, 4  ;;  %v12089_v2 = vld [vmem:[%s12015_s12 + $0x30] sm:$0xf]  ;;  %v12094_v9 = vld [vmem:[%s12015_s12 + $0x34] sm:$0xf] }
  0x1c   : > { %10221 = vmatprep.subr.bf16.mxu0 %v11731_v17  ;;  %v360_v41 = vsel %vm12047_vm2, %v355_v31, %v359_v18  ;;  %v370_v47 = vsel %vm12047_vm2, %v365_v37, %v369_v27  ;;  %v401_v49 = vrot.slane %v399_v40, 5  ;;  %v409_v50 = vshrl.u32 %v12055_v35, 16  ;;  %v12098_v16 = vld [vmem:[%s12015_s12 + $0x38] sm:$0x1]  ;;  %v12108_v22 = vld [vmem:[%s12015_s12 + $0x3c] sm:$0xf] }
  0x1d   : > { %v8911_v52 = vcombine.low %v360_v41, %v370_v47  ;;  %v379_v53 = vrot.slane %v378_v42, 4  ;;  %v389_v54 = vrot.slane %v388_v43, 4  ;;  %v407_v55 = vrot.slane %v405_v45, 5  ;;  %v11735_v39 = vld [vmem:[%s14756_s1] sm:$0xff]  }
  0x1e   : > { %v402_v57 = vor.u32 %v401_v49, %v398_v48  ;;  %v411_v58 = vrot.slane %v409_v50, 4  ;;  %v415_v59 = vshll.u32 %v330_v44, 16  ;;  %v420_v60 = vshrl.u32 %v12067_v46, 16  ;;  %v12126_v48 = vld [vmem:[%s12015_s12 + $0x44] sm:$0x1] }
  0x1f   : > { %10222 = vmatpush3.bf16.msra.mxu0 %v11731_v17  ;;  %10229 = vmatprep.mubr.bf16.mxu0 %v8911_v52  ;;  %v384_v61 = vsel %vm12047_vm2, %v379_v53, %v383_v33  ;;  %v394_v62 = vsel %vm12047_vm2, %v389_v54, %v393_v38  ;;  %v423_v0 = vshll.u32 %v12067_v46, 16  ;;  %v429_v1 = vshll.u32 %v12073_v51, 16  ;;  %v11734_v17 = vld [vmem:[%s14756_s1 + $0x78] sm:$0xff]   ;;  %v12116_v38 = vld [vmem:[%s12015_s12 + $0x40] sm:$0xf] }
  0x20   : > { %10223 = vmatprep.subr.bf16.mxu0 %v11732_v36  ;;  %v12091_v3 = vcombine.low %v384_v61, %v394_v62  ;;  %v403_v6 = vrot.slane %v402_v57, 4  ;;  %v412_v7 = vor.u32 %v411_v58, %v407_v55  ;;  %v417_v8 = vrot.slane %v415_v59, 5  ;;  %v12130_v50 = vld [vmem:[%s12015_s12 + $0x48] sm:$0xf] }
  0x21   : > { %v422_v10 = vrot.slane %v420_v60, 4  ;;  %v425_v11 = vrot.slane %v423_v0, 5  ;;  %v431_v13 = vrot.slane %v429_v1, 5  ;;  %v433_v14 = vshrl.u32 %v12073_v51, 16  ;;  %v11736_v62 = vld [vmem:[%s14756_s1 + $0x8] sm:$0xff]  }
  0x22   : > { %v408_v18 = vsel %vm12047_vm2, %v403_v6, %v407_v55  ;;  %v413_v19 = vrot.slane %v412_v7, 4  ;;  %v439_v20 = vshll.u32 %v12084_v63, 16  ;;  %v444_v21 = vshrl.u32 %v12089_v2, 16 }
  0x23   : > { %10224 = vmatpush3.bf16.msra.mxu0 %v11732_v36  ;;  %v426_v23 = vor.u32 %v425_v11, %v422_v10  ;;  %v435_v24 = vrot.slane %v433_v14, 4  ;;  %v447_v26 = vshll.u32 %v12089_v2, 16  ;;  %v453_v27 = vshll.u32 %v12094_v9, 16  ;;  %v12146_v11 = vld [vmem:[%s12015_s12 + $0x50] sm:$0x1] }
  0x24   : > { %10225 = vmatprep.subr.bf16.mxu0 %v11733_v56  ;;  %v418_v28 = vsel %vm12047_vm2, %v413_v19, %v417_v8  ;;  %v441_v29 = vrot.slane %v439_v20, 5  ;;  %v446_v31 = vrot.slane %v444_v21, 4  ;;  %v457_v32 = vshrl.u32 %v12094_v9, 16  ;;  %v12155_v20 = vld [vmem:[%s12015_s12 + $0x54] sm:$0xf] }
  0x25   : > { %v8913_v33 = vcombine.low %v408_v18, %v418_v28  ;;  %v427_v34 = vrot.slane %v426_v23, 4  ;;  %v436_v36 = vor.u32 %v435_v24, %v431_v13  ;;  %v449_v37 = vrot.slane %v447_v26, 5 }
  0x26   : > { %v455_v40 = vrot.slane %v453_v27, 5  ;;  %v459_v41 = vrot.slane %v457_v32, 4  ;;  %v463_v42 = vshll.u32 %v12098_v16, 16  ;;  %v468_v43 = vshrl.u32 %v12108_v22, 16  ;;  %v12161_v27 = vld [vmem:[%s12015_s12 + $0x58] sm:$0xf] }
  0x27   : > { %10226 = vmatpush3.bf16.msra.mxu0 %v11733_v56  ;;  %v432_v44 = vsel %vm12047_vm2, %v427_v34, %v431_v13  ;;  %v437_v45 = vrot.slane %v436_v36, 4  ;;  %v450_v47 = vor.u32 %v449_v37, %v446_v31  ;;  %v471_v49 = vshll.u32 %v12108_v22, 16  ;;  %v12134_v56 = vld [vmem:[%s12015_s12 + $0x4c] sm:$0xf]  ;;  %v12166_v34 = vld [vmem:[%s12015_s12 + $0x5c] sm:$0x1] }
  0x28   : > { %10227 = vmatprep.subr.bf16.mxu0 %v11734_v17  ;;  %v460_v52 = vor.u32 %v459_v41, %v455_v40  ;;  %v465_v53 = vrot.slane %v463_v42, 5  ;;  %v470_v54 = vrot.slane %v468_v43, 4  ;;  %v477_v55 = vshll.u32 %v12116_v38, 16 }
  0x29   : > { %v442_v57 = vsel %vm12047_vm2, %v437_v45, %v441_v29  ;;  %v451_v58 = vrot.slane %v450_v47, 4  ;;  %v473_v59 = vrot.slane %v471_v49, 5  ;;  %v481_v60 = vshrl.u32 %v12116_v38, 16 }
  0x2a   : > { %v8914_v61 = vcombine.low %v432_v44, %v442_v57  ;;  %v461_v0 = vrot.slane %v460_v52, 4  ;;  %v479_v1 = vrot.slane %v477_v55, 5  ;;  %v487_v6 = vshll.u32 %v12126_v48, 16 }
  0x2b   : > { %10228 = vmatpush3.bf16.msra.mxu0 %v11734_v17  ;;  %v456_v7 = vsel %vm12047_vm2, %v451_v58, %v455_v40  ;;  %v474_v8 = vor.u32 %v473_v59, %v470_v54  ;;  %v483_v10 = vrot.slane %v481_v60, 4  ;;  %v492_v13 = vshrl.u32 %v12130_v50, 16  ;;  %v11738_v59 = vld [vmem:[%s14756_s1 + $0x18] sm:$0xff]  }
  0x2c   : > { %10261 = vmatprep.subr.bf16.mxu0 %v11735_v39  ;;  %v466_v14 = vsel %vm12047_vm2, %v461_v0, %v465_v53  ;;  %v489_v17 = vrot.slane %v487_v6, 5  ;;  %v495_v18 = vshll.u32 %v12130_v50, 16  ;;  %v501_v19 = vshll.u32 %v12134_v56, 16  ;;  %v12180_v53 = vld [vmem:[%s12015_s12 + $0x64] sm:$0xf] }
  0x2d   : > { %v8915_v21 = vcombine.low %v456_v7, %v466_v14  ;;  %v475_v23 = vrot.slane %v474_v8, 4  ;;  %v484_v24 = vor.u32 %v483_v10, %v479_v1  ;;  %v494_v26 = vrot.slane %v492_v13, 4  ;;  %v12195_v14 = vld [vmem:[%s12015_s12 + $0x6c] sm:$0xf] }
  0x2e   : > { %10230 = vmatmul.mubr.bf16.vlgmr.msra.gmra.mrb[0].mxu0 %v12091_v3  ;;  %v11737_v3 = vld [vmem:[%s14756_s1 + $0x10] sm:$0xff]   ;;  %v497_v28 = vrot.slane %v495_v18, 5  ;;  %v503_v29 = vrot.slane %v501_v19, 5  ;;  %v505_v31 = vshrl.u32 %v12134_v56, 16  ;;  %v511_v32 = vshll.u32 %v12146_v11, 16 }
  0x2f   : > { %10262 = vmatpush3.bf16.msra.mxu0 %v11735_v39  ;;  %10233 = vmatprep.mubr.bf16.mxu0 %v8913_v33  ;;  %v12169_v33 = vld [vmem:[%s12015_s12 + $0x60] sm:$0xf]  ;;  %v480_v36 = vsel %vm12047_vm2, %v475_v23, %v479_v1  ;;  %v485_v37 = vrot.slane %v484_v24, 4  ;;  %v516_v39 = vshrl.u32 %v12155_v20, 16  ;;  %v519_v40 = vshll.u32 %v12155_v20, 16 }
  0x30   : > { %10263 = vmatprep.subr.bf16.mxu0 %v11736_v62  ;;  %v498_v41 = vor.u32 %v497_v28, %v494_v26  ;;  %v507_v42 = vrot.slane %v505_v31, 4  ;;  %v513_v43 = vrot.slane %v511_v32, 5  ;;  %v525_v44 = vshll.u32 %v12161_v27, 16  ;;  %v12187_v1 = vld [vmem:[%s12015_s12 + $0x68] sm:$0x1] }
  0x31   : > { %v490_v45 = vsel %vm12047_vm2, %v485_v37, %v489_v17  ;;  %v518_v47 = vrot.slane %v516_v39, 4  ;;  %v521_v49 = vrot.slane %v519_v40, 5  ;;  %v529_v52 = vshrl.u32 %v12161_v27, 16  ;;  %14811 = vst [vmem:[#allocation4_spill] sm:$0xff] %v12187_v1  ;;  %v12198_v24 = vld [vmem:[%s12015_s12 + $0x70] sm:$0xf] }
  0x32   : > { %v8916_v54 = vcombine.low %v480_v36, %v490_v45  ;;  %v499_v55 = vrot.slane %v498_v41, 4  ;;  %v508_v57 = vor.u32 %v507_v42, %v503_v29  ;;  %v527_v58 = vrot.slane %v525_v44, 5  ;;  %v12210_v40 = vld [vmem:[%s12015_s12 + $0x74] sm:$0x1] }
  0x33   : > { %10264 = vmatpush3.bf16.msra.mxu0 %v11736_v62  ;;  %v522_v60 = vor.u32 %v521_v49, %v518_v47  ;;  %v531_v62 = vrot.slane %v529_v52, 4  ;;  %v535_v0 = vshll.u32 %v12166_v34, 16  ;;  %v540_v6 = vshrl.u32 %v12169_v33, 16  ;;  %14812 = vst [vmem:[#allocation5_spill] sm:$0xff] %v12210_v40  ;;  %v12219_v49 = vld [vmem:[%s12015_s12 + $0x78] sm:$0xf] }
  0x34   : > { %10265 = vmatprep.subr.bf16.mxu0 %v11737_v3  ;;  %v504_v7 = vsel %vm12047_vm2, %v499_v55, %v503_v29  ;;  %v509_v8 = vrot.slane %v508_v57, 4  ;;  %v543_v10 = vshll.u32 %v12169_v33, 16  ;;  %v549_v13 = vshll.u32 %v12180_v53, 16 }
  0x35   : > { %v523_v17 = vrot.slane %v522_v60, 4  ;;  %v532_v18 = vor.u32 %v531_v62, %v527_v58  ;;  %v537_v19 = vrot.slane %v535_v0, 5  ;;  %v542_v23 = vrot.slane %v540_v6, 4  ;;  %v12222_v60 = vld [vmem:[%s12015_s12 + $0x7c] sm:$0xf]  ;;  %v11740_v62 = vld [vmem:[%s14756_s1 + $0x28] sm:$0xff]  }
  0x36   : > { %10234 = vmatmul.mubr.bf16.gmra.mrb[4].mxu0 %v8914_v61  ;;  %v514_v61 = vsel %vm12047_vm2, %v509_v8, %v513_v43  ;;  %v545_v26 = vrot.slane %v543_v10, 5  ;;  %v551_v28 = vrot.slane %v549_v13, 5  ;;  %v553_v29 = vshrl.u32 %v12180_v53, 16  ;;  %v12229_v8 = vld [vmem:[%s12015_s12 + $0x80] sm:$0x1] }
  0x37   : > { %10237 = vmatprep.mubr.bf16.mxu0 %v8915_v21  ;;  %10266 = vmatpush3.bf16.msra.mxu0 %v11737_v3  ;;  %v11739_v21 = vld [vmem:[%s14756_s1 + $0x20] sm:$0xff]   ;;  %v8917_v3 = vcombine.low %v504_v7, %v514_v61  ;;  %v528_v31 = vsel %vm12047_vm2, %v523_v17, %v527_v58  ;;  %v533_v32 = vrot.slane %v532_v18, 4  ;;  %v559_v36 = vshll.u32 %v12187_v1, 16  ;;  %14813 = vst [vmem:[#allocation6_spill] sm:$0xff] %v12229_v8 }
  0x38   : > { %10267 = vmatprep.subr.bf16.mxu0 %v11738_v59  ;;  %v546_v37 = vor.u32 %v545_v26, %v542_v23  ;;  %v555_v39 = vrot.slane %v553_v29, 4  ;;  %v564_v41 = vshrl.u32 %v12195_v14, 16  ;;  %v567_v42 = vshll.u32 %v12195_v14, 16  ;;  %v12237_v29 = vld [vmem:[%s12015_s12 + $0x84] sm:$0xf] }
  0x39   : > { %v538_v43 = vsel %vm12047_vm2, %v533_v32, %v537_v19  ;;  %v561_v44 = vrot.slane %v559_v36, 5  ;;  %v573_v45 = vshll.u32 %v12198_v24, 16  ;;  %v577_v47 = vshrl.u32 %v12198_v24, 16  ;;  %v12243_v36 = vld [vmem:[%s12015_s12 + $0x88] sm:$0xf] }
  0x3a   : > { %v8918_v52 = vcombine.low %v528_v31, %v538_v43  ;;  %v547_v55 = vrot.slane %v546_v37, 4  ;;  %v556_v57 = vor.u32 %v555_v39, %v551_v28  ;;  %v566_v58 = vrot.slane %v564_v41, 4 }
  0x3b   : > { %10268 = vmatpush3.bf16.msra.mxu0 %v11738_v59  ;;  %v569_v59 = vrot.slane %v567_v42, 5  ;;  %v575_v0 = vrot.slane %v573_v45, 5  ;;  %v579_v6 = vrot.slane %v577_v47, 4  ;;  %v583_v7 = vshll.u32 %v12210_v40, 16  ;;  %v12250_v45 = vld [vmem:[%s12015_s12 + $0x8c] sm:$0x1] }
  0x3c   : > { %10269 = vmatprep.subr.bf16.mxu0 %v11739_v21  ;;  %v552_v10 = vsel %vm12047_vm2, %v547_v55, %v551_v28  ;;  %v557_v13 = vrot.slane %v556_v57, 4  ;;  %v588_v17 = vshrl.u32 %v12219_v49, 16  ;;  %v591_v18 = vshll.u32 %v12219_v49, 16  ;;  %14814 = vst [vmem:[#allocation7_spill] sm:$0xff] %v12250_v45  ;;  %v11742_v55 = vld [vmem:[%s14756_s1 + $0x38] sm:$0xff]  }
  0x3d   : > { %v570_v19 = vor.u32 %v569_v59, %v566_v58  ;;  %v580_v23 = vor.u32 %v579_v6, %v575_v0  ;;  %v585_v61 = vrot.slane %v583_v7, 5  ;;  %v597_v26 = vshll.u32 %v12222_v60, 16  ;;  %v12263_v7 = vld [vmem:[%s12015_s12 + $0x90] sm:$0xf] }
  0x3e   : > { %10238 = vmatmul.mubr.bf16.gmra.mrb[8].mxu0 %v8916_v54  ;;  %v562_v54 = vsel %vm12047_vm2, %v557_v13, %v561_v44  ;;  %v590_v31 = vrot.slane %v588_v17, 4  ;;  %v593_v28 = vrot.slane %v591_v18, 5  ;;  %v601_v32 = vshrl.u32 %v12222_v60, 16 }
  0x3f   : > { %10241 = vmatprep.mubr.bf16.mxu0 %v8917_v3  ;;  %10270 = vmatpush3.bf16.msra.mxu0 %v11739_v21  ;;  %v11741_v3 = vld [vmem:[%s14756_s1 + $0x30] sm:$0xff]   ;;  %v8919_v21 = vcombine.low %v552_v10, %v562_v54  ;;  %v571_v37 = vrot.slane %v570_v19, 4  ;;  %v581_v39 = vrot.slane %v580_v23, 4  ;;  %v599_v41 = vrot.slane %v597_v26, 5  ;;  %v12270_v54 = vld [vmem:[%s12015_s12 + $0x98] sm:$0x1] }
  0x40   : > { %10271 = vmatprep.subr.bf16.mxu0 %v11740_v62  ;;  %v594_v42 = vor.u32 %v593_v28, %v590_v31  ;;  %v603_v43 = vrot.slane %v601_v32, 4  ;;  %v607_v44 = vshll.u32 %v12229_v8, 16  ;;  %v612_v47 = vshrl.u32 %v12237_v29, 16  ;;  %v12266_v10 = vld [vmem:[%s12015_s12 + $0x94] sm:$0xf]  ;;  %14815 = vst [vmem:[#allocation8_spill] sm:$0xff] %v12270_v54 }
  0x41   : > { %v576_v57 = vsel %vm12047_vm2, %v571_v37, %v575_v0  ;;  %v586_v58 = vsel %vm12047_vm2, %v581_v39, %v585_v61  ;;  %v615_v59 = vshll.u32 %v12237_v29, 16  ;;  %v621_v6 = vshll.u32 %v12243_v36, 16  ;;  %v12273_v31 = vld [vmem:[%s12015_s12 + $0x9c] sm:$0xf] }
  0x42   : > { %v8920_v13 = vcombine.low %v576_v57, %v586_v58  ;;  %v595_v17 = vrot.slane %v594_v42, 4  ;;  %v604_v18 = vor.u32 %v603_v43, %v599_v41  ;;  %v609_v19 = vrot.slane %v607_v44, 5 }
  0x43   : > { %10272 = vmatpush3.bf16.msra.mxu0 %v11740_v62  ;;  %v614_v0 = vrot.slane %v612_v47, 4  ;;  %v617_v23 = vrot.slane %v615_v59, 5  ;;  %v623_v26 = vrot.slane %v621_v6, 5  ;;  %v625_v61 = vshrl.u32 %v12243_v36, 16  ;;  %v12282_v47 = vld [vmem:[%s12015_s12 + $0xa0] sm:$0xf] }
  0x44   : > { %10273 = vmatprep.subr.bf16.mxu0 %v11741_v3  ;;  %v600_v62 = vsel %vm12047_vm2, %v595_v17, %v599_v41  ;;  %v605_v28 = vrot.slane %v604_v18, 4  ;;  %v631_v32 = vshll.u32 %v12250_v45, 16  ;;  %v636_v37 = vshrl.u32 %v12263_v7, 16 }
  0x45   : > { %v618_v39 = vor.u32 %v617_v23, %v614_v0  ;;  %v627_v42 = vrot.slane %v625_v61, 4  ;;  %v639_v43 = vshll.u32 %v12263_v7, 16  ;;  %v645_v44 = vshll.u32 %v12266_v10, 16 }
  0x46   : > { %10242 = vmatmul.mubr.bf16.gmra.mrb[12].mxu0 %v8918_v52  ;;  %v610_v52 = vsel %vm12047_vm2, %v605_v28, %v609_v19  ;;  %v633_v41 = vrot.slane %v631_v32, 5  ;;  %v638_v57 = vrot.slane %v636_v37, 4  ;;  %v649_v58 = vshrl.u32 %v12266_v10, 16  ;;  %v12298_v28 = vld [vmem:[%s12015_s12 + $0xa8] sm:$0xf] }
  0x47   : > { %10245 = vmatprep.mubr.bf16.mxu0 %v8919_v21  ;;  %10274 = vmatpush3.bf16.msra.mxu0 %v11741_v3  ;;  %v12290_v21 = vld [vmem:[%s14756_s1 + $0x80] sm:$0xff]   ;;  %v8921_v59 = vcombine.low %v600_v62, %v610_v52  ;;  %v619_v6 = vrot.slane %v618_v39, 4  ;;  %v628_v17 = vor.u32 %v627_v42, %v623_v26  ;;  %v641_v18 = vrot.slane %v639_v43, 5  ;;  %v12304_v39 = vld [vmem:[%s12015_s12 + $0xac] sm:$0xf] }
  0x48   : > { %10275 = vmatprep.subr.bf16.mxu0 %v11742_v55  ;;  %14816 = vst [vmem:[#allocation9_spill] sm:$0xff] %v12290_v21  ;;  %v12293_v3 = vld [vmem:[%s12015_s12 + $0xa4] sm:$0x1]  ;;  %v647_v0 = vrot.slane %v645_v44, 5  ;;  %v651_v23 = vrot.slane %v649_v58, 4  ;;  %v655_v19 = vshll.u32 %v12270_v54, 16 }
  0x49   : > { %14817 = vst [vmem:[#allocation10_spill] sm:$0xff] %v12293_v3  ;;  %v660_v61 = vshrl.u32 %v12273_v31, 16  ;;  %v624_v32 = vsel %vm12047_vm2, %v619_v6, %v623_v26  ;;  %v629_v37 = vrot.slane %v628_v17, 4  ;;  %v642_v45 = vor.u32 %v641_v18, %v638_v57  ;;  %v12312_v6 = vld [vmem:[%s12015_s12 + $0xb0] sm:$0x1] }
  0x4a   : > { %v663_v62 = vshll.u32 %v12273_v31, 16  ;;  %v652_v42 = vor.u32 %v651_v23, %v647_v0  ;;  %v657_v43 = vrot.slane %v655_v19, 5  ;;  %v669_v52 = vshll.u32 %v12282_v47, 16  ;;  %14818 = vst [vmem:[#allocation11_spill] sm:$0xff] %v12312_v6  ;;  %v12316_v23 = vld [vmem:[%s12015_s12 + $0xb4] sm:$0xf] }
  0x4b   : > { %10276 = vmatpush3.bf16.msra.mxu0 %v11742_v55  ;;  %v662_v44 = vrot.slane %v660_v61, 4  ;;  %v634_v58 = vsel %vm12047_vm2, %v629_v37, %v633_v41  ;;  %v643_v54 = vrot.slane %v642_v45, 4  ;;  %v673_v57 = vshrl.u32 %v12282_v47, 16 }
  0x4c   : > { %10309 = vmatprep.subr.bf16.mxu0 %v12290_v21  ;;  %v665_v26 = vrot.slane %v663_v62, 5  ;;  %v653_v17 = vrot.slane %v652_v42, 4  ;;  %v671_v55 = vrot.slane %v669_v52, 5  ;;  %v679_v18 = vshll.u32 %v12293_v3, 16  ;;  %v12326_v42 = vld [vmem:[%s12015_s12 + $0xb8] sm:$0xf] }
  0x4d   : > { %v8922_v19 = vcombine.low %v624_v32, %v634_v58  ;;  %v675_v8 = vrot.slane %v673_v57, 4  ;;  %v684_v41 = vshrl.u32 %v12298_v28, 16  ;;  %v648_v45 = vsel %vm12047_vm2, %v643_v54, %v647_v0 }
  0x4e   : > { %10246 = vmatmul.mubr.bf16.gmra.mrb[16].mxu0 %v8920_v13  ;;  %v666_v61 = vor.u32 %v665_v26, %v662_v44  ;;  %v658_v37 = vsel %vm12047_vm2, %v653_v17, %v657_v43  ;;  %v687_v13 = vshll.u32 %v12298_v28, 16  ;;  %v693_v62 = vshll.u32 %v12304_v39, 16 }
  0x4f   : > { %10249 = vmatprep.mubr.bf16.mxu0 %v8921_v59  ;;  %v676_v59 = vor.u32 %v675_v8, %v671_v55  ;;  %v681_v32 = vrot.slane %v679_v18, 5  ;;  %v686_v44 = vrot.slane %v684_v41, 4  ;;  %v697_v57 = vshrl.u32 %v12304_v39, 16  ;;  %v12335_v8 = vld [vmem:[%s12015_s12 + $0xbc] sm:$0x1] }
  0x50   : > { %v667_v52 = vrot.slane %v666_v61, 4  ;;  %v689_v58 = vrot.slane %v687_v13, 5  ;;  %v695_v26 = vrot.slane %v693_v62, 5  ;;  %v703_v54 = vshll.u32 %v12312_v6, 16 }
  0x51   : > { %v8923_v0 = vcombine.low %v648_v45, %v658_v37  ;;  %v677_v3 = vrot.slane %v676_v59, 4  ;;  %v708_v43 = vshrl.u32 %v12316_v23, 16  ;;  %v711_v17 = vshll.u32 %v12316_v23, 16 }
  0x52   : > { %v672_v21 = vsel %vm12047_vm2, %v667_v52, %v671_v55  ;;  %v690_v40 = vor.u32 %v689_v58, %v686_v44  ;;  %v699_v61 = vrot.slane %v697_v57, 4  ;;  %v717_v18 = vshll.u32 %v12326_v42, 16 }
  0x53   : > { %v705_v41 = vrot.slane %v703_v54, 5  ;;  %v710_v13 = vrot.slane %v708_v43, 4  ;;  %v713_v62 = vrot.slane %v711_v17, 5  ;;  %v721_v6 = vshrl.u32 %v12326_v42, 16  ;;  %v1341_v54 = vld [vmem:[%s12015_s12 + $0xb4] sm:$0xe] }
  0x54   : > { %v682_v45 = vsel %vm12047_vm2, %v677_v3, %v681_v32  ;;  %v691_v37 = vrot.slane %v690_v40, 4  ;;  %v700_v59 = vor.u32 %v699_v61, %v695_v26  ;;  %v719_v1 = vrot.slane %v717_v18, 5 }
  0x55   : > { %v714_v55 = vor.u32 %v713_v62, %v710_v13  ;;  %v723_v52 = vrot.slane %v721_v6, 4  ;;  %v727_v44 = vshll.u32 %v12335_v8, 16  ;;  %v8924_v43 = vcombine.low %v672_v21, %v682_v45 }
  0x56   : > { %10250 = vmatmul.mubr.bf16.gmra.mrb[20].mxu0 %v8922_v19  ;;  %v696_v58 = vsel %vm12047_vm2, %v691_v37, %v695_v26  ;;  %v701_v57 = vrot.slane %v700_v59, 4  ;;  %v1331_v59 = vld [vmem:[%s12015_s12 + $0x3c] sm:$0xe]  ;;  %v8937_v45 = vcombine.low %v12052_v30, %v12055_v35  ;;  %v1417_v30 = vrot.slane %v12126_v48, 5  ;;  %v11748_v48 = vld [vmem:[%s14756_s1 + $0x88] sm:$0xff]  }
  0x57   : > { %10253 = vmatprep.mubr.bf16.mxu0 %v8923_v0  ;;  %v715_v19 = vrot.slane %v714_v55, 4  ;;  %v724_v17 = vor.u32 %v723_v52, %v719_v1  ;;  %v729_v61 = vrot.slane %v727_v44, 5  ;;  %v1329_v52 = vld [vmem:[%s12015_s12 + $0x24] sm:$0xe]  ;;  %v1463_v6 = vrot.slane %v12266_v10, 5 }
  0x58   : > { %v706_v3 = vsel %vm12047_vm2, %v701_v57, %v705_v41  ;;  %v8962_v57 = vrot.slane %v1329_v52, 9  ;;  %v1333_v52 = vld [vmem:[%s12015_s12 + $0x54] sm:$0xe]  ;;  %v1477_v25 = vrot.slane %v12304_v39, 5 }
  0x59   : > { %v8925_v0 = vcombine.low %v696_v58, %v706_v3  ;;  %v725_v21 = vrot.slane %v724_v17, 4  ;;  %v720_v44 = vsel %vm12047_vm2, %v715_v19, %v719_v1  ;;  %v1400_v17 = vrot.slane %v12073_v51, 5  ;;  %v1330_v3 = vld [vmem:[%s12015_s12 + $0x30] sm:$0xe] }
  0x5a   : > { %v8935_v1 = vcombine.low %v12021_v4, %v12024_v5  ;;  %v1410_v5 = vrot.slane %v12098_v16, 5  ;;  %v1421_v16 = vrot.slane %v12134_v56, 5 }
  0x5b   : > { %v730_v58 = vsel %vm12047_vm2, %v725_v21, %v729_v61  ;;  %v12389_v19 = vsel %vm12380_vm5, %v8962_v57, %v1400_v17  ;;  %v1403_v21 = vrot.slane %v12084_v63, 5  ;;  %v8963_v61 = vrot.slane %v1330_v3, 9 }
  0x5c   : > { %v8926_v37 = vcombine.low %v720_v44, %v730_v58  ;;  %v8936_v44 = vcombine.low %v12032_v12, %v12035_v15  ;;  %v1407_v58 = vrot.slane %v12094_v9, 5  ;;  %v8964_v57 = vrot.slane %v1331_v59, 9 }
  0x5d   : > { %v1424_v59 = vrot.slane %v12146_v11, 5  ;;  %v1423_v11 = vrot.slane %v1421_v16, 4 }
  0x5e   : > { %10254 = vmatmul.mubr.bf16.gmra.mrb[24].mxu0 %v8924_v43  ;;  %v1402_v43 = vrot.slane %v1400_v17, 4  ;;  %v12407_v12 = vsel %vm12380_vm5, %v8963_v61, %v1407_v58  ;;  %v1409_v15 = vrot.slane %v1407_v58, 4  ;;  %v1414_v17 = vrot.slane %v12116_v38, 5 }
  0x5f   : > { %10257 = vmatprep.mubr.bf16.mxu0 %v8925_v0  ;;  %v1332_v0 = vld [vmem:[%s12015_s12 + $0x48] sm:$0xe]  ;;  %v8966_v61 = vrot.slane %v1333_v52, 9  ;;  %v1428_v58 = vrot.slane %v12161_v27, 5 }
  0x60   : > { %v12400_v4 = vsel %vm12380_vm5, %v1402_v43, %v1403_v21  ;;  %v8965_v35 = vrot.slane %v1332_v0, 9  ;;  %v12416_v3 = vsel %vm12380_vm5, %v1409_v15, %v1410_v5  ;;  %v12420_v43 = vsel %vm12380_vm5, %v8964_v57, %v1414_v17  ;;  %v1336_v5 = vld [vmem:[%s12015_s12 + $0x78] sm:$0xe] }
  0x61   : > { %v1416_v21 = vrot.slane %v1414_v17, 4  ;;  %v1431_v57 = vrot.slane %v12166_v34, 5  ;;  %v1435_v17 = vrot.slane %v12180_v53, 5  ;;  %v1430_v34 = vrot.slane %v1428_v58, 4 }
  0x62   : > { %v12427_v0 = vsel %vm12380_vm5, %v8965_v35, %v1421_v16  ;;  %v12444_v16 = vsel %vm12380_vm5, %v1423_v11, %v1424_v59  ;;  %v14821_v35 = vld [vmem:[#allocation4_spill] sm:$0xff]  ;;  %v1442_v11 = vrot.slane %v12198_v24, 5 }
  0x63   : > { %v12433_v15 = vsel %vm12380_vm5, %v1416_v21, %v1417_v30  ;;  %v12448_v30 = vsel %vm12380_vm5, %v8966_v61, %v1428_v58  ;;  %v1437_v62 = vrot.slane %v1435_v17, 4  ;;  %v1438_v41 = vrot.slane %v14821_v35, 5  ;;  %v14822_v58 = vld [vmem:[#allocation5_spill] sm:$0xff]  ;;  %v14824_v21 = vld [vmem:[#allocation6_spill] sm:$0xff] }
  0x64   : > { %v12460_v59 = vsel %vm12380_vm5, %v1430_v34, %v1431_v57  ;;  %v1445_v13 = vrot.slane %v14822_v58, 5  ;;  %v1449_v35 = vrot.slane %v12222_v60, 5  ;;  %v1338_v57 = vld [vmem:[%s12015_s12 + $0x90] sm:$0xe]  ;;  %v14823_v34 = vld [vmem:[#allocation9_spill] sm:$0xff]  ;;  %v1444_v58 = vrot.slane %v1442_v11, 4 }
  0x65   : > { %v1452_v18 = vrot.slane %v14824_v21, 5  ;;  %v14825_v21 = vld [vmem:[#allocation7_spill] sm:$0xff]  ;;  %v8971_v32 = vrot.slane %v1338_v57, 9 }
  0x66   : > { %10258 = vmatmul.mubr.bf16.gmra.mrb[28].mxu0 %v8926_v37  ;;  %v1334_v37 = vld [vmem:[%s12015_s12 + $0x60] sm:$0xe]  ;;  %v1459_v26 = vrot.slane %v14825_v21, 5  ;;  %v14827_v21 = vld [vmem:[#allocation8_spill] sm:$0xff] }
  0x67   : > { %10277 = vmatprep.mubr.bf16.mxu0 %v8935_v1  ;;  %v1335_v1 = vld [vmem:[%s12015_s12 + $0x6c] sm:$0xe]  ;;  %v8967_v52 = vrot.slane %v1334_v37, 9  ;;  %v1337_v37 = vld [vmem:[%s12015_s12 + $0x84] sm:$0xe]  ;;  %v12511_v57 = vsel %vm12380_vm5, %v8971_v32, %v1463_v6  ;;  %v1466_v40 = vrot.slane %v14827_v21, 5 }
  0x68   : > { %v8968_v61 = vrot.slane %v1335_v1, 9  ;;  %v1456_v1 = vrot.slane %v12243_v36, 5 }
  0x69   : > { %v12455_v63 = vsel %vm12380_vm5, %v8967_v52, %v1435_v17  ;;  %v12468_v52 = vsel %vm12380_vm5, %v1437_v62, %v1438_v41  ;;  %v8969_v17 = vrot.slane %v1336_v5, 9  ;;  %v1339_v41 = vld [vmem:[%s12015_s12 + $0x9c] sm:$0xe]  ;;  %v11751_v62 = vld [vmem:[%s14756_s1 + $0x90] sm:$0xff]   ;;  %v1451_v5 = vrot.slane %v1449_v35, 4 }
  0x6e   : > { %10278 = vmatmul.mubr.bf16.vlgmr.msra.gmra.mrb[0].mxu0 %v8936_v44  ;;  %v12477_v44 = vsel %vm12380_vm5, %v8968_v61, %v1442_v11  ;;  %v1340_v61 = vld [vmem:[%s12015_s12 + $0xa8] sm:$0xe]  ;;  %v12492_v11 = vsel %vm12380_vm5, %v1444_v58, %v1445_v13  ;;  %v1465_v58 = vrot.slane %v1463_v6, 4 }
  0x6f   : > { %10310 = vmatpush3.bf16.msra.mxu0 %v14823_v34  ;;  %10281 = vmatprep.mubr.bf16.mxu0 %v8937_v45  ;;  %v12486_v45 = vsel %vm12380_vm5, %v8969_v17, %v1449_v35  ;;  %v8970_v34 = vrot.slane %v1337_v37, 9  ;;  %v12500_v17 = vsel %vm12380_vm5, %v1451_v5, %v1452_v18  ;;  %v1458_v35 = vrot.slane %v1456_v1, 4  ;;  %v11754_v18 = vld [vmem:[%s14756_s1 + $0x98] sm:$0xff]  }
  0x70   : > { %10311 = vmatprep.subr.bf16.mxu0 %v11748_v48  ;;  %14826 = vst [vmem:[#allocation4_spill] sm:$0xff] %v12500_v17  ;;  %v1470_v5 = vrot.slane %v12282_v47, 5  ;;  %v12527_v6 = vsel %vm12380_vm5, %v1465_v58, %v1466_v40  ;;  %v8973_v21 = vrot.slane %v1340_v61, 9  ;;  %v14829_v17 = vcombine.low %v12067_v46, %v12073_v51  ;;  %v11757_v58 = vld [vmem:[%s14756_s1 + $0xa0] sm:$0xff]  }
  0x71   : > { %v12504_v37 = vsel %vm12380_vm5, %v8970_v34, %v1456_v1  ;;  %v12519_v1 = vsel %vm12380_vm5, %v1458_v35, %v1459_v26  ;;  %v14828_v34 = vld [vmem:[#allocation10_spill] sm:$0xff]  ;;  %v9003_v26 = vcombine.low %v12511_v57, %v12527_v6  ;;  %v14831_v40 = vcombine.low %v12089_v2, %v12094_v9 }
  0x72   : > { %v1473_v13 = vrot.slane %v14828_v34, 5  ;;  %v1472_v35 = vrot.slane %v1470_v5, 4  ;;  %v14830_v34 = vld [vmem:[#allocation11_spill] sm:$0xff]  ;;  %v12545_v61 = vsel %vm12380_vm5, %v8973_v21, %v1477_v25  ;;  %v1479_v46 = vrot.slane %v1477_v25, 4 }
  0x73   : > { %10312 = vmatpush3.bf16.msra.mxu0 %v11748_v48  ;;  %v8972_v48 = vrot.slane %v1339_v41, 9  ;;  %v1480_v32 = vrot.slane %v14830_v34, 5  ;;  %v8974_v51 = vrot.slane %v1341_v54, 9  ;;  %v1487_v2 = vrot.slane %v12335_v8, 5  ;;  %v11766_v34 = vld [vmem:[%s14756_s1 + $0xb8] sm:$0xff]  }
  0x74   : > { %10313 = vmatprep.subr.bf16.mxu0 %v11751_v62  ;;  %v14832_v21 = vcombine.low %v12108_v22, %v12116_v38  ;;  %v14834_v22 = vcombine.low %v12155_v20, %v12161_v27  ;;  %v14835_v38 = vcombine.low %v12169_v33, %v12180_v53  ;;  %v14837_v20 = vcombine.low %v12219_v49, %v12222_v60  ;;  %v11927_v27 = vld [vmem:[%s12015_s12 + $0x4] sm:$0xf]  ;;  %v1326_v53 = vld [vmem:[%s12015_s12] sm:$0xe]  ;;  %v1327_v60 = vld [vmem:[%s12015_s12 + $0xc] sm:$0xe] }
  0x75   : > { %v12537_v41 = vsel %vm12380_vm5, %v8972_v48, %v1470_v5  ;;  %v12553_v48 = vsel %vm12380_vm5, %v1472_v35, %v1473_v13  ;;  %v12560_v25 = vsel %vm12380_vm5, %v1479_v46, %v1480_v32  ;;  %v11760_v5 = vld [vmem:[%s14756_s1 + $0xa8] sm:$0xff]   ;;  %v14833_v35 = vcombine.low %v12130_v50, %v12134_v56  ;;  %v11767_v50 = vld [vmem:[%s14756_s1 + $0xc0] sm:$0xff]  }
  0x76   : > { %10282 = vmatmul.mubr.bf16.gmra.mrb[4].mxu0 %v14829_v17  ;;  %v1484_v17 = vrot.slane %v12326_v42, 5  ;;  %v9004_v9 = vcombine.low %v12537_v41, %v12553_v48  ;;  %v9005_v13 = vcombine.low %v12545_v61, %v12560_v25  ;;  %v14836_v56 = vcombine.low %v12195_v14, %v12198_v24  ;;  %v9092_v25 = vld [vmem:[%s12015_s12 + $0x20] sm:$0x1] }
  0x77   : > { %10285 = vmatprep.mubr.bf16.mxu0 %v14831_v40  ;;  %10314 = vmatpush3.bf16.msra.mxu0 %v11751_v62  ;;  %v1379_v33 = vrot.slane %v11927_v27, 5  ;;  %v11928_v40 = vld [vmem:[%s12015_s12 + $0x8] sm:$0x1]  ;;  %v14839_v14 = vcombine.low %v12263_v7, %v12266_v10  ;;  %v8959_v24 = vrot.slane %v1326_v53, 9  ;;  %v14840_v49 = vcombine.low %v12273_v31, %v12282_v47 }
  0x78   : > { %10315 = vmatprep.subr.bf16.mxu0 %v11754_v18  ;;  %v12564_v54 = vsel %vm12380_vm5, %v8974_v51, %v1484_v17  ;;  %v1486_v62 = vrot.slane %v1484_v17, 4  ;;  %v1382_v46 = vrot.slane %v11928_v40, 5  ;;  %v14838_v51 = vcombine.low %v12237_v29, %v12243_v36  ;;  %v11930_v29 = vld [vmem:[%s12015_s12 + $0x1c] sm:$0xf] }
  0x79   : > { %v1381_v17 = vrot.slane %v1379_v33, 4  ;;  %v1393_v36 = vrot.slane %v11930_v29, 5  ;;  %v1380_v7 = vsel %vm12380_vm5, %v8959_v24, %v1379_v33  ;;  %v11772_v24 = vld [vmem:[%s14756_s1 + $0xe8] sm:$0xff]  }
  0x7a   : > { %v12573_v8 = vsel %vm12380_vm5, %v1486_v62, %v1487_v2  ;;  %v11929_v2 = vld [vmem:[%s12015_s12 + $0x10] sm:$0xf] }
  0x7b   : > { %10316 = vmatpush3.bf16.msra.mxu0 %v11754_v18  ;;  %v9006_v32 = vcombine.low %v12564_v54, %v12573_v8  ;;  %v11763_v18 = vld [vmem:[%s14756_s1 + $0xb0] sm:$0xff]   ;;  %v1386_v62 = vrot.slane %v11929_v2, 5  ;;  %v1383_v10 = vsel %vm12380_vm5, %v1381_v17, %v1382_v46  ;;  %v11770_v46 = vld [vmem:[%s14756_s1 + $0xd8] sm:$0xff]   ;;  %v11778_v8 = vld [vmem:[%s12015_s12 + $0x24] sm:$0xff]  }
  0x7c   : > { %10317 = vmatprep.subr.bf16.mxu0 %v11757_v58  ;;  %v8991_v47 = vcombine.low %v1380_v7, %v1383_v10  ;;  %v9088_v17 = vld [vmem:[%s12015_s12 + $0x10] sm:$0xf] }
  0x7d   : > { %v11775_v7 = vld [vmem:[%s12015_s12 + $0xc] sm:$0xff]  }
  0x7e   : > { %10286 = vmatmul.mubr.bf16.gmra.mrb[8].mxu0 %v14832_v21  ;;  %v11931_v21 = vld [vmem:[%s12015_s12 + $0x14] sm:$0x1] }
  0x7f   : > { %10289 = vmatprep.mubr.bf16.mxu0 %v14833_v35  ;;  %10318 = vmatpush3.bf16.msra.mxu0 %v11757_v58  ;;  %v14841_v58 = vcombine.low %v12298_v28, %v12304_v39  ;;  %v1389_v31 = vrot.slane %v11931_v21, 5  ;;  %v8960_v35 = vrot.slane %v1327_v60, 9  ;;  %v1395_v28 = vrot.slane %v1393_v36, 4  ;;  %v11932_v39 = vld [vmem:[%s12015_s12 + $0x20] sm:$0x1] }
  0x80   : > { %10319 = vmatprep.subr.bf16.mxu0 %v11760_v5  ;;  %v9094_v21 = vld [vmem:[%s12015_s12 + $0x28] sm:$0xf] }
  0x83   : > { %10320 = vmatpush3.bf16.msra.mxu0 %v11760_v5  ;;  %v1328_v5 = vld [vmem:[%s12015_s12 + $0x18] sm:$0xe] }
  0x84   : > { %10321 = vmatprep.subr.bf16.mxu0 %v11763_v18 }
  0x86   : > { %10290 = vmatmul.mubr.bf16.gmra.mrb[12].mxu0 %v14834_v22  ;;  %v1396_v22 = vrot.slane %v11932_v39, 5 }
  0x87   : > { %10293 = vmatprep.mubr.bf16.mxu0 %v14835_v38  ;;  %10322 = vmatpush3.bf16.msra.mxu0 %v11763_v18  ;;  %v1388_v18 = vrot.slane %v1386_v62, 4  ;;  %v14842_v38 = vcombine.low %v12316_v23, %v12326_v42  ;;  %v11768_v23 = vld [vmem:[%s14756_s1 + $0xc8] sm:$0xff]   ;;  %v11769_v42 = vld [vmem:[%s14756_s1 + $0xd0] sm:$0xff]  }
  0x88   : > { %10323 = vmatprep.subr.bf16.mxu0 %v11766_v34  ;;  %v1397_v33 = vsel %vm12380_vm5, %v1395_v28, %v1396_v22  ;;  %v11776_v28 = vld [vmem:[%s12015_s12 + $0x18] sm:$0xff]  }
  0x8b   : > { %10324 = vmatpush3.bf16.msra.mxu0 %v11766_v34  ;;  %v8961_v34 = vrot.slane %v1328_v5, 9  ;;  %v9093_v5 = vld [vmem:[%s12015_s12 + $0x24] sm:$0xf] }
  0x8c   : > { %10357 = vmatprep.subr.bf16.mxu0 %v11767_v50  ;;  %v2295_v54 = vshrl.u32 %v9093_v5, 16 }
  0x8d   : > { %v1394_v27 = vsel %vm12380_vm5, %v8961_v34, %v1393_v36  ;;  %v9096_v34 = vld [vmem:[%s12015_s12 + $0x30] sm:$0xf] }
  0x8e   : > { %10294 = vmatmul.mubr.bf16.gmra.mrb[16].mxu0 %v14836_v56  ;;  %v1387_v56 = vsel %vm12380_vm5, %v8960_v35, %v1386_v62  ;;  %v8993_v40 = vcombine.low %v1394_v27, %v1397_v33  ;;  %v9089_v62 = vld [vmem:[%s12015_s12 + $0x14] sm:$0x1]  ;;  %v2308_v27 = vshrl.u32 %v9094_v21, 16  ;;  %v2319_v33 = vshrl.u32 %v9096_v34, 16 }
  0x8f   : > { %10297 = vmatprep.mubr.bf16.mxu0 %v14837_v20  ;;  %v1390_v20 = vsel %vm12380_vm5, %v1388_v18, %v1389_v31  ;;  %v2266_v48 = vshll.u32 %v9089_v62, 16  ;;  %v2290_v18 = vshll.u32 %v9092_v25, 16  ;;  %v11795_v25 = vld [vmem:[%s14756_s1 + $0x130] sm:$0xff]  }
  0x90   : > { %v8992_v53 = vcombine.low %v1387_v56, %v1390_v20  ;;  %v2304_v56 = vshll.u32 %v9094_v21, 16  ;;  %v11780_v20 = vld [vmem:[%s14756_s1 + $0x108] sm:$0xff]   ;;  %v12799_v21 = vld [vmem:[%s12015_s12 + $0x64] sm:$0xf] }
  0x91   : > { %v12723_v22 = vrot.slane %v2266_v48, 5 }
  0x96   : > { %10298 = vmatmul.mubr.bf16.gmra.mrb[20].mxu0 %v14838_v51  ;;  %v14843_v51 = vcombine.low %v12389_v19, %v12400_v4  ;;  %v14845_v19 = vcombine.low %v12420_v43, %v12433_v15  ;;  %v14846_v4 = vcombine.low %v12427_v0, %v12444_v16  ;;  %v14847_v43 = vcombine.low %v12448_v30, %v12460_v59  ;;  %v11777_v15 = vld [vmem:[%s14756_s1 + $0x100] sm:$0xff]   ;;  %v14850_v30 = vld [vmem:[#allocation4_spill] sm:$0xff] }
  0x97   : > { %10301 = vmatprep.mubr.bf16.mxu0 %v14839_v14  ;;  %v14844_v14 = vcombine.low %v12407_v12, %v12416_v3  ;;  %v11773_v12 = vld [vmem:[%s14756_s1 + $0xf0] sm:$0xff]   ;;  %v11774_v3 = vld [vmem:[%s14756_s1 + $0xf8] sm:$0xff]   ;;  %v14848_v0 = vcombine.low %v12455_v63, %v12468_v52  ;;  %v14849_v16 = vcombine.low %v12477_v44, %v12492_v11  ;;  %v14851_v59 = vcombine.low %v12486_v45, %v14850_v30  ;;  %v9087_v52 = vld [vmem:[%s12015_s12 + $0xc] sm:$0xf] }
  0x98   : > { %v14852_v63 = vcombine.low %v12504_v37, %v12519_v1  ;;  %v2247_v60 = vshrl.u32 %v9087_v52, 16  ;;  %v2250_v44 = vshll.u32 %v9087_v52, 16  ;;  %v2256_v11 = vshll.u32 %v9088_v17, 16  ;;  %v9091_v37 = vld [vmem:[%s12015_s12 + $0x1c] sm:$0xf] }
  0x99   : > { %v2284_v10 = vshrl.u32 %v9091_v37, 16 }
  0x9a   : > { %v2249_v57 = vrot.slane %v2247_v60, 4  ;;  %v2252_v1 = vrot.slane %v2250_v44, 5  ;;  %v12704_v6 = vrot.slane %v2256_v11, 5  ;;  %v12762_v60 = vld [vmem:[%s12015_s12 + $0x50] sm:$0x1] }
  0x9b   : > { %v2286_v35 = vrot.slane %v2284_v10, 4 }
  0x9c   : > { %v2253_v41 = vor.u32 %v2252_v1, %v2249_v57 }
  0x9e   : > { %10302 = vmatmul.mubr.bf16.gmra.mrb[24].mxu0 %v14840_v49  ;;  %v9090_v49 = vld [vmem:[%s12015_s12 + $0x18] sm:$0xf]  ;;  %v12715_v31 = vrot.slane %v2253_v41, 4  ;;  %v9099_v41 = vld [vmem:[%s12015_s12 + $0x3c] sm:$0xf] }
  0x9f   : > { %10305 = vmatprep.mubr.bf16.mxu0 %v14841_v58  ;;  %v2260_v58 = vshrl.u32 %v9088_v17, 16  ;;  %v2271_v2 = vshrl.u32 %v9090_v49, 16  ;;  %v2274_v45 = vshll.u32 %v9090_v49, 16  ;;  %v12759_v49 = vld [vmem:[%s12015_s12 + $0x4c] sm:$0xf] }
  0xa1   : > { %v2273_v29 = vrot.slane %v2271_v2, 4  ;;  %v2276_v36 = vrot.slane %v2274_v45, 5  ;;  %v3053_v2 = vrot.slane %v12759_v49, 5  ;;  %v3056_v45 = vrot.slane %v12762_v60, 5 }
  0xa6   : > { %10306 = vmatmul.mubr.bf16.gmra.mrb[28].mxu0 %v14842_v38 }
  0xa7   : > { %10325 = vmatprep.mubr.bf16.mxu0 %v8991_v47 }
  0xae   : > { %10326 = vmatmul.mubr.bf16.vlgmr.msra.gmra.mrb[0].mxu0 %v8992_v53 }
  0xaf   : > { %10358 = vmatpush3.bf16.msra.mxu0 %v11767_v50  ;;  %10329 = vmatprep.mubr.bf16.mxu0 %v8993_v40  ;;  %v11771_v50 = vld [vmem:[%s14756_s1 + $0xe0] sm:$0xff]   ;;  %v9097_v40 = vld [vmem:[%s12015_s12 + $0x34] sm:$0xf] }
  0xb0   : > { %10359 = vmatprep.subr.bf16.mxu0 %v11768_v23  ;;  %v2332_v11 = vshrl.u32 %v9097_v40, 16 }
  0xb3   : > { %10360 = vmatpush3.bf16.msra.mxu0 %v11768_v23  ;;  %v9095_v23 = vld [vmem:[%s12015_s12 + $0x2c] sm:$0x1] }
  0xb4   : > { %10361 = vmatprep.subr.bf16.mxu0 %v11769_v42 }
  0xb6   : > { %10330 = vmatmul.mubr.bf16.gmra.mrb[4].mxu0 %v14843_v51  ;;  %v12739_v51 = vrot.slane %v2290_v18, 5  ;;  %v2343_v18 = vshrl.u32 %v9099_v41, 16 }
  0xb7   : > { %10333 = vmatprep.mubr.bf16.mxu0 %v14844_v14  ;;  %10362 = vmatpush3.bf16.msra.mxu0 %v11769_v42  ;;  %v11783_v42 = vld [vmem:[%s14756_s1 + $0x110] sm:$0xff]   ;;  %v2297_v14 = vrot.slane %v2295_v54, 4  ;;  %v3067_v54 = vrot.slane %v12799_v21, 5 }
  0xb8   : > { %10363 = vmatprep.subr.bf16.mxu0 %v11770_v46 }
  0xbb   : > { %10364 = vmatpush3.bf16.msra.mxu0 %v11770_v46 }
  0xbc   : > { %10365 = vmatprep.subr.bf16.mxu0 %v11771_v50 }
  0xbe   : > { %10334 = vmatmul.mubr.bf16.gmra.mrb[8].mxu0 %v14845_v19  ;;  %v12742_v19 = vrot.slane %v2304_v56, 5 }
  0xbf   : > { %10337 = vmatprep.mubr.bf16.mxu0 %v14846_v4  ;;  %10366 = vmatpush3.bf16.msra.mxu0 %v11771_v50  ;;  %v2310_v4 = vrot.slane %v2308_v27, 4  ;;  %v11787_v27 = vld [vmem:[%s12015_s12 + $0x6c] sm:$0xff]  }
  0xc0   : > { %10367 = vmatprep.subr.bf16.mxu0 %v11772_v24 }
  0xc3   : > { %10368 = vmatpush3.bf16.msra.mxu0 %v11772_v24  ;;  %v11779_v24 = vld [vmem:[%s12015_s12 + $0x30] sm:$0xff]  }
  0xc4   : > { %10369 = vmatprep.subr.bf16.mxu0 %v11773_v12 }
  0xc6   : > { %10338 = vmatmul.mubr.bf16.gmra.mrb[12].mxu0 %v14847_v43  ;;  %v11781_v43 = vld [vmem:[%s12015_s12 + $0x3c] sm:$0xff]  }
  0xc7   : > { %10341 = vmatprep.mubr.bf16.mxu0 %v14848_v0  ;;  %10370 = vmatpush3.bf16.msra.mxu0 %v11773_v12  ;;  %v2322_v12 = vshll.u32 %v9096_v34, 16  ;;  %v2314_v0 = vshll.u32 %v9095_v23, 16  ;;  %v2346_v34 = vshll.u32 %v9099_v41, 16  ;;  %v12815_v23 = vld [vmem:[%s12015_s12 + $0x48] sm:$0xf] }
  0xc8   : > { %10371 = vmatprep.subr.bf16.mxu0 %v11774_v3  ;;  %v12873_v41 = vld [vmem:[%s12015_s12 + $0x94] sm:$0xf] }
  0xc9   : > { %v12754_v52 = vrot.slane %v2322_v12, 5  ;;  %v12770_v57 = vrot.slane %v2314_v0, 5  ;;  %v12834_v12 = vrot.slane %v2343_v18, 4  ;;  %v12842_v0 = vrot.slane %v2346_v34, 5  ;;  %v12878_v18 = vld [vmem:[%s12015_s12 + $0x98] sm:$0x1] }
  0xca   : > { %v9185_v34 = vld [vmem:[%s12015_s12 + $0x84] sm:$0xe] }
  0xcb   : > { %10372 = vmatpush3.bf16.msra.mxu0 %v11774_v3  ;;  %v2328_v3 = vshll.u32 %v9097_v40, 16  ;;  %v11798_v40 = vld [vmem:[%s14756_s1 + $0x138] sm:$0xff]  }
  0xcc   : > { %10405 = vmatprep.subr.bf16.mxu0 %v11777_v15 }
  0xcd   : > { %v12756_v17 = vrot.slane %v2328_v3, 5  ;;  %v12837_v3 = vld [vmem:[%s12015_s12 + $0x7c] sm:$0xf] }
  0xce   : > { %10342 = vmatmul.mubr.bf16.gmra.mrb[16].mxu0 %v14849_v16  ;;  %v11786_v16 = vld [vmem:[%s14756_s1 + $0x118] sm:$0xff]  }
  0xcf   : > { %10345 = vmatprep.mubr.bf16.mxu0 %v14851_v59  ;;  %v9098_v59 = vld [vmem:[%s12015_s12 + $0x38] sm:$0x1] }
  0xd0   : > { %v2338_v62 = vshll.u32 %v9098_v59, 16  ;;  %v3081_v59 = vrot.slane %v12837_v3, 5 }
  0xd6   : > { %10346 = vmatmul.mubr.bf16.gmra.mrb[20].mxu0 %v14852_v63  ;;  %v11789_v63 = vld [vmem:[%s14756_s1 + $0x120] sm:$0xff]  }
  0xd7   : > { %10349 = vmatprep.mubr.bf16.mxu0 %v9003_v26  ;;  %v2262_v26 = vrot.slane %v2260_v58, 4  ;;  %v9180_v58 = vld [vmem:[%s12015_s12 + $0x48] sm:$0xe] }
  0xd8   : > { %v9196_v1 = vrot.slane %v9180_v58, 9 }
  0xd9   : > { %v2263_v61 = vor.u32 %v2262_v26, %v12704_v6  ;;  %v11784_v26 = vld [vmem:[%s12015_s12 + $0x54] sm:$0xff]  }
  0xda   : > { %v12780_v48 = vsel %vm12380_vm5, %v9196_v1, %v3053_v2  ;;  %v3083_v1 = vrot.slane %v3081_v59, 4 }
  0xdb   : > { %v12721_v39 = vrot.slane %v2263_v61, 4 }
  0xde   : > { %10350 = vmatmul.mubr.bf16.gmra.mrb[24].mxu0 %v9004_v9  ;;  %v2280_v9 = vshll.u32 %v9091_v37, 16  ;;  %v11782_v37 = vld [vmem:[%s12015_s12 + $0x48] sm:$0xff]  }
  0xdf   : > { %10353 = vmatprep.mubr.bf16.mxu0 %v9005_v13  ;;  %v2277_v13 = vor.u32 %v2276_v36, %v2273_v29  ;;  %v3055_v29 = vrot.slane %v3053_v2, 4  ;;  %v11792_v36 = vld [vmem:[%s14756_s1 + $0x128] sm:$0xff]  }
  0xe0   : > { %v12717_v47 = vrot.slane %v2280_v9, 5  ;;  %v12783_v9 = vld [vmem:[%s12015_s12 + $0x40] sm:$0xf] }
  0xe1   : > { %v12725_v38 = vrot.slane %v2277_v13, 4  ;;  %v12787_v10 = vsel %vm12380_vm5, %v3055_v29, %v3056_v45  ;;  %v2352_v56 = vshll.u32 %v12783_v9, 16  ;;  %v11790_v45 = vld [vmem:[%s12015_s12 + $0x84] sm:$0xff]  }
  0xe2   : > { %v2287_v53 = vor.u32 %v2286_v35, %v12717_v47  ;;  %v12802_v35 = vld [vmem:[%s12015_s12 + $0x68] sm:$0x1] }
  0xe3   : > { %v12849_v58 = vrot.slane %v2352_v56, 5  ;;  %v12862_v29 = vld [vmem:[%s12015_s12 + $0x88] sm:$0xf]  ;;  %v9186_v56 = vld [vmem:[%s12015_s12 + $0x90] sm:$0xe] }
  0xe4   : > { %v12737_v46 = vrot.slane %v2287_v53, 4  ;;  %v3069_v53 = vrot.slane %v3067_v54, 4 }
  0xe6   : > { %10354 = vmatmul.mubr.bf16.gmra.mrb[28].mxu0 %v9006_v32  ;;  %v2298_v32 = vshll.u32 %v9093_v5, 16  ;;  %v12796_v5 = vrot.slane %v2332_v11, 4  ;;  %v11788_v11 = vld [vmem:[%s12015_s12 + $0x78] sm:$0xff]  }
  0xe7   : > { %10373 = vmatprep.mubr.bf16.mxu0 %v11775_v7  ;;  %v2311_v7 = vor.u32 %v2310_v4, %v12742_v19  ;;  %v12832_v4 = vrot.slane %v2338_v62, 5 }
  0xe8   : > { %v2300_v50 = vrot.slane %v2298_v32, 5  ;;  %v11785_v32 = vld [vmem:[%s12015_s12 + $0x60] sm:$0xff]  }
  0xe9   : > { %v12794_v13 = vrot.slane %v2311_v7, 4 }
  0xea   : > { %v2301_v30 = vor.u32 %v2300_v50, %v2297_v14 }
  0xec   : > { %v12764_v44 = vrot.slane %v2301_v30, 4  ;;  %v9184_v30 = vld [vmem:[%s12015_s12 + $0x78] sm:$0xe] }
  0xed   : > { %v9200_v2 = vrot.slane %v9184_v30, 9  ;;  %v11793_v30 = vld [vmem:[%s12015_s12 + $0x9c] sm:$0xff]  }
  0xee   : > { %10374 = vmatmul.mubr.bf16.vlgmr.msra.gmra.mrb[0].mxu0 %v11776_v28  ;;  %v9182_v28 = vld [vmem:[%s12015_s12 + $0x60] sm:$0xe] }
  0xef   : > { %10406 = vmatpush3.bf16.msra.mxu0 %v11777_v15  ;;  %10377 = vmatprep.mubr.bf16.mxu0 %v11778_v8  ;;  %v12745_v15 = vrot.slane %v2319_v33, 4  ;;  %v3070_v8 = vrot.slane %v12802_v35, 5  ;;  %v2356_v33 = vshrl.u32 %v12783_v9, 16  ;;  %v12859_v62 = vsel %vm12380_vm5, %v9200_v2, %v3081_v59 }
  0xf0   : > { %10407 = vmatprep.subr.bf16.mxu0 %v11780_v20  ;;  %14855 = vst [vmem:[#allocation6_spill] sm:$0xff] %v12859_v62 }
  0xf1   : > { %v12823_v14 = vsel %vm12380_vm5, %v3069_v53, %v3070_v8  ;;  %v2380_v8 = vshrl.u32 %v12759_v49, 16 }
  0xf2   : > { %14854 = vst [vmem:[#allocation9_spill] sm:$0xff] %v12823_v14 }
  0xf3   : > { %10408 = vmatpush3.bf16.msra.mxu0 %v11780_v20  ;;  %v9198_v20 = vrot.slane %v9182_v28, 9  ;;  %v3088_v28 = vrot.slane %v12862_v29, 5 }
  0xf4   : > { %10409 = vmatprep.subr.bf16.mxu0 %v11783_v42 }
  0xf5   : > { %v3090_v53 = vrot.slane %v3088_v28, 4 }
  0xf6   : > { %10378 = vmatmul.mubr.bf16.gmra.mrb[4].mxu0 %v11779_v24  ;;  %v12830_v24 = vld [vmem:[%s14756_s1 + $0x140] sm:$0xff]  }
  0xf7   : > { %10381 = vmatprep.mubr.bf16.mxu0 %v11781_v43  ;;  %10410 = vmatpush3.bf16.msra.mxu0 %v11783_v42  ;;  %v12819_v42 = vsel %vm12380_vm5, %v9198_v20, %v3067_v54  ;;  %v12840_v43 = vld [vmem:[%s12015_s12 + $0x80] sm:$0x1]  ;;  %v3095_v20 = vrot.slane %v12873_v41, 5 }
  0xf8   : > { %10411 = vmatprep.subr.bf16.mxu0 %v11786_v16  ;;  %14853 = vst [vmem:[#allocation5_spill] sm:$0xff] %v12819_v42  ;;  %v2293_v42 = vsel %vm12047_vm2, %v12737_v46, %v12739_v51 }
  0xfb   : > { %10412 = vmatpush3.bf16.msra.mxu0 %v11786_v16  ;;  %v11796_v16 = vld [vmem:[%s12015_s12 + $0xb4] sm:$0xff]  }
  0xfc   : > { %10413 = vmatprep.subr.bf16.mxu0 %v11789_v63 }
  0xfe   : > { %10382 = vmatmul.mubr.bf16.gmra.mrb[8].mxu0 %v11782_v37  ;;  %v12852_v37 = vrot.slane %v2356_v33, 4  ;;  %v11791_v33 = vld [vmem:[%s12015_s12 + $0x90] sm:$0xff]  }
  0xff   : > { %10385 = vmatprep.mubr.bf16.mxu0 %v11784_v26  ;;  %10414 = vmatpush3.bf16.msra.mxu0 %v11789_v63  ;;  %v3084_v63 = vrot.slane %v12840_v43, 5  ;;  %v12855_v26 = vld [vmem:[%s12015_s12 + $0x44] sm:$0x1] }
 0x100   : > { %10415 = vmatprep.subr.bf16.mxu0 %v11792_v36  ;;  %v2359_v46 = vor.u32 %v12852_v37, %v12849_v58  ;;  %v14867_v37 = vshll.u32 %v12855_v26, 16 }
 0x101   : > { %v12869_v7 = vsel %vm12380_vm5, %v3083_v1, %v3084_v63  ;;  %v12903_v1 = vld [vmem:[%s12015_s12 + $0xa0] sm:$0xf] }
 0x102   : > { %14856 = vst [vmem:[#allocation7_spill] sm:$0xff] %v12869_v7 }
 0x103   : > { %10416 = vmatpush3.bf16.msra.mxu0 %v11792_v36  ;;  %v12865_v36 = vld [vmem:[%s12015_s12 + $0x8c] sm:$0x1] }
 0x104   : > { %10417 = vmatprep.subr.bf16.mxu0 %v11795_v25  ;;  %v3091_v54 = vrot.slane %v12865_v36, 5 }
 0x106   : > { %10386 = vmatmul.mubr.bf16.gmra.mrb[12].mxu0 %v11785_v32  ;;  %v9201_v32 = vrot.slane %v9185_v34, 9  ;;  %v12896_v2 = vsel %vm12380_vm5, %v3090_v53, %v3091_v54  ;;  %v12906_v34 = vld [vmem:[%s12015_s12 + $0xa4] sm:$0x1]  ;;  %v9187_v53 = vld [vmem:[%s12015_s12 + $0x9c] sm:$0xe] }
 0x107   : > { %10389 = vmatprep.mubr.bf16.mxu0 %v11787_v27  ;;  %10418 = vmatpush3.bf16.msra.mxu0 %v11795_v25  ;;  %v3098_v27 = vrot.slane %v12878_v18, 5  ;;  %14858 = vst [vmem:[#allocation10_spill] sm:$0xff] %v12896_v2  ;;  %v3105_v25 = vrot.slane %v12906_v34, 5  ;;  %v2259_v2 = vsel %vm12047_vm2, %v12715_v31, %v12704_v6  ;;  %v11797_v6 = vld [vmem:[%s12015_s12 + $0xc0] sm:$0xff]  }
 0x108   : > { %10419 = vmatprep.subr.bf16.mxu0 %v11798_v40  ;;  %v12892_v63 = vsel %vm12380_vm5, %v9201_v32, %v3088_v28  ;;  %v12915_v32 = vld [vmem:[%s12015_s12 + $0xac] sm:$0xf] }
 0x109   : > { %14857 = vst [vmem:[#allocation8_spill] sm:$0xff] %v12892_v63  ;;  %v3109_v50 = vrot.slane %v12915_v32, 5 }
 0x10b   : > { %10420 = vmatpush3.bf16.msra.mxu0 %v11798_v40  ;;  %v9202_v40 = vrot.slane %v9186_v56, 9  ;;  %v9105_v56 = vld [vmem:[%s12015_s12 + $0x54] sm:$0xf] }
 0x10c   : > { %10453 = vmatprep.subr.bf16.mxu0 %v12830_v24 }
 0x10e   : > { %10390 = vmatmul.mubr.bf16.gmra.mrb[16].mxu0 %v11788_v11  ;;  %v3097_v11 = vrot.slane %v3095_v20, 4 }
 0x10f   : > { %10393 = vmatprep.mubr.bf16.mxu0 %v11790_v45  ;;  %v12900_v45 = vsel %vm12380_vm5, %v9202_v40, %v3095_v20  ;;  %v12920_v20 = vld [vmem:[%s12015_s12 + $0xb0] sm:$0x1]  ;;  %v3102_v40 = vrot.slane %v12903_v1, 5 }
 0x110   : > { %14859 = vst [vmem:[#allocation11_spill] sm:$0xff] %v12900_v45  ;;  %v12912_v28 = vsel %vm12380_vm5, %v3097_v11, %v3098_v27  ;;  %v9203_v27 = vrot.slane %v9187_v53, 9  ;;  %v9188_v11 = vld [vmem:[%s12015_s12 + $0xa8] sm:$0xe]  ;;  %v3112_v54 = vrot.slane %v12920_v20, 5  ;;  %v3111_v53 = vrot.slane %v3109_v50, 4 }
 0x111   : > { %14860 = vst [vmem:[#allocation4_spill] sm:$0xff] %v12912_v28  ;;  %v3104_v61 = vrot.slane %v3102_v40, 4  ;;  %v9204_v59 = vrot.slane %v9188_v11, 9 }
 0x113   : > { %v12939_v28 = vsel %vm12380_vm5, %v3104_v61, %v3105_v25  ;;  %v12943_v45 = vsel %vm12380_vm5, %v9204_v59, %v3109_v50  ;;  %v12957_v61 = vld [vmem:[%s12015_s12 + $0xbc] sm:$0x1]  ;;  %v12963_v25 = vsel %vm12380_vm5, %v3111_v53, %v3112_v54  ;;  %v12966_v59 = vld [vmem:[%s12015_s12 + $0xc4] sm:$0xf]  ;;  %v12977_v50 = vld [vmem:[%s12015_s12 + $0x58] sm:$0xf] }
 0x114   : > { %14862 = vst [vmem:[#allocation13_spill] sm:$0xff] %v12939_v28  ;;  %14863 = vst [vmem:[#allocation14_spill] sm:$0xff] %v12943_v45  ;;  %v3119_v7 = vrot.slane %v12957_v61, 5  ;;  %v2391_v54 = vshrl.u32 %v9105_v56, 16  ;;  %v9190_v28 = vld [vmem:[%s12015_s12 + $0xc0] sm:$0xe] }
 0x115   : > { %14865 = vst [vmem:[#allocation3_spill] sm:$0xff] %v12963_v25  ;;  %v2335_v25 = vor.u32 %v12796_v5, %v12756_v17 }
 0x116   : > { %10394 = vmatmul.mubr.bf16.gmra.mrb[20].mxu0 %v11791_v33  ;;  %v11794_v33 = vld [vmem:[%s12015_s12 + $0xa8] sm:$0xff]  }
 0x117   : > { %10397 = vmatprep.mubr.bf16.mxu0 %v11793_v30  ;;  %v12934_v30 = vsel %vm12380_vm5, %v9203_v27, %v3102_v40  ;;  %v2269_v40 = vsel %vm12047_vm2, %v12721_v39, %v12723_v22  ;;  %v12954_v27 = vld [vmem:[%s12015_s12 + $0xb8] sm:$0xf]  ;;  %v12971_v39 = vld [vmem:[%s12015_s12 + $0xc8] sm:$0x1]  ;;  %v9189_v22 = vld [vmem:[%s12015_s12 + $0xb4] sm:$0xe] }
 0x118   : > { %14861 = vst [vmem:[#allocation12_spill] sm:$0xff] %v12934_v30  ;;  %v9151_v31 = vcombine.low %v2259_v2, %v2269_v40  ;;  %v3116_v63 = vrot.slane %v12954_v27, 5  ;;  %v9205_v53 = vrot.slane %v9189_v22, 9  ;;  %v3123_v30 = vrot.slane %v12966_v59, 5 }
 0x119   : > { %v3126_v62 = vrot.slane %v12971_v39, 5  ;;  %v2283_v2 = vsel %vm12047_vm2, %v12725_v38, %v12717_v47  ;;  %v2394_v22 = vshll.u32 %v9105_v56, 16  ;;  %v2349_v47 = vor.u32 %v12842_v0, %v12834_v12 }
 0x11a   : > { %v3118_v40 = vrot.slane %v3116_v63, 4  ;;  %v12993_v45 = vsel %vm12380_vm5, %v9205_v53, %v3116_v63  ;;  %v3125_v14 = vrot.slane %v3123_v30, 4  ;;  %v2317_v12 = vsel %vm12047_vm2, %v12794_v13, %v12770_v57  ;;  %v9108_v57 = vld [vmem:[%s12015_s12 + $0x60] sm:$0xf] }
 0x11b   : > { %v13034_v63 = vrot.slane %v14867_v37, 5  ;;  %v2404_v56 = vshrl.u32 %v12977_v50, 16  ;;  %v2350_v13 = vrot.slane %v2349_v47, 4  ;;  %v2393_v37 = vrot.slane %v2391_v54, 4  ;;  %v9111_v47 = vld [vmem:[%s12015_s12 + $0x6c] sm:$0xf] }
 0x11c   : > { %v13003_v38 = vsel %vm12380_vm5, %v3118_v40, %v3119_v7  ;;  %v13019_v5 = vsel %vm12380_vm5, %v3125_v14, %v3126_v62  ;;  %v2400_v7 = vshll.u32 %v12977_v50, 16  ;;  %v14868_v14 = vshrl.u32 %v12815_v23, 16 }
 0x11d   : > { %14866 = vst [vmem:[#allocation15_spill] sm:$0xff] %v13019_v5  ;;  %v2360_v40 = vrot.slane %v2359_v46, 4  ;;  %v13048_v5 = vld [vmem:[%s12015_s12 + $0x5c] sm:$0x1]  ;;  %v2442_v46 = vshll.u32 %v9111_v47, 16 }
 0x11e   : > { %10398 = vmatmul.mubr.bf16.gmra.mrb[24].mxu0 %v11794_v33  ;;  %v2325_v33 = vor.u32 %v12754_v52, %v12745_v15  ;;  %v2307_v52 = vsel %vm12047_vm2, %v12764_v44, %v12742_v19  ;;  %v13030_v44 = vrot.slane %v2335_v25, 4  ;;  %v2369_v62 = vrot.slane %v14868_v14, 4 }
 0x11f   : > { %10401 = vmatprep.mubr.bf16.mxu0 %v11796_v16  ;;  %v9206_v16 = vrot.slane %v9190_v28, 9  ;;  %v14869_v28 = vshll.u32 %v12815_v23, 16  ;;  %v14870_v25 = vshll.u32 %v12759_v49, 16  ;;  %v2396_v14 = vrot.slane %v2394_v22, 5 }
 0x120   : > { %v13025_v0 = vrot.slane %v2325_v33, 4  ;;  %v2382_v33 = vrot.slane %v2380_v8, 4  ;;  %v9152_v19 = vcombine.low %v2283_v2, %v2293_v42  ;;  %v9153_v51 = vcombine.low %v2307_v52, %v2317_v12  ;;  %v13066_v52 = vld [vmem:[%s12015_s12 + $0x70] sm:$0xf] }
 0x121   : > { %v13007_v15 = vsel %vm12380_vm5, %v9206_v16, %v3123_v30  ;;  %v2372_v30 = vrot.slane %v14869_v28, 5  ;;  %v13044_v53 = vrot.slane %v14870_v25, 5  ;;  %v2386_v16 = vshll.u32 %v12762_v60, 16 }
 0x122   : > { %v2415_v23 = vshrl.u32 %v9108_v57, 16  ;;  %v2406_v28 = vrot.slane %v2404_v56, 4  ;;  %v2418_v49 = vshll.u32 %v9108_v57, 16  ;;  %v2424_v25 = vshll.u32 %v12799_v21, 16 }
 0x123   : > { %v2428_v8 = vshrl.u32 %v12799_v21, 16  ;;  %v2331_v60 = vsel %vm12047_vm2, %v13025_v0, %v12756_v17  ;;  %v2341_v42 = vsel %vm12047_vm2, %v13030_v44, %v12832_v4  ;;  %v2383_v54 = vor.u32 %v2382_v33, %v13044_v53  ;;  %v11800_v17 = vld [vmem:[%s14756_s1 + $0x148] sm:$0xff]  }
 0x124   : > { %v2397_v2 = vor.u32 %v2396_v14, %v2393_v37  ;;  %v2410_v22 = vshll.u32 %v13048_v5, 16  ;;  %v2439_v21 = vshrl.u32 %v9111_v47, 16  ;;  %v2355_v12 = vsel %vm12047_vm2, %v2350_v13, %v12849_v58 }
 0x125   : > { %v2365_v4 = vsel %vm12047_vm2, %v2360_v40, %v13034_v63  ;;  %v13077_v0 = vrot.slane %v2386_v16, 5  ;;  %v13080_v56 = vrot.slane %v2424_v25, 5  ;;  %v2430_v57 = vrot.slane %v2428_v8, 4 }
 0x126   : > { %10402 = vmatmul.mubr.bf16.gmra.mrb[28].mxu0 %v11797_v6  ;;  %v13050_v6 = vrot.slane %v2400_v7, 5  ;;  %v2417_v7 = vrot.slane %v2415_v23, 4  ;;  %v2384_v37 = vrot.slane %v2383_v54, 4  ;;  %v2448_v14 = vshll.u32 %v13066_v52, 16  ;;  %v11801_v23 = vld [vmem:[%s14756_s1 + $0x150] sm:$0xff]  }
 0x127   : > { %10421 = vmatprep.mubr.bf16.mxu0 %v9151_v31  ;;  %v2373_v31 = vor.u32 %v2372_v30, %v2369_v62  ;;  %v2420_v62 = vrot.slane %v2418_v49, 5  ;;  %v9114_v30 = vld [vmem:[%s12015_s12 + $0x78] sm:$0xf]  ;;  %v2452_v58 = vshrl.u32 %v13066_v52, 16  ;;  %v2398_v63 = vrot.slane %v2397_v2, 4 }
 0x128   : > { %v2407_v44 = vor.u32 %v2406_v28, %v13050_v6  ;;  %v2412_v13 = vrot.slane %v2410_v22, 5  ;;  %v2441_v40 = vrot.slane %v2439_v21, 4  ;;  %v2444_v16 = vrot.slane %v2442_v46, 5 }
 0x129   : > { %v2374_v33 = vrot.slane %v2373_v31, 4  ;;  %v2463_v47 = vshrl.u32 %v9114_v30, 16  ;;  %v2472_v28 = vshll.u32 %v12837_v3, 16  ;;  %v2476_v49 = vshrl.u32 %v12837_v3, 16 }
 0x12a   : > { %v2408_v25 = vrot.slane %v2407_v44, 4  ;;  %v2434_v8 = vshll.u32 %v12802_v35, 16  ;;  %v9154_v31 = vcombine.low %v2331_v60, %v2341_v42  ;;  %v9155_v54 = vcombine.low %v2355_v12, %v2365_v4  ;;  %v9117_v60 = vld [vmem:[%s12015_s12 + $0x84] sm:$0xf]  ;;  %v11802_v42 = vld [vmem:[%s14756_s1 + $0x158] sm:$0xff]  }
 0x12b   : > { %v13093_v2 = vrot.slane %v2448_v14, 5  ;;  %v2454_v22 = vrot.slane %v2452_v58, 4  ;;  %v2379_v21 = vsel %vm12047_vm2, %v2374_v33, %v13044_v53  ;;  %v2389_v3 = vsel %vm12047_vm2, %v2384_v37, %v13077_v0 }
 0x12c   : > { %v2403_v46 = vsel %vm12047_vm2, %v2398_v63, %v13050_v6  ;;  %v2445_v35 = vor.u32 %v2444_v16, %v2441_v40  ;;  %v13111_v53 = vrot.slane %v2472_v28, 5  ;;  %v2478_v4 = vrot.slane %v2476_v49, 4 }
 0x12d   : > { %v2413_v0 = vsel %vm12047_vm2, %v2408_v25, %v2412_v13  ;;  %v2436_v6 = vrot.slane %v2434_v8, 5  ;;  %v2487_v33 = vshrl.u32 %v9117_v60, 16  ;;  %v2490_v37 = vshll.u32 %v9117_v60, 16  ;;  %v11804_v60 = vld [vmem:[%s14756_s1 + $0x168] sm:$0xff]  }
 0x12e   : > { %10422 = vmatmul.mubr.bf16.vlgmr.msra.gmra.mrb[0].mxu0 %v9152_v19  ;;  %v2466_v19 = vshll.u32 %v9114_v30, 16  ;;  %v2496_v14 = vshll.u32 %v12862_v29, 16  ;;  %v2500_v58 = vshrl.u32 %v12862_v29, 16  ;;  %v2446_v63 = vrot.slane %v2445_v35, 4 }
 0x12f   : > { %10454 = vmatpush3.bf16.msra.mxu0 %v12830_v24  ;;  %10425 = vmatprep.mubr.bf16.mxu0 %v9153_v51  ;;  %v2421_v24 = vor.u32 %v2420_v62, %v2417_v7  ;;  %v2431_v51 = vor.u32 %v2430_v57, %v13080_v56  ;;  %v13105_v7 = vld [vmem:[%s12015_s12 + $0x74] sm:$0x1]  ;;  %v2455_v57 = vor.u32 %v2454_v22, %v13093_v2  ;;  %v2482_v16 = vshll.u32 %v12840_v43, 16 }
 0x130   : > { %10455 = vmatprep.subr.bf16.mxu0 %v11800_v17  ;;  %v2468_v12 = vrot.slane %v2466_v19, 5  ;;  %v2458_v30 = vshll.u32 %v13105_v7, 16  ;;  %v2479_v40 = vor.u32 %v2478_v4, %v13111_v53  ;;  %v9120_v19 = vld [vmem:[%s12015_s12 + $0x90] sm:$0xf]  ;;  %v9156_v28 = vcombine.low %v2379_v21, %v2389_v3 }
 0x131   : > { %v2422_v44 = vrot.slane %v2421_v24, 4  ;;  %v2432_v62 = vrot.slane %v2431_v51, 4  ;;  %v9157_v49 = vcombine.low %v2403_v46, %v2413_v0  ;;  %v2456_v25 = vrot.slane %v2455_v57, 4 }
 0x132   : > { %v2460_v24 = vrot.slane %v2458_v30, 5  ;;  %v2489_v51 = vrot.slane %v2487_v33, 4  ;;  %v2492_v8 = vrot.slane %v2490_v37, 5  ;;  %v13131_v43 = vrot.slane %v2496_v14, 5 }
 0x133   : > { %10456 = vmatpush3.bf16.msra.mxu0 %v11800_v17  ;;  %v2465_v17 = vrot.slane %v2463_v47, 4  ;;  %v11803_v47 = vld [vmem:[%s14756_s1 + $0x160] sm:$0xff]   ;;  %v2437_v29 = vsel %vm12047_vm2, %v2432_v62, %v2436_v6  ;;  %v2511_v22 = vshrl.u32 %v9120_v19, 16  ;;  %v2514_v35 = vshll.u32 %v9120_v19, 16 }
 0x134   : > { %10457 = vmatprep.subr.bf16.mxu0 %v11801_v23  ;;  %v2451_v21 = vsel %vm12047_vm2, %v2446_v63, %v13093_v2  ;;  %v2484_v46 = vrot.slane %v2482_v16, 5  ;;  %v2461_v0 = vsel %vm12047_vm2, %v2456_v25, %v2460_v24  ;;  %v2506_v2 = vshll.u32 %v12865_v36, 16  ;;  %v11806_v24 = vld [vmem:[%s14756_s1 + $0x178] sm:$0xff]  }
 0x135   : > { %v2469_v13 = vor.u32 %v2468_v12, %v2465_v17  ;;  %v2520_v17 = vshll.u32 %v12873_v41, 16  ;;  %v2548_v62 = vshrl.u32 %v12903_v1, 16  ;;  %v2493_v6 = vor.u32 %v2492_v8, %v2489_v51 }
 0x136   : > { %10426 = vmatmul.mubr.bf16.gmra.mrb[4].mxu0 %v9154_v31  ;;  %v9123_v31 = vld [vmem:[%s12015_s12 + $0x9c] sm:$0xf]  ;;  %v2513_v30 = vrot.slane %v2511_v22, 4  ;;  %v2508_v16 = vrot.slane %v2506_v2, 5  ;;  %v9129_v22 = vld [vmem:[%s12015_s12 + $0xb4] sm:$0xf] }
 0x137   : > { %10429 = vmatprep.mubr.bf16.mxu0 %v9155_v54  ;;  %10458 = vmatpush3.bf16.msra.mxu0 %v11801_v23  ;;  %v2427_v23 = vsel %vm12047_vm2, %v2422_v44, %v13080_v56  ;;  %v2502_v54 = vrot.slane %v2500_v58, 4  ;;  %v2470_v3 = vrot.slane %v2469_v13, 4  ;;  %v2480_v56 = vrot.slane %v2479_v40, 4 }
 0x138   : > { %10459 = vmatprep.subr.bf16.mxu0 %v11802_v42  ;;  %v2535_v12 = vshrl.u32 %v9123_v31, 16  ;;  %v2538_v4 = vshll.u32 %v9123_v31, 16  ;;  %v2544_v44 = vshll.u32 %v12903_v1, 16  ;;  %v9158_v33 = vcombine.low %v2427_v23, %v2437_v29  ;;  %v11805_v1 = vld [vmem:[%s14756_s1 + $0x170] sm:$0xff]  }
 0x139   : > { %v2503_v57 = vor.u32 %v2502_v54, %v13131_v43  ;;  %v2475_v37 = vsel %vm12047_vm2, %v2470_v3, %v13111_v53  ;;  %v2485_v36 = vsel %vm12047_vm2, %v2480_v56, %v2484_v46  ;;  %v13155_v14 = vrot.slane %v2520_v17, 5  ;;  %v9126_v53 = vld [vmem:[%s12015_s12 + $0xa8] sm:$0xf] }
 0x13a   : > { %v2537_v63 = vrot.slane %v2535_v12, 4  ;;  %v2540_v13 = vrot.slane %v2538_v4, 5  ;;  %v9159_v40 = vcombine.low %v2451_v21, %v2461_v0  ;;  %v2550_v19 = vrot.slane %v2548_v62, 4 }
 0x13b   : > { %10460 = vmatpush3.bf16.msra.mxu0 %v11802_v42  ;;  %v2524_v42 = vshrl.u32 %v12873_v41, 16  ;;  %v2516_v41 = vrot.slane %v2514_v35, 5  ;;  %v2530_v29 = vshll.u32 %v12878_v18, 16  ;;  %v9160_v25 = vcombine.low %v2475_v37, %v2485_v36 }
 0x13c   : > { %10461 = vmatprep.subr.bf16.mxu0 %v11803_v47  ;;  %v2541_v8 = vor.u32 %v2540_v13, %v2537_v63  ;;  %v2554_v31 = vshll.u32 %v12906_v34, 16  ;;  %v2559_v54 = vshrl.u32 %v9126_v53, 16  ;;  %v2562_v21 = vshll.u32 %v9126_v53, 16 }
 0x13d   : > { %v2526_v58 = vrot.slane %v2524_v42, 4  ;;  %v2517_v23 = vor.u32 %v2516_v41, %v2513_v30  ;;  %v2568_v18 = vshll.u32 %v12915_v32, 16  ;;  %v2572_v3 = vshrl.u32 %v12915_v32, 16  ;;  %v13180_v32 = vld [vmem:[%s14756_s1 + $0x180] sm:$0xff]  }
 0x13e   : > { %10430 = vmatmul.mubr.bf16.gmra.mrb[8].mxu0 %v9156_v28  ;;  %v2494_v28 = vrot.slane %v2493_v6, 4  ;;  %v2532_v34 = vrot.slane %v2530_v29, 5  ;;  %v2583_v17 = vshrl.u32 %v9129_v22, 16  ;;  %v2586_v42 = vshll.u32 %v9129_v22, 16 }
 0x13f   : > { %10433 = vmatprep.mubr.bf16.mxu0 %v9157_v49  ;;  %10462 = vmatpush3.bf16.msra.mxu0 %v11803_v47  ;;  %v13157_v47 = vrot.slane %v2544_v44, 5  ;;  %v2504_v49 = vrot.slane %v2503_v57, 4  ;;  %v2527_v51 = vor.u32 %v2526_v58, %v13155_v14  ;;  %v2592_v12 = vshll.u32 %v12954_v27, 16 }
 0x140   : > { %10463 = vmatprep.subr.bf16.mxu0 %v11804_v60  ;;  %v2499_v56 = vsel %vm12047_vm2, %v2494_v28, %v13131_v43  ;;  %v2596_v4 = vshrl.u32 %v12954_v27, 16  ;;  %v2542_v0 = vrot.slane %v2541_v8, 4  ;;  %v2556_v2 = vrot.slane %v2554_v31, 5 }
 0x141   : > { %v2551_v35 = vor.u32 %v2550_v19, %v13157_v47  ;;  %v2509_v46 = vsel %vm12047_vm2, %v2504_v49, %v2508_v16  ;;  %v2528_v43 = vrot.slane %v2527_v51, 4  ;;  %v2561_v44 = vrot.slane %v2559_v54, 4 }
 0x142   : > { %v2564_v6 = vrot.slane %v2562_v21, 5  ;;  %v2570_v57 = vrot.slane %v2568_v18, 5  ;;  %v2574_v30 = vrot.slane %v2572_v3, 4  ;;  %v9161_v41 = vcombine.low %v2499_v56, %v2509_v46 }
 0x143   : > { %10464 = vmatpush3.bf16.msra.mxu0 %v11804_v60  ;;  %v2518_v60 = vrot.slane %v2517_v23, 4  ;;  %v2552_v62 = vrot.slane %v2551_v35, 4  ;;  %v2588_v37 = vrot.slane %v2586_v42, 5  ;;  %v2594_v27 = vrot.slane %v2592_v12, 5  ;;  %v11933_v12 = vld [vmem:[%s12015_s12 + $0x10] sm:$0xf] }
 0x144   : > { %10465 = vmatprep.subr.bf16.mxu0 %v11805_v1  ;;  %v2598_v36 = vrot.slane %v2596_v4, 4  ;;  %v2533_v63 = vsel %vm12047_vm2, %v2528_v43, %v2532_v34  ;;  %v2578_v13 = vshll.u32 %v12920_v20, 16  ;;  %v2565_v19 = vor.u32 %v2564_v6, %v2561_v44  ;;  %v9175_v43 = vld [vmem:[%s12015_s12 + $0xc] sm:$0xe] }
 0x145   : > { %v2523_v58 = vsel %vm12047_vm2, %v2518_v60, %v13155_v14  ;;  %v2557_v16 = vsel %vm12047_vm2, %v2552_v62, %v2556_v2  ;;  %v2575_v53 = vor.u32 %v2574_v30, %v2570_v57  ;;  %v2616_v14 = vshll.u32 %v12966_v59, 16  ;;  %v11934_v30 = vld [vmem:[%s12015_s12 + $0x14] sm:$0x1] }
 0x146   : > { %10434 = vmatmul.mubr.bf16.gmra.mrb[12].mxu0 %v9158_v33  ;;  %v2585_v33 = vrot.slane %v2583_v17, 4  ;;  %v2620_v23 = vshrl.u32 %v12966_v59, 16  ;;  %v2602_v20 = vshll.u32 %v12957_v61, 16  ;;  %v2566_v8 = vrot.slane %v2565_v19, 4 }
 0x147   : > { %10437 = vmatprep.mubr.bf16.mxu0 %v9159_v40  ;;  %10466 = vmatpush3.bf16.msra.mxu0 %v11805_v1  ;;  %v9132_v1 = vld [vmem:[%s12015_s12 + $0xc0] sm:$0xf]  ;;  %v2547_v40 = vsel %vm12047_vm2, %v2542_v0, %v13157_v47  ;;  %v2576_v47 = vrot.slane %v2575_v53, 4  ;;  %v2580_v31 = vrot.slane %v2578_v13, 5  ;;  %v2618_v35 = vrot.slane %v2616_v14, 5 }
 0x148   : > { %10467 = vmatprep.subr.bf16.mxu0 %v11806_v24  ;;  %v2607_v28 = vshrl.u32 %v9132_v1, 16  ;;  %v2610_v49 = vshll.u32 %v9132_v1, 16  ;;  %v2589_v29 = vor.u32 %v2588_v37, %v2585_v33  ;;  %v9163_v51 = vcombine.low %v2547_v40, %v2557_v16  ;;  %v11936_v13 = vld [vmem:[%s12015_s12 + $0x28] sm:$0xf]  ;;  %v9177_v16 = vld [vmem:[%s12015_s12 + $0x24] sm:$0xe] }
 0x149   : > { %v2622_v21 = vrot.slane %v2620_v23, 4  ;;  %v2604_v56 = vrot.slane %v2602_v20, 5  ;;  %v2571_v59 = vsel %vm12047_vm2, %v2566_v8, %v2570_v57  ;;  %v2581_v61 = vsel %vm12047_vm2, %v2576_v47, %v2580_v31  ;;  %v11937_v14 = vld [vmem:[%s12015_s12 + $0x20] sm:$0x1]  ;;  %v11938_v20 = vld [vmem:[%s12015_s12 + $0x2c] sm:$0x1] }
 0x14a   : > { %v2609_v54 = vrot.slane %v2607_v28, 4  ;;  %v2612_v22 = vrot.slane %v2610_v49, 5  ;;  %v2590_v18 = vrot.slane %v2589_v29, 4  ;;  %v2626_v34 = vshll.u32 %v12971_v39, 16  ;;  %v11939_v47 = vld [vmem:[%s12015_s12 + $0x34] sm:$0xf] }
 0x14b   : > { %10468 = vmatpush3.bf16.msra.mxu0 %v11806_v24  ;;  %v2599_v24 = vor.u32 %v2598_v36, %v2594_v27  ;;  %v2623_v60 = vor.u32 %v2622_v21, %v2618_v35  ;;  %v3018_v4 = vrot.slane %v11933_v12, 5  ;;  %v9164_v0 = vcombine.low %v2571_v59, %v2581_v61 }
 0x14c   : > { %10501 = vmatprep.subr.bf16.mxu0 %v13180_v32  ;;  %v2613_v46 = vor.u32 %v2612_v22, %v2609_v54  ;;  %v2595_v17 = vsel %vm12047_vm2, %v2590_v18, %v2594_v27  ;;  %v2628_v6 = vrot.slane %v2626_v34, 5  ;;  %v9191_v57 = vrot.slane %v9175_v43, 9  ;;  %v11935_v27 = vld [vmem:[%s12015_s12 + $0x1c] sm:$0xf]  ;;  %v11808_v34 = vld [vmem:[%s14756_s1 + $0x188] sm:$0xff]  }
 0x14d   : > { %v2600_v3 = vrot.slane %v2599_v24, 4  ;;  %v2624_v62 = vrot.slane %v2623_v60, 4  ;;  %v3020_v39 = vrot.slane %v3018_v4, 4  ;;  %v3025_v36 = vrot.slane %v11935_v27, 5  ;;  %v9179_v18 = vld [vmem:[%s12015_s12 + $0x3c] sm:$0xe] }
 0x14e   : > { %10438 = vmatmul.mubr.bf16.gmra.mrb[16].mxu0 %v9160_v25  ;;  %v9162_v25 = vcombine.low %v2523_v58, %v2533_v63  ;;  %v2614_v44 = vrot.slane %v2613_v46, 4  ;;  %v3019_v1 = vsel %vm12380_vm5, %v9191_v57, %v3018_v4  ;;  %v9176_v63 = vld [vmem:[%s12015_s12 + $0x18] sm:$0xe]  ;;  %v3032_v40 = vrot.slane %v11936_v13, 5  ;;  %v11940_v46 = vld [vmem:[%s12015_s12 + $0x38] sm:$0x1] }
 0x14f   : > { %10441 = vmatprep.mubr.bf16.mxu0 %v9161_v41  ;;  %v2605_v42 = vsel %vm12047_vm2, %v2600_v3, %v2604_v56  ;;  %v3021_v41 = vrot.slane %v11934_v30, 5  ;;  %v2629_v37 = vsel %vm12047_vm2, %v2624_v62, %v2628_v6  ;;  %v9192_v28 = vrot.slane %v9176_v63, 9  ;;  %v11810_v30 = vld [vmem:[%s14756_s1 + $0x198] sm:$0xff]   ;;  %v11812_v63 = vld [vmem:[%s14756_s1 + $0x1a8] sm:$0xff]  }
 0x150   : > { %v9165_v2 = vcombine.low %v2595_v17, %v2605_v42  ;;  %v2619_v33 = vsel %vm12047_vm2, %v2614_v44, %v2618_v35  ;;  %v3027_v49 = vrot.slane %v3025_v36, 4  ;;  %v3028_v23 = vrot.slane %v11937_v14, 5  ;;  %v9178_v35 = vld [vmem:[%s12015_s12 + $0x30] sm:$0xe] }
 0x151   : > { %v3022_v58 = vsel %vm12380_vm5, %v3020_v39, %v3021_v41  ;;  %v9166_v19 = vcombine.low %v2619_v33, %v2629_v37  ;;  %v9193_v29 = vrot.slane %v9177_v16, 9  ;;  %v3034_v24 = vrot.slane %v3032_v40, 4  ;;  %v9183_v37 = vld [vmem:[%s12015_s12 + $0x6c] sm:$0xe]  ;;  %v14876_v14 = vld [vmem:[#allocation7_spill] sm:$0xff] }
 0x152   : > { %v9223_v53 = vcombine.low %v3019_v1, %v3022_v58  ;;  %v3029_v8 = vsel %vm12380_vm5, %v3027_v49, %v3028_v23  ;;  %v3039_v31 = vrot.slane %v11939_v47, 5  ;;  %v3046_v21 = vrot.slane %v12783_v9, 5  ;;  %v14875_v49 = vld [vmem:[#allocation6_spill] sm:$0xff]  ;;  %v14884_v47 = vld [vmem:[#allocation12_spill] sm:$0xff] }
 0x153   : > { %v3033_v54 = vsel %vm12380_vm5, %v9193_v29, %v3032_v40  ;;  %v9194_v59 = vrot.slane %v9178_v35, 9  ;;  %v3042_v60 = vrot.slane %v11940_v46, 5  ;;  %v9195_v17 = vrot.slane %v9179_v18, 9  ;;  %v14878_v29 = vld [vmem:[#allocation8_spill] sm:$0xff]  ;;  %v14888_v35 = vld [vmem:[#allocation3_spill] sm:$0xff] }
 0x154   : > { %v3041_v61 = vrot.slane %v3039_v31, 4  ;;  %v3048_v42 = vrot.slane %v3046_v21, 4  ;;  %v3049_v12 = vrot.slane %v12855_v26, 5  ;;  %v11809_v26 = vld [vmem:[%s14756_s1 + $0x190] sm:$0xff]   ;;  %v3063_v39 = vrot.slane %v13048_v5, 5  ;;  %v11811_v5 = vld [vmem:[%s14756_s1 + $0x1a0] sm:$0xff]  }
 0x155   : > { %v3040_v9 = vsel %vm12380_vm5, %v9194_v59, %v3039_v31  ;;  %v3047_v43 = vsel %vm12380_vm5, %v9195_v17, %v3046_v21  ;;  %v3074_v33 = vrot.slane %v13066_v52, 5  ;;  %v3077_v58 = vrot.slane %v13105_v7, 5  ;;  %v11813_v7 = vld [vmem:[%s14756_s1 + $0x1b0] sm:$0xff]   ;;  %v14885_v31 = vld [vmem:[#allocation13_spill] sm:$0xff]  ;;  %v13327_v17 = vld [vmem:[%s12015_s12 + $0x58] sm:$0xf] }
 0x156   : > { %10442 = vmatmul.mubr.bf16.gmra.mrb[20].mxu0 %v9162_v25  ;;  %v3035_v25 = vrot.slane %v11938_v20, 5  ;;  %v3043_v4 = vsel %vm12380_vm5, %v3041_v61, %v3042_v60  ;;  %v14871_v13 = vcombine.low %v12780_v48, %v12787_v10  ;;  %v11814_v48 = vld [vmem:[%s14756_s1 + $0x1b8] sm:$0xff]   ;;  %v14872_v10 = vld [vmem:[#allocation5_spill] sm:$0xff]  ;;  %v14877_v23 = vcombine.low %v14875_v49, %v14876_v14  ;;  %v11818_v46 = vld [vmem:[%s12015_s12 + $0x30] sm:$0xff]  }
 0x157   : > { %10445 = vmatprep.mubr.bf16.mxu0 %v9163_v51  ;;  %v3026_v51 = vsel %vm12380_vm5, %v9192_v28, %v3025_v36  ;;  %v9226_v44 = vcombine.low %v3040_v9, %v3043_v4  ;;  %v9199_v36 = vrot.slane %v9183_v37, 9  ;;  %v3076_v1 = vrot.slane %v3074_v33, 4  ;;  %v11817_v28 = vld [vmem:[%s14756_s1 + $0x1c0] sm:$0xff]   ;;  %v11820_v60 = vld [vmem:[%s14756_s1 + $0x1c8] sm:$0xff]  }
 0x158   : > { %v3036_v22 = vsel %vm12380_vm5, %v3034_v24, %v3035_v25  ;;  %v9224_v3 = vcombine.low %v3026_v51, %v3029_v8  ;;  %v14879_v24 = vld [vmem:[#allocation10_spill] sm:$0xff]  ;;  %v14881_v25 = vld [vmem:[#allocation11_spill] sm:$0xff]  ;;  %v14882_v51 = vld [vmem:[#allocation4_spill] sm:$0xff]  ;;  %v14890_v18 = vcombine.low %v12993_v45, %v13003_v38  ;;  %v4692_v9 = vrot.slane %v13327_v17, 5 }
 0x159   : > { %v9225_v56 = vcombine.low %v3033_v54, %v3036_v22  ;;  %v3075_v52 = vsel %vm12380_vm5, %v9199_v36, %v3074_v33  ;;  %v3078_v40 = vsel %vm12380_vm5, %v3076_v1, %v3077_v58  ;;  %v14880_v20 = vcombine.low %v14878_v29, %v14879_v24  ;;  %v14887_v22 = vld [vmem:[#allocation14_spill] sm:$0xff]  ;;  %v11823_v45 = vld [vmem:[%s14756_s1 + $0x1d0] sm:$0xff]   ;;  %v11819_v38 = vld [vmem:[%s12015_s12 + $0x3c] sm:$0xff]  }
 0x15a   : > { %v9231_v16 = vcombine.low %v3075_v52, %v3078_v40  ;;  %v14883_v8 = vcombine.low %v14881_v25, %v14882_v51  ;;  %v14886_v54 = vcombine.low %v14884_v47, %v14885_v31  ;;  %v14889_v21 = vcombine.low %v14887_v22, %v14888_v35  ;;  %v11816_v61 = vld [vmem:[%s12015_s12 + $0x24] sm:$0xff]   ;;  %v13361_v1 = vld [vmem:[%s12015_s12 + $0x70] sm:$0xf]  ;;  %v13364_v58 = vld [vmem:[%s12015_s12 + $0x74] sm:$0x1] }
 0x15b   : > { %v4706_v52 = vrot.slane %v13361_v1, 5  ;;  %v4709_v40 = vrot.slane %v13364_v58, 5  ;;  %v11825_v14 = vld [vmem:[%s12015_s12 + $0x6c] sm:$0xff]   ;;  %v11827_v51 = vld [vmem:[%s12015_s12 + $0x78] sm:$0xff]  }
 0x15c   : > { %v11838_v47 = vld [vmem:[%s14756_s1 + $0x1f8] sm:$0xff]   ;;  %v13396_v31 = vld [vmem:[%s12015_s12 + $0x2c] sm:$0x1] }
 0x15d   : > { %v4708_v49 = vrot.slane %v4706_v52, 4 }
 0x15e   : > { %10446 = vmatmul.mubr.bf16.gmra.mrb[24].mxu0 %v9164_v0  ;;  %v3050_v0 = vsel %vm12380_vm5, %v3048_v42, %v3049_v12  ;;  %v13330_v42 = vld [vmem:[%s12015_s12 + $0x5c] sm:$0x1]  ;;  %v9412_v12 = vld [vmem:[%s12015_s12 + $0x54] sm:$0xe] }
 0x15f   : > { %10449 = vmatprep.mubr.bf16.mxu0 %v9165_v2  ;;  %v9181_v2 = vld [vmem:[%s12015_s12 + $0x54] sm:$0xe]  ;;  %v9227_v62 = vcombine.low %v3047_v43, %v3050_v0  ;;  %v4695_v4 = vrot.slane %v13330_v42, 5  ;;  %v11829_v43 = vld [vmem:[%s14756_s1 + $0x1e0] sm:$0xff]   ;;  %v9428_v0 = vrot.slane %v9412_v12, 9 }
 0x160   : > { %v9197_v6 = vrot.slane %v9181_v2, 9  ;;  %v11822_v2 = vld [vmem:[%s12015_s12 + $0x54] sm:$0xff]   ;;  %v13418_v12 = vld [vmem:[%s14756_s1 + $0x200] sm:$0xff]  }
 0x166   : > { %10450 = vmatmul.mubr.bf16.gmra.mrb[28].mxu0 %v9166_v19  ;;  %v14873_v19 = vld [vmem:[#allocation9_spill] sm:$0xff] }
 0x167   : > { %10469 = vmatprep.mubr.bf16.mxu0 %v9223_v53  ;;  %v14874_v53 = vcombine.low %v14872_v10, %v14873_v19 }
 0x16e   : > { %10470 = vmatmul.mubr.bf16.vlgmr.msra.gmra.mrb[0].mxu0 %v9224_v3  ;;  %v11815_v3 = vld [vmem:[%s12015_s12 + $0x18] sm:$0xff]  }
 0x16f   : > { %10502 = vmatpush3.bf16.msra.mxu0 %v13180_v32  ;;  %10473 = vmatprep.mubr.bf16.mxu0 %v9225_v56  ;;  %v3060_v32 = vrot.slane %v12977_v50, 5  ;;  %v14891_v56 = vld [vmem:[#allocation15_spill] sm:$0xff] }
 0x170   : > { %10503 = vmatprep.subr.bf16.mxu0 %v11808_v34  ;;  %v14892_v59 = vcombine.low %v13007_v15, %v14891_v56  ;;  %v11821_v15 = vld [vmem:[%s12015_s12 + $0x48] sm:$0xff]  }
 0x171   : > { %v3062_v57 = vrot.slane %v3060_v32, 4  ;;  %v3061_v50 = vsel %vm12380_vm5, %v9197_v6, %v3060_v32  ;;  %v4694_v32 = vrot.slane %v4692_v9, 4  ;;  %v13346_v6 = vsel %vm12380_vm5, %v9428_v0, %v4692_v9  ;;  %v13421_v9 = vld [vmem:[%s12015_s12 + $0x34] sm:$0xf] }
 0x172   : > { %14893 = vst [vmem:[#allocation5_spill] sm:$0xff] %v13346_v6  ;;  %v4015_v6 = vshll.u32 %v13327_v17, 16 }
 0x173   : > { %10504 = vmatpush3.bf16.msra.mxu0 %v11808_v34  ;;  %v3064_v41 = vsel %vm12380_vm5, %v3062_v57, %v3063_v39  ;;  %v11826_v34 = vld [vmem:[%s14756_s1 + $0x1d8] sm:$0xff]   ;;  %v11824_v57 = vld [vmem:[%s12015_s12 + $0x60] sm:$0xff]   ;;  %v13351_v39 = vsel %vm12380_vm5, %v4694_v32, %v4695_v4 }
 0x174   : > { %10505 = vmatprep.subr.bf16.mxu0 %v11809_v26  ;;  %v9229_v27 = vcombine.low %v3061_v50, %v3064_v41  ;;  %14894 = vst [vmem:[#allocation9_spill] sm:$0xff] %v13351_v39  ;;  %v9328_v32 = vld [vmem:[%s12015_s12 + $0x3c] sm:$0xf]  ;;  %v11837_v39 = vld [vmem:[%s12015_s12 + $0xcc] sm:$0xff]  }
 0x176   : > { %10474 = vmatmul.mubr.bf16.gmra.mrb[4].mxu0 %v9226_v44  ;;  %v13341_v44 = vld [vmem:[%s12015_s12 + $0x1c] sm:$0xf] }
 0x177   : > { %10477 = vmatprep.mubr.bf16.mxu0 %v9227_v62  ;;  %10506 = vmatpush3.bf16.msra.mxu0 %v11809_v26  ;;  %v9319_v26 = vld [vmem:[%s12015_s12 + $0x18] sm:$0xf]  ;;  %v9322_v62 = vld [vmem:[%s12015_s12 + $0x24] sm:$0xf]  ;;  %v3899_v37 = vshrl.u32 %v13341_v44, 16 }
 0x178   : > { %10507 = vmatprep.subr.bf16.mxu0 %v11810_v30  ;;  %v3886_v50 = vshrl.u32 %v9319_v26, 16  ;;  %v3889_v41 = vshll.u32 %v9319_v26, 16  ;;  %v3913_v36 = vshll.u32 %v9322_v62, 16 }
 0x17a   : > { %v3915_v29 = vrot.slane %v3913_v36, 5  ;;  %v3943_v36 = vshll.u32 %v13421_v9, 16 }
 0x17b   : > { %10508 = vmatpush3.bf16.msra.mxu0 %v11810_v30  ;;  %v11832_v30 = vld [vmem:[%s14756_s1 + $0x1e8] sm:$0xff]  }
 0x17c   : > { %10509 = vmatprep.subr.bf16.mxu0 %v11811_v5 }
 0x17e   : > { %10478 = vmatmul.mubr.bf16.gmra.mrb[8].mxu0 %v14871_v13  ;;  %v9414_v13 = vld [vmem:[%s12015_s12 + $0x6c] sm:$0xe] }
 0x17f   : > { %10481 = vmatprep.mubr.bf16.mxu0 %v9229_v27  ;;  %10510 = vmatpush3.bf16.msra.mxu0 %v11811_v5  ;;  %v3895_v5 = vshll.u32 %v13341_v44, 16  ;;  %v3910_v27 = vshrl.u32 %v9322_v62, 16  ;;  %v9430_v10 = vrot.slane %v9414_v13, 9  ;;  %v11828_v62 = vld [vmem:[%s12015_s12 + $0x84] sm:$0xff]  }
 0x180   : > { %10511 = vmatprep.subr.bf16.mxu0 %v11812_v63 }
 0x181   : > { %v13375_v19 = vrot.slane %v3895_v5, 5  ;;  %v13385_v25 = vsel %vm12380_vm5, %v9430_v10, %v4706_v52  ;;  %v11830_v5 = vld [vmem:[%s12015_s12 + $0x90] sm:$0xff]   ;;  %v13458_v10 = vld [vmem:[%s12015_s12 + $0x38] sm:$0x1] }
 0x182   : > { %14895 = vst [vmem:[#allocation6_spill] sm:$0xff] %v13385_v25 }
 0x183   : > { %10512 = vmatpush3.bf16.msra.mxu0 %v11812_v63  ;;  %v13367_v63 = vld [vmem:[%s12015_s12 + $0x28] sm:$0xf] }
 0x184   : > { %10513 = vmatprep.subr.bf16.mxu0 %v11813_v7  ;;  %v3919_v24 = vshll.u32 %v13367_v63, 16 }
 0x186   : > { %10482 = vmatmul.mubr.bf16.gmra.mrb[12].mxu0 %v14874_v53  ;;  %v3901_v53 = vrot.slane %v3899_v37, 4  ;;  %v13403_v56 = vrot.slane %v3919_v24, 5 }
 0x187   : > { %10485 = vmatprep.mubr.bf16.mxu0 %v9231_v16  ;;  %10514 = vmatpush3.bf16.msra.mxu0 %v11813_v7  ;;  %v11835_v7 = vld [vmem:[%s14756_s1 + $0x1f0] sm:$0xff]   ;;  %v3888_v16 = vrot.slane %v3886_v50, 4 }
 0x188   : > { %10515 = vmatprep.subr.bf16.mxu0 %v11814_v48 }
 0x18b   : > { %10516 = vmatpush3.bf16.msra.mxu0 %v11814_v48  ;;  %v3891_v48 = vrot.slane %v3889_v41, 5 }
 0x18c   : > { %10549 = vmatprep.subr.bf16.mxu0 %v11817_v28 }
 0x18d   : > { %v3892_v35 = vor.u32 %v3891_v48, %v3888_v16  ;;  %v3958_v16 = vshrl.u32 %v9328_v32, 16 }
 0x18e   : > { %10486 = vmatmul.mubr.bf16.gmra.mrb[16].mxu0 %v14877_v23  ;;  %v13379_v23 = vld [vmem:[%s12015_s12 + $0x20] sm:$0x1] }
 0x18f   : > { %10489 = vmatprep.mubr.bf16.mxu0 %v14880_v20  ;;  %v3923_v20 = vshrl.u32 %v13367_v63, 16  ;;  %v13423_v0 = vrot.slane %v3892_v35, 4 }
 0x196   : > { %10490 = vmatmul.mubr.bf16.gmra.mrb[20].mxu0 %v14883_v8  ;;  %v13390_v8 = vsel %vm12380_vm5, %v4708_v49, %v4709_v40  ;;  %v3947_v40 = vshrl.u32 %v13421_v9, 16  ;;  %v13467_v49 = vld [vmem:[%s12015_s12 + $0xa0] sm:$0xf] }
 0x197   : > { %10493 = vmatprep.mubr.bf16.mxu0 %v14886_v54  ;;  %14896 = vst [vmem:[#allocation7_spill] sm:$0xff] %v13390_v8  ;;  %v9325_v54 = vld [vmem:[%s12015_s12 + $0x30] sm:$0xf]  ;;  %v4734_v35 = vrot.slane %v13467_v49, 5 }
 0x198   : > { %v3937_v4 = vshll.u32 %v9325_v54, 16 }
 0x19a   : > { %v13449_v52 = vrot.slane %v3937_v4, 5  ;;  %v4736_v4 = vrot.slane %v4734_v35, 4 }
 0x19e   : > { %10494 = vmatmul.mubr.bf16.gmra.mrb[24].mxu0 %v14889_v21  ;;  %v3902_v21 = vor.u32 %v3901_v53, %v13375_v19  ;;  %v13461_v53 = vld [vmem:[%s12015_s12 + $0x94] sm:$0xf] }
 0x19f   : > { %10497 = vmatprep.mubr.bf16.mxu0 %v14890_v18  ;;  %v3905_v18 = vshll.u32 %v13379_v23, 16  ;;  %v4727_v24 = vrot.slane %v13461_v53, 5 }
 0x1a0   : > { %v13425_v26 = vrot.slane %v3902_v21, 4 }
 0x1a6   : > { %10498 = vmatmul.mubr.bf16.gmra.mrb[28].mxu0 %v14892_v59  ;;  %v3925_v59 = vrot.slane %v3923_v20, 4 }
 0x1a7   : > { %10517 = vmatprep.mubr.bf16.mxu0 %v11815_v3 }
 0x1a8   : > { %v3926_v50 = vor.u32 %v3925_v59, %v13403_v56  ;;  %v4729_v59 = vrot.slane %v4727_v24, 4 }
 0x1ae   : > { %10518 = vmatmul.mubr.bf16.vlgmr.msra.gmra.mrb[0].mxu0 %v11816_v61  ;;  %v13406_v61 = vld [vmem:[%s12015_s12 + $0x88] sm:$0xf] }
 0x1af   : > { %10550 = vmatpush3.bf16.msra.mxu0 %v11817_v28  ;;  %10521 = vmatprep.mubr.bf16.mxu0 %v11818_v46  ;;  %v3912_v28 = vrot.slane %v3910_v27, 4  ;;  %v13409_v46 = vld [vmem:[%s12015_s12 + $0x8c] sm:$0x1] }
 0x1b0   : > { %10551 = vmatprep.subr.bf16.mxu0 %v11820_v60 }
 0x1b1   : > { %v3916_v3 = vor.u32 %v3915_v29, %v3912_v28  ;;  %v13464_v28 = vld [vmem:[%s12015_s12 + $0x98] sm:$0x1]  ;;  %v9417_v29 = vld [vmem:[%s12015_s12 + $0x90] sm:$0xe] }
 0x1b2   : > { %v4730_v20 = vrot.slane %v13464_v28, 5 }
 0x1b3   : > { %10552 = vmatpush3.bf16.msra.mxu0 %v11820_v60  ;;  %v3929_v60 = vshll.u32 %v13396_v31, 16 }
 0x1b4   : > { %10553 = vmatprep.subr.bf16.mxu0 %v11823_v45 }
 0x1b5   : > { %v13439_v37 = vrot.slane %v3929_v60, 5 }
 0x1b6   : > { %10522 = vmatmul.mubr.bf16.gmra.mrb[4].mxu0 %v11819_v38  ;;  %v9416_v38 = vld [vmem:[%s12015_s12 + $0x84] sm:$0xe] }
 0x1b7   : > { %10525 = vmatprep.mubr.bf16.mxu0 %v11821_v15  ;;  %10554 = vmatpush3.bf16.msra.mxu0 %v11823_v45  ;;  %v3934_v45 = vshrl.u32 %v9325_v54, 16  ;;  %v4720_v15 = vrot.slane %v13406_v61, 5  ;;  %v9418_v54 = vld [vmem:[%s12015_s12 + $0x9c] sm:$0xe] }
 0x1b8   : > { %10555 = vmatprep.subr.bf16.mxu0 %v11826_v34  ;;  %v9434_v60 = vrot.slane %v9418_v54, 9 }
 0x1b9   : > { %v13441_v27 = vrot.slane %v3934_v45, 4 }
 0x1bb   : > { %10556 = vmatpush3.bf16.msra.mxu0 %v11826_v34  ;;  %v4723_v34 = vrot.slane %v13409_v46, 5  ;;  %v3940_v45 = vor.u32 %v13449_v52, %v13441_v27  ;;  %v13503_v27 = vrot.slane %v3958_v16, 4 }
 0x1bc   : > { %10557 = vmatprep.subr.bf16.mxu0 %v11829_v43 }
 0x1be   : > { %10526 = vmatmul.mubr.bf16.gmra.mrb[8].mxu0 %v11822_v2  ;;  %v4722_v2 = vrot.slane %v4720_v15, 4 }
 0x1bf   : > { %10529 = vmatprep.mubr.bf16.mxu0 %v11824_v57  ;;  %10558 = vmatpush3.bf16.msra.mxu0 %v11829_v43  ;;  %v9432_v43 = vrot.slane %v9416_v38, 9  ;;  %v13429_v57 = vrot.slane %v3905_v18, 5  ;;  %v13478_v18 = vrot.slane %v3926_v50, 4  ;;  %v13483_v38 = vrot.slane %v3943_v36, 5 }
 0x1c0   : > { %10559 = vmatprep.subr.bf16.mxu0 %v11832_v30  ;;  %v13446_v13 = vsel %vm12380_vm5, %v4722_v2, %v4723_v34  ;;  %v3953_v2 = vshll.u32 %v13458_v10, 16  ;;  %v13500_v50 = vsel %vm12380_vm5, %v9434_v60, %v4734_v35 }
 0x1c1   : > { %v13436_v41 = vsel %vm12380_vm5, %v9432_v43, %v4720_v15  ;;  %14898 = vst [vmem:[#allocation10_spill] sm:$0xff] %v13446_v13  ;;  %v13486_v15 = vld [vmem:[%s12015_s12 + $0x44] sm:$0x1]  ;;  %v11831_v43 = vld [vmem:[%s12015_s12 + $0x9c] sm:$0xff]   ;;  %14901 = vst [vmem:[#allocation12_spill] sm:$0xff] %v13500_v50  ;;  %v3908_v54 = vsel %vm12047_vm2, %v13425_v26, %v13429_v57 }
 0x1c2   : > { %14897 = vst [vmem:[#allocation8_spill] sm:$0xff] %v13436_v41  ;;  %v13547_v26 = vld [vmem:[%s12015_s12 + $0xbc] sm:$0x1]  ;;  %v9419_v57 = vld [vmem:[%s12015_s12 + $0xa8] sm:$0xe]  ;;  %v13560_v33 = vrot.slane %v3953_v2, 5 }
 0x1c3   : > { %10560 = vmatpush3.bf16.msra.mxu0 %v11832_v30  ;;  %v13431_v30 = vrot.slane %v3916_v3, 4  ;;  %v4751_v52 = vrot.slane %v13547_v26, 5 }
 0x1c4   : > { %10561 = vmatprep.subr.bf16.mxu0 %v11835_v7 }
 0x1c5   : > { %v3922_v35 = vsel %vm12047_vm2, %v13431_v30, %v13403_v56 }
 0x1c6   : > { %10530 = vmatmul.mubr.bf16.gmra.mrb[12].mxu0 %v11825_v14  ;;  %v13470_v14 = vld [vmem:[%s12015_s12 + $0xa4] sm:$0x1] }
 0x1c7   : > { %10533 = vmatprep.mubr.bf16.mxu0 %v11827_v51  ;;  %10562 = vmatpush3.bf16.msra.mxu0 %v11835_v7  ;;  %v13453_v7 = vld [vmem:[%s12015_s12 + $0x40] sm:$0xf]  ;;  %v3961_v51 = vshll.u32 %v9328_v32, 16  ;;  %v4737_v21 = vrot.slane %v13470_v14, 5  ;;  %v3949_v32 = vrot.slane %v3947_v40, 4 }
 0x1c8   : > { %10563 = vmatprep.subr.bf16.mxu0 %v11838_v47  ;;  %v3967_v3 = vshll.u32 %v13453_v7, 16 }
 0x1c9   : > { %v13505_v36 = vrot.slane %v3961_v51, 5  ;;  %v13511_v40 = vsel %vm12380_vm5, %v4736_v4, %v4737_v21  ;;  %v3898_v51 = vsel %vm12047_vm2, %v13423_v0, %v13375_v19  ;;  %v13533_v21 = vld [vmem:[%s12015_s12 + $0xac] sm:$0xf]  ;;  %v3932_v19 = vsel %vm12047_vm2, %v13478_v18, %v13439_v37 }
 0x1ca   : > { %14902 = vst [vmem:[#allocation13_spill] sm:$0xff] %v13511_v40  ;;  %v3950_v0 = vor.u32 %v3949_v32, %v13483_v38  ;;  %v4741_v56 = vrot.slane %v13533_v21, 5  ;;  %v9435_v4 = vrot.slane %v9419_v57, 9  ;;  %v13555_v37 = vrot.slane %v3940_v45, 4  ;;  %v13558_v18 = vld [vmem:[%s12015_s12 + $0x4c] sm:$0xf] }
 0x1cb   : > { %10564 = vmatpush3.bf16.msra.mxu0 %v11838_v47  ;;  %v9433_v47 = vrot.slane %v9417_v29, 9  ;;  %v13513_v29 = vrot.slane %v3967_v3, 5  ;;  %v13536_v3 = vld [vmem:[%s12015_s12 + $0xb0] sm:$0x1]  ;;  %v13565_v40 = vld [vmem:[%s12015_s12 + $0x54] sm:$0xf]  ;;  %v13601_v13 = vcombine.low %v3922_v35, %v3932_v19 }
 0x1cc   : > { %10597 = vmatprep.subr.bf16.mxu0 %v13418_v12  ;;  %v4744_v30 = vrot.slane %v13536_v3, 5  ;;  %v4743_v48 = vrot.slane %v4741_v56, 4  ;;  %v13569_v57 = vsel %vm12380_vm5, %v9435_v4, %v4741_v56  ;;  %v13572_v45 = vrot.slane %v3950_v0, 4  ;;  %v9421_v35 = vld [vmem:[%s12015_s12 + $0xc0] sm:$0xe] }
 0x1cd   : > { %v13490_v34 = vsel %vm12380_vm5, %v9433_v47, %v4727_v24  ;;  %v3971_v24 = vshrl.u32 %v13453_v7, 16  ;;  %v9331_v47 = vld [vmem:[%s12015_s12 + $0x48] sm:$0xf]  ;;  %14903 = vst [vmem:[#allocation14_spill] sm:$0xff] %v13569_v57  ;;  %v3991_v4 = vshll.u32 %v13558_v18, 16  ;;  %v4009_v25 = vshll.u32 %v13565_v40, 16 }
 0x1ce   : > { %10534 = vmatmul.mubr.bf16.gmra.mrb[16].mxu0 %v11828_v62  ;;  %14899 = vst [vmem:[#allocation11_spill] sm:$0xff] %v13490_v34  ;;  %v13496_v62 = vsel %vm12380_vm5, %v4729_v59, %v4730_v20  ;;  %v3977_v20 = vshll.u32 %v13486_v15, 16  ;;  %v13539_v59 = vld [vmem:[%s12015_s12 + $0xb8] sm:$0xf]  ;;  %v3982_v60 = vshrl.u32 %v9331_v47, 16  ;;  %v3985_v32 = vshll.u32 %v9331_v47, 16 }
 0x1cf   : > { %10537 = vmatprep.mubr.bf16.mxu0 %v11830_v5  ;;  %14900 = vst [vmem:[#allocation4_spill] sm:$0xff] %v13496_v62  ;;  %v11833_v5 = vld [vmem:[%s12015_s12 + $0xa8] sm:$0xff]   ;;  %v4748_v16 = vrot.slane %v13539_v59, 5  ;;  %v11834_v62 = vld [vmem:[%s12015_s12 + $0xb4] sm:$0xff]   ;;  %v13578_v47 = vsel %vm12380_vm5, %v4743_v48, %v4744_v30  ;;  %v13595_v48 = vld [vmem:[%s12015_s12 + $0x50] sm:$0x1] }
 0x1d0   : > { %v13574_v34 = vrot.slane %v3977_v20, 5  ;;  %14904 = vst [vmem:[#allocation3_spill] sm:$0xff] %v13578_v47  ;;  %v13585_v56 = vrot.slane %v3982_v60, 4  ;;  %14907 = vst [vmem:[#allocation17_spill] sm:$0xff] %v13595_v48  ;;  %v3987_v30 = vrot.slane %v3985_v32, 5  ;;  %v3964_v20 = vor.u32 %v13505_v36, %v13503_v27 }
 0x1d1   : > { %v4750_v50 = vrot.slane %v4748_v16, 4  ;;  %v13612_v47 = vld [vmem:[%s12015_s12 + $0xd0] sm:$0xf]  ;;  %v3946_v32 = vsel %vm12047_vm2, %v13555_v37, %v13483_v38  ;;  %v13626_v19 = vrot.slane %v3991_v4, 5  ;;  %v9422_v60 = vld [vmem:[%s12015_s12 + $0xcc] sm:$0xe] }
 0x1d2   : > { %v9438_v41 = vrot.slane %v9422_v60, 9  ;;  %v3988_v8 = vor.u32 %v3987_v30, %v13585_v56 }
 0x1d3   : > { %v13592_v0 = vsel %vm12380_vm5, %v4750_v50, %v4751_v52  ;;  %v13606_v50 = vld [vmem:[%s12015_s12 + $0xc4] sm:$0xf]  ;;  %v13609_v52 = vld [vmem:[%s12015_s12 + $0xc8] sm:$0x1] }
 0x1d4   : > { %14906 = vst [vmem:[#allocation16_spill] sm:$0xff] %v13592_v0  ;;  %v4755_v27 = vrot.slane %v13606_v50, 5  ;;  %v4758_v36 = vrot.slane %v13609_v52, 5  ;;  %v4762_v0 = vrot.slane %v13612_v47, 5  ;;  %v14932_v55 = vld [vmem:[#allocation14_spill] sm:$0xff] }
 0x1d6   : > { %10538 = vmatmul.mubr.bf16.gmra.mrb[20].mxu0 %v11831_v43  ;;  %v9420_v43 = vld [vmem:[%s12015_s12 + $0xb4] sm:$0xe]  ;;  %v4757_v57 = vrot.slane %v4755_v27, 4 }
 0x1d7   : > { %10541 = vmatprep.mubr.bf16.mxu0 %v11833_v5  ;;  %v9436_v22 = vrot.slane %v9420_v43, 9  ;;  %v13562_v5 = vrot.slane %v3971_v24, 4  ;;  %v11836_v24 = vld [vmem:[%s12015_s12 + $0xc0] sm:$0xff]   ;;  %v9383_v43 = vcombine.low %v3898_v51, %v3908_v54  ;;  %v13621_v54 = vld [vmem:[%s12015_s12 + $0xd4] sm:$0x1] }
 0x1d8   : > { %v4765_v38 = vrot.slane %v13621_v54, 5  ;;  %v13647_v60 = vsel %vm12380_vm5, %v4757_v57, %v4758_v36 }
 0x1d9   : > { %v13582_v2 = vsel %vm12380_vm5, %v9436_v22, %v4748_v16  ;;  %v3995_v22 = vshrl.u32 %v13558_v18, 16  ;;  %v4006_v16 = vshrl.u32 %v13565_v40, 16  ;;  %v3974_v51 = vor.u32 %v13562_v5, %v13513_v29  ;;  %14909 = vst [vmem:[#allocation19_spill] sm:$0xff] %v13647_v60 }
 0x1da   : > { %14905 = vst [vmem:[#allocation15_spill] sm:$0xff] %v13582_v2  ;;  %v4001_v5 = vshll.u32 %v13595_v48, 16  ;;  %v9337_v2 = vld [vmem:[%s12015_s12 + $0x60] sm:$0xf]  ;;  %v13651_v40 = vsel %vm12380_vm5, %v9438_v41, %v4762_v0  ;;  %v13659_v48 = vrot.slane %v3964_v20, 4 }
 0x1db   : > { %v3997_v37 = vrot.slane %v3995_v22, 4  ;;  %v4019_v22 = vshrl.u32 %v13327_v17, 16  ;;  %14910 = vst [vmem:[#allocation20_spill] sm:$0xff] %v13651_v40  ;;  %v4030_v56 = vshrl.u32 %v9337_v2, 16  ;;  %v4033_v30 = vshll.u32 %v9337_v2, 16  ;;  %v13680_v41 = vld [vmem:[%s14758_s3 + $0x40] sm:$0xff]  }
 0x1dc   : > { %v3956_v2 = vsel %vm12047_vm2, %v13572_v45, %v13560_v33  ;;  %v4008_v36 = vrot.slane %v4006_v16, 4  ;;  %v9340_v20 = vld [vmem:[%s12015_s12 + $0x6c] sm:$0xf]  ;;  %v13682_v33 = vrot.slane %v3988_v8, 4  ;;  %v4025_v45 = vshll.u32 %v13330_v42, 16  ;;  %11125 = vmatprep.subr.bf16.mxu1 %v13680_v41 }
 0x1dd   : > { %v3998_v17 = vor.u32 %v3997_v37, %v13626_v19  ;;  %v13673_v37 = vrot.slane %v4001_v5, 5  ;;  %v4021_v60 = vrot.slane %v4019_v22, 4  ;;  %v13686_v16 = vld [vmem:[%s12015_s12 + $0x68] sm:$0x1]  ;;  %v9385_v5 = vcombine.low %v3946_v32, %v3956_v2  ;;  %v9343_v22 = vld [vmem:[%s12015_s12 + $0x78] sm:$0xf]  ;;  %11133 = vmatpush3.bf16.msra.mxu1 %v13680_v41 }
 0x1de   : > { %10542 = vmatmul.mubr.bf16.gmra.mrb[24].mxu0 %v11834_v62  ;;  %v9437_v62 = vrot.slane %v9421_v35, 9  ;;  %v4764_v35 = vrot.slane %v4762_v0, 4  ;;  %v13669_v0 = vrot.slane %v3974_v51, 4  ;;  %14912 = vst [vmem:[#allocation22_spill] sm:$0xff] %v13686_v16  ;;  %v4035_v51 = vrot.slane %v4033_v30, 5  ;;  %v13694_v40 = vld [vmem:[%s14758_s3 + $0x48] sm:$0xff]  }
 0x1df   : > { %10545 = vmatprep.mubr.bf16.mxu0 %v11836_v24  ;;  %v13636_v24 = vld [vmem:[%s12015_s12 + $0x64] sm:$0xf]  ;;  %v4057_v42 = vshll.u32 %v9340_v20, 16  ;;  %v3970_v32 = vsel %vm12047_vm2, %v13659_v48, %v13513_v29  ;;  %11126 = vmatprep.subr.bf16.mxu1 %v13694_v40  ;;  %v11840_v29 = vld [vmem:[%s14756_s1 + $0x208] sm:$0xff]  }
 0x1e0   : > { %v13640_v4 = vsel %vm12380_vm5, %v9437_v62, %v4755_v27  ;;  %v13657_v62 = vsel %vm12380_vm5, %v4764_v35, %v4765_v38  ;;  %v4039_v57 = vshll.u32 %v13636_v24, 16  ;;  %v4043_v38 = vshrl.u32 %v13636_v24, 16 }
 0x1e1   : > { %14908 = vst [vmem:[#allocation18_spill] sm:$0xff] %v13640_v4  ;;  %14911 = vst [vmem:[#allocation21_spill] sm:$0xff] %v13657_v62  ;;  %v4011_v35 = vrot.slane %v4009_v25, 5  ;;  %v13675_v27 = vrot.slane %v4015_v6, 5  ;;  %v3999_v62 = vrot.slane %v3998_v17, 4  ;;  %v4054_v6 = vshrl.u32 %v9340_v20, 16  ;;  %11134 = vmatpush3.bf16.msra.mxu1 %v13694_v40 }
 0x1e2   : > { %v13688_v25 = vrot.slane %v4039_v57, 5  ;;  %v4045_v8 = vrot.slane %v4043_v38, 4  ;;  %v3980_v30 = vsel %vm12047_vm2, %v13669_v0, %v13574_v34  ;;  %v13712_v38 = vld [vmem:[%s12015_s12 + $0x7c] sm:$0xf]  ;;  %v4078_v20 = vshrl.u32 %v9343_v22, 16 }
 0x1e3   : > { %v4012_v17 = vor.u32 %v4011_v35, %v4008_v36  ;;  %v4022_v57 = vor.u32 %v4021_v60, %v13675_v27  ;;  %14913 = vst [vmem:[#allocation23_spill] sm:$0xff] %v13712_v38  ;;  %v4081_v4 = vshll.u32 %v9343_v22, 16  ;;  %v3994_v34 = vsel %vm12047_vm2, %v13682_v33, %v13626_v19  ;;  %v13729_v36 = vld [vmem:[%s14758_s3 + $0x50] sm:$0xff]  }
 0x1e4   : > { %v4004_v48 = vsel %vm12047_vm2, %v3999_v62, %v13673_v37  ;;  %v13724_v60 = vrot.slane %v4025_v45, 5  ;;  %v4056_v0 = vrot.slane %v4054_v6, 4  ;;  %v4046_v35 = vor.u32 %v4045_v8, %v13688_v25  ;;  %11127 = vmatprep.subr.bf16.mxu1 %v13729_v36 }
 0x1e5   : > { %v13737_v19 = vrot.slane %v4012_v17, 4  ;;  %v4023_v62 = vrot.slane %v4022_v57, 4  ;;  %v4087_v37 = vshll.u32 %v13712_v38, 16  ;;  %v4091_v33 = vshrl.u32 %v13712_v38, 16  ;;  %11135 = vmatpush3.bf16.msra.mxu1 %v13729_v36 }
 0x1e6   : > { %10546 = vmatmul.mubr.bf16.gmra.mrb[28].mxu0 %v11837_v39  ;;  %v4032_v39 = vrot.slane %v4030_v56, 4  ;;  %v4067_v56 = vshrl.u32 %v13361_v1, 16  ;;  %v4080_v8 = vrot.slane %v4078_v20, 4  ;;  %v4111_v17 = vshll.u32 %v13406_v61, 16 }
 0x1e7   : > { %10565 = vmatprep.mubr.bf16.mxu0 %v9383_v43  ;;  %v4063_v43 = vshll.u32 %v13361_v1, 16  ;;  %v4049_v1 = vshll.u32 %v13686_v16, 16  ;;  %v9346_v16 = vld [vmem:[%s12015_s12 + $0x84] sm:$0xf]  ;;  %v4115_v57 = vshrl.u32 %v13406_v61, 16  ;;  %v9387_v20 = vcombine.low %v3994_v34, %v4004_v48 }
 0x1e8   : > { %v4036_v2 = vor.u32 %v4035_v51, %v4032_v39  ;;  %v4059_v39 = vrot.slane %v4057_v42, 5  ;;  %v4069_v22 = vrot.slane %v4067_v56, 4  ;;  %v4083_v42 = vrot.slane %v4081_v4, 5  ;;  %v9349_v34 = vld [vmem:[%s12015_s12 + $0x90] sm:$0xf] }
 0x1e9   : > { %v13732_v51 = vrot.slane %v4063_v43, 5  ;;  %v4051_v6 = vrot.slane %v4049_v1, 5  ;;  %v4102_v43 = vshrl.u32 %v9346_v16, 16  ;;  %v4105_v56 = vshll.u32 %v9346_v16, 16 }
 0x1ea   : > { %v4037_v45 = vrot.slane %v4036_v2, 4  ;;  %v4060_v4 = vor.u32 %v4059_v39, %v4056_v0  ;;  %v4073_v1 = vshll.u32 %v13364_v58, 16  ;;  %v9386_v16 = vcombine.low %v3970_v32, %v3980_v30  ;;  %v13770_v32 = vld [vmem:[%s12015_s12 + $0x80] sm:$0x1] }
 0x1eb   : > { %v4070_v2 = vor.u32 %v4069_v22, %v13732_v51  ;;  %v13756_v38 = vrot.slane %v4087_v37, 5  ;;  %v4093_v61 = vrot.slane %v4091_v33, 4  ;;  %v4028_v0 = vsel %vm12047_vm2, %v4023_v62, %v13724_v60 }
 0x1ec   : > { %v4042_v58 = vsel %vm12047_vm2, %v4037_v45, %v13688_v25  ;;  %v4084_v30 = vor.u32 %v4083_v42, %v4080_v8  ;;  %v4104_v48 = vrot.slane %v4102_v43, 4  ;;  %v4107_v39 = vrot.slane %v4105_v56, 5 }
 0x1ed   : > { %v4117_v22 = vrot.slane %v4115_v57, 4  ;;  %v4071_v62 = vrot.slane %v4070_v2, 4  ;;  %v4075_v25 = vrot.slane %v4073_v1, 5  ;;  %v4094_v37 = vor.u32 %v4093_v61, %v13756_v38 }
 0x1ee   : > { %10566 = vmatmul.mubr.bf16.vlgmr.msra.gmra.mrb[0].mxu0 %v13601_v13  ;;  %v11841_v13 = vld [vmem:[%s14756_s1 + $0x210] sm:$0xff]   ;;  %v4097_v33 = vshll.u32 %v13770_v32, 16  ;;  %v4126_v45 = vshrl.u32 %v9349_v34, 16  ;;  %v4129_v8 = vshll.u32 %v9349_v34, 16  ;;  %v4135_v42 = vshll.u32 %v13461_v53, 16 }
 0x1ef   : > { %10598 = vmatpush3.bf16.msra.mxu0 %v13418_v12  ;;  %10569 = vmatprep.mubr.bf16.mxu0 %v9385_v5  ;;  %v13751_v12 = vld [vmem:[%s14758_s3 + $0x58] sm:$0xff]   ;;  %v4047_v5 = vrot.slane %v4046_v35, 4  ;;  %v4018_v35 = vsel %vm12047_vm2, %v13737_v19, %v13675_v27  ;;  %v13776_v27 = vrot.slane %v4111_v17, 5  ;;  %v4061_v19 = vrot.slane %v4060_v4, 4  ;;  %v9355_v34 = vld [vmem:[%s12015_s12 + $0xa8] sm:$0xf] }
 0x1f0   : > { %10599 = vmatprep.subr.bf16.mxu0 %v11840_v29  ;;  %11128 = vmatprep.subr.bf16.mxu1 %v13751_v12  ;;  %v4139_v43 = vshrl.u32 %v13461_v53, 16  ;;  %v4108_v56 = vor.u32 %v4107_v39, %v4104_v48  ;;  %v4121_v57 = vshll.u32 %v13409_v46, 16  ;;  %v9352_v4 = vld [vmem:[%s12015_s12 + $0x9c] sm:$0xf]  ;;  %v9388_v2 = vcombine.low %v4018_v35, %v4028_v0 }
 0x1f1   : > { %v4052_v60 = vsel %vm12047_vm2, %v4047_v5, %v4051_v6  ;;  %11136 = vmatpush3.bf16.msra.mxu1 %v13751_v12  ;;  %v4085_v6 = vrot.slane %v4084_v30, 4  ;;  %v4118_v17 = vor.u32 %v4117_v22, %v13776_v27  ;;  %v11843_v5 = vld [vmem:[%s14756_s1 + $0x220] sm:$0xff]   ;;  %v4076_v53 = vsel %vm12047_vm2, %v4071_v62, %v4075_v25 }
 0x1f2   : > { %v9389_v1 = vcombine.low %v4042_v58, %v4052_v60  ;;  %v4128_v61 = vrot.slane %v4126_v45, 4  ;;  %v4131_v30 = vrot.slane %v4129_v8, 5  ;;  %v13797_v46 = vrot.slane %v4135_v42, 5  ;;  %v11844_v60 = vld [vmem:[%s14756_s1 + $0x228] sm:$0xff]  }
 0x1f3   : > { %10600 = vmatpush3.bf16.msra.mxu0 %v11840_v29  ;;  %v11842_v29 = vld [vmem:[%s14756_s1 + $0x218] sm:$0xff]   ;;  %v4141_v48 = vrot.slane %v4139_v43, 4  ;;  %v4150_v39 = vshrl.u32 %v9352_v4, 16  ;;  %v4153_v22 = vshll.u32 %v9352_v4, 16  ;;  %v4090_v35 = vsel %vm12047_vm2, %v4085_v6, %v13756_v38 }
 0x1f4   : > { %10601 = vmatprep.subr.bf16.mxu0 %v11841_v13  ;;  %v4109_v0 = vrot.slane %v4108_v56, 4  ;;  %v4123_v58 = vrot.slane %v4121_v57, 5  ;;  %v4174_v62 = vshrl.u32 %v9355_v34, 16  ;;  %v4177_v25 = vshll.u32 %v9355_v34, 16 }
 0x1f5   : > { %v4145_v38 = vshll.u32 %v13464_v28, 16  ;;  %v4187_v45 = vshrl.u32 %v13533_v21, 16  ;;  %v4132_v8 = vor.u32 %v4131_v30, %v4128_v61  ;;  %v4142_v42 = vor.u32 %v4141_v48, %v13797_v46  ;;  %v11846_v48 = vld [vmem:[%s14756_s1 + $0x238] sm:$0xff]  }
 0x1f6   : > { %10570 = vmatmul.mubr.bf16.gmra.mrb[4].mxu0 %v9386_v16  ;;  %v4095_v16 = vrot.slane %v4094_v37, 4  ;;  %v4152_v43 = vrot.slane %v4150_v39, 4  ;;  %v4114_v56 = vsel %vm12047_vm2, %v4109_v0, %v13776_v27  ;;  %v4179_v4 = vrot.slane %v4177_v25, 5  ;;  %v9358_v27 = vld [vmem:[%s12015_s12 + $0xb4] sm:$0xf] }
 0x1f7   : > { %10573 = vmatprep.mubr.bf16.mxu0 %v9387_v20  ;;  %10602 = vmatpush3.bf16.msra.mxu0 %v11841_v13  ;;  %v4066_v13 = vsel %vm12047_vm2, %v4061_v19, %v13732_v51  ;;  %v4099_v20 = vrot.slane %v4097_v33, 5  ;;  %v4119_v51 = vrot.slane %v4118_v17, 4  ;;  %v4159_v19 = vshll.u32 %v13467_v49, 16 }
 0x1f8   : > { %10603 = vmatprep.subr.bf16.mxu0 %v11842_v29  ;;  %v4183_v33 = vshll.u32 %v13533_v21, 16  ;;  %v9390_v6 = vcombine.low %v4066_v13, %v4076_v53  ;;  %v11845_v21 = vld [vmem:[%s14756_s1 + $0x230] sm:$0xff]   ;;  %v4189_v53 = vrot.slane %v4187_v45, 4  ;;  %v4169_v30 = vshll.u32 %v13470_v14, 16 }
 0x1f9   : > { %v4100_v37 = vsel %vm12047_vm2, %v4095_v16, %v4099_v20  ;;  %v4124_v28 = vsel %vm12047_vm2, %v4119_v51, %v4123_v58  ;;  %v13821_v17 = vrot.slane %v4159_v19, 5  ;;  %v4133_v16 = vrot.slane %v4132_v8, 4  ;;  %v9361_v51 = vld [vmem:[%s12015_s12 + $0xc0] sm:$0xf] }
 0x1fa   : > { %v13823_v13 = vrot.slane %v4183_v33, 5  ;;  %v4143_v20 = vrot.slane %v4142_v42, 4  ;;  %v9392_v34 = vcombine.low %v4114_v56, %v4124_v28  ;;  %v4198_v0 = vshrl.u32 %v9358_v27, 16 }
 0x1fb   : > { %10604 = vmatpush3.bf16.msra.mxu0 %v11842_v29  ;;  %v4163_v29 = vshrl.u32 %v13467_v49, 16  ;;  %v4155_v49 = vrot.slane %v4153_v22, 5  ;;  %v4201_v19 = vshll.u32 %v9358_v27, 16  ;;  %v4207_v14 = vshll.u32 %v13539_v59, 16 }
 0x1fc   : > { %10605 = vmatprep.subr.bf16.mxu0 %v11843_v5  ;;  %v4190_v58 = vor.u32 %v4189_v53, %v13823_v13  ;;  %v4231_v33 = vshll.u32 %v13606_v50, 16  ;;  %v4235_v45 = vshrl.u32 %v13606_v50, 16  ;;  %v4217_v53 = vshll.u32 %v13547_v26, 16 }
 0x1fd   : > { %v4165_v57 = vrot.slane %v4163_v29, 4  ;;  %v4156_v61 = vor.u32 %v4155_v49, %v4152_v43  ;;  %v4138_v29 = vsel %vm12047_vm2, %v4133_v16, %v13797_v46  ;;  %v4200_v43 = vrot.slane %v4198_v0, 4 }
 0x1fe   : > { %10574 = vmatmul.mubr.bf16.gmra.mrb[8].mxu0 %v9388_v2  ;;  %v9391_v2 = vcombine.low %v4090_v35, %v4100_v37  ;;  %v4193_v35 = vshll.u32 %v13536_v3, 16  ;;  %v4171_v3 = vrot.slane %v4169_v30, 5  ;;  %v4222_v37 = vshrl.u32 %v9361_v51, 16 }
 0x1ff   : > { %10577 = vmatprep.mubr.bf16.mxu0 %v9389_v1  ;;  %10606 = vmatpush3.bf16.msra.mxu0 %v11843_v5  ;;  %v4176_v5 = vrot.slane %v4174_v62, 4  ;;  %v4147_v1 = vrot.slane %v4145_v38, 5  ;;  %v4166_v39 = vor.u32 %v4165_v57, %v13821_v17  ;;  %v4157_v25 = vrot.slane %v4156_v61, 4 }
 0x200   : > { %10607 = vmatprep.subr.bf16.mxu0 %v11844_v60  ;;  %v4225_v38 = vshll.u32 %v9361_v51, 16  ;;  %v4195_v42 = vrot.slane %v4193_v35, 5  ;;  %v4191_v49 = vrot.slane %v4190_v58, 4  ;;  %v4203_v46 = vrot.slane %v4201_v19, 5 }
 0x201   : > { %v4180_v22 = vor.u32 %v4179_v4, %v4176_v5  ;;  %v4148_v62 = vsel %vm12047_vm2, %v4143_v20, %v4147_v1  ;;  %v4224_v57 = vrot.slane %v4222_v37, 4  ;;  %v4233_v5 = vrot.slane %v4231_v33, 5 }
 0x202   : > { %v9393_v28 = vcombine.low %v4138_v29, %v4148_v62  ;;  %v4237_v4 = vrot.slane %v4235_v45, 4  ;;  %v4162_v50 = vsel %vm12047_vm2, %v4157_v25, %v13821_v17  ;;  %v4196_v16 = vsel %vm12047_vm2, %v4191_v49, %v4195_v42  ;;  %v9407_v42 = vld [vmem:[%s12015_s12 + $0x18] sm:$0xe] }
 0x203   : > { %10608 = vmatpush3.bf16.msra.mxu0 %v11844_v60  ;;  %v4211_v60 = vshrl.u32 %v13539_v59, 16  ;;  %v4167_v59 = vrot.slane %v4166_v39, 4  ;;  %v4181_v8 = vrot.slane %v4180_v22, 4  ;;  %v4204_v20 = vor.u32 %v4203_v46, %v4200_v43 }
 0x204   : > { %10609 = vmatprep.subr.bf16.mxu0 %v11845_v21  ;;  %v4255_v17 = vshll.u32 %v13612_v47, 16  ;;  %v4259_v39 = vshrl.u32 %v13612_v47, 16  ;;  %v4238_v35 = vor.u32 %v4237_v4, %v4233_v5  ;;  %v4241_v26 = vshll.u32 %v13609_v52, 16 }
 0x205   : > { %v4213_v56 = vrot.slane %v4211_v60, 4  ;;  %v4172_v1 = vsel %vm12047_vm2, %v4167_v59, %v4171_v3  ;;  %v4186_v27 = vsel %vm12047_vm2, %v4181_v8, %v13823_v13  ;;  %v4205_v51 = vrot.slane %v4204_v20, 4 }
 0x206   : > { %10578 = vmatmul.mubr.bf16.gmra.mrb[12].mxu0 %v9390_v6  ;;  %v4209_v6 = vrot.slane %v4207_v14, 5  ;;  %v9395_v0 = vcombine.low %v4186_v27, %v4196_v16  ;;  %v4219_v58 = vrot.slane %v4217_v53, 5  ;;  %v4257_v60 = vrot.slane %v4255_v17, 5 }
 0x207   : > { %10581 = vmatprep.mubr.bf16.mxu0 %v9391_v2  ;;  %10610 = vmatpush3.bf16.msra.mxu0 %v11845_v21  ;;  %v4227_v21 = vrot.slane %v4225_v38, 5  ;;  %v9364_v2 = vld [vmem:[%s12015_s12 + $0xcc] sm:$0xf]  ;;  %v4261_v29 = vrot.slane %v4259_v39, 4  ;;  %v4239_v25 = vrot.slane %v4238_v35, 4  ;;  %v4243_v3 = vrot.slane %v4241_v26, 5 }
 0x208   : > { %10611 = vmatprep.subr.bf16.mxu0 %v11846_v48  ;;  %v4214_v61 = vor.u32 %v4213_v56, %v4209_v6  ;;  %v4246_v30 = vshrl.u32 %v9364_v2, 16  ;;  %v4210_v47 = vsel %vm12047_vm2, %v4205_v51, %v4209_v6  ;;  %v4265_v33 = vshll.u32 %v13621_v54, 16  ;;  %v9410_v35 = vld [vmem:[%s12015_s12 + $0x3c] sm:$0xe] }
 0x209   : > { %v4228_v22 = vor.u32 %v4227_v21, %v4224_v57  ;;  %v4262_v38 = vor.u32 %v4261_v29, %v4257_v60  ;;  %v4244_v59 = vsel %vm12047_vm2, %v4239_v25, %v4243_v3  ;;  %v4657_v8 = vrot.slane %v13341_v44, 5  ;;  %v9413_v3 = vld [vmem:[%s12015_s12 + $0x60] sm:$0xe] }
 0x20a   : > { %v4215_v13 = vrot.slane %v4214_v61, 4  ;;  %v4248_v19 = vrot.slane %v4246_v30, 4  ;;  %v4267_v56 = vrot.slane %v4265_v33, 5  ;;  %v4660_v54 = vrot.slane %v13379_v23, 5  ;;  %v9409_v23 = vld [vmem:[%s12015_s12 + $0x30] sm:$0xe] }
 0x20b   : > { %10612 = vmatpush3.bf16.msra.mxu0 %v11846_v48  ;;  %v4249_v48 = vshll.u32 %v9364_v2, 16  ;;  %v4229_v62 = vrot.slane %v4228_v22, 4  ;;  %v4263_v6 = vrot.slane %v4262_v38, 4  ;;  %v4659_v57 = vrot.slane %v4657_v8, 4  ;;  %v14915_v33 = vld [vmem:[#allocation22_spill] sm:$0xff] }
 0x20c   : > { %10645 = vmatprep.subr.bf16.mxu0 %v13680_v41  ;;  %v4220_v52 = vsel %vm12047_vm2, %v4215_v13, %v4219_v58  ;;  %v4667_v61 = vrot.slane %v13396_v31, 5  ;;  %v9425_v30 = vrot.slane %v9409_v23, 9  ;;  %v4678_v39 = vrot.slane %v13453_v7, 5  ;;  %v14914_v7 = vld [vmem:[#allocation17_spill] sm:$0xff]  ;;  %v14929_v23 = vld [vmem:[#allocation12_spill] sm:$0xff] }
 0x20d   : > { %v4251_v14 = vrot.slane %v4249_v48, 5  ;;  %v4234_v45 = vsel %vm12047_vm2, %v4229_v62, %v4233_v5  ;;  %v9396_v43 = vcombine.low %v4210_v47, %v4220_v52  ;;  %v4268_v44 = vsel %vm12047_vm2, %v4263_v6, %v4267_v56  ;;  %v14917_v6 = vld [vmem:[#allocation5_spill] sm:$0xff] }
 0x20e   : > { %10582 = vmatmul.mubr.bf16.gmra.mrb[16].mxu0 %v9392_v34  ;;  %v9394_v34 = vcombine.low %v4162_v50, %v4172_v1  ;;  %v9397_v49 = vcombine.low %v4234_v45, %v4244_v59  ;;  %v4664_v5 = vrot.slane %v13367_v63, 5  ;;  %v4661_v2 = vsel %vm12380_vm5, %v4659_v57, %v4660_v54  ;;  %v9408_v50 = vld [vmem:[%s12015_s12 + $0x24] sm:$0xe]  ;;  %v14916_v59 = vld [vmem:[#allocation23_spill] sm:$0xff] }
 0x20f   : > { %10585 = vmatprep.mubr.bf16.mxu0 %v9393_v28  ;;  %v4252_v37 = vor.u32 %v4251_v14, %v4248_v19  ;;  %v9423_v28 = vrot.slane %v9407_v42, 9  ;;  %v4671_v1 = vrot.slane %v13421_v9, 5  ;;  %v9424_v16 = vrot.slane %v9408_v50, 9  ;;  %v14927_v50 = vld [vmem:[#allocation4_spill] sm:$0xff] }
 0x210   : > { %v4666_v20 = vrot.slane %v4664_v5, 4  ;;  %v4674_v48 = vrot.slane %v13458_v10, 5  ;;  %v4685_v26 = vrot.slane %v13558_v18, 5  ;;  %v9411_v10 = vld [vmem:[%s12015_s12 + $0x48] sm:$0xe]  ;;  %v9426_v51 = vrot.slane %v9410_v35, 9 }
 0x211   : > { %v4253_v46 = vrot.slane %v4252_v37, 4  ;;  %v4658_v4 = vsel %vm12380_vm5, %v9423_v28, %v4657_v8  ;;  %v4673_v63 = vrot.slane %v4671_v1, 4  ;;  %v4665_v17 = vsel %vm12380_vm5, %v9424_v16, %v4664_v5  ;;  %v14933_v16 = vld [vmem:[#allocation3_spill] sm:$0xff]  ;;  %v11851_v35 = vld [vmem:[%s14758_s3 + $0x60] sm:$0xff]  }
 0x212   : > { %v9455_v27 = vcombine.low %v4658_v4, %v4661_v2  ;;  %v4668_v9 = vsel %vm12380_vm5, %v4666_v20, %v4667_v61  ;;  %v4672_v22 = vsel %vm12380_vm5, %v9425_v30, %v4671_v1  ;;  %v4680_v13 = vrot.slane %v4678_v39, 4  ;;  %v14924_v4 = vld [vmem:[#allocation10_spill] sm:$0xff]  ;;  %v14926_v2 = vld [vmem:[#allocation11_spill] sm:$0xff]  ;;  %v14936_v30 = vld [vmem:[#allocation16_spill] sm:$0xff]  ;;  %11129 = vmatprep.subr.bf16.mxu1 %v11851_v35 }
 0x213   : > { %v4258_v21 = vsel %vm12047_vm2, %v4253_v46, %v4257_v60  ;;  %v4675_v31 = vsel %vm12380_vm5, %v4673_v63, %v4674_v48  ;;  %v4681_v58 = vrot.slane %v13486_v15, 5  ;;  %v9427_v19 = vrot.slane %v9411_v10, 9  ;;  %v14935_v61 = vld [vmem:[#allocation15_spill] sm:$0xff]  ;;  %v14938_v48 = vld [vmem:[#allocation18_spill] sm:$0xff]  ;;  %11137 = vmatpush3.bf16.msra.mxu1 %v11851_v35 }
 0x214   : > { %v9398_v53 = vcombine.low %v4258_v21, %v4268_v44  ;;  %v4687_v14 = vrot.slane %v4685_v26, 4  ;;  %v4688_v60 = vrot.slane %v14914_v7, 5  ;;  %v4679_v29 = vsel %vm12380_vm5, %v9426_v51, %v4678_v39  ;;  %v14920_v21 = vld [vmem:[#allocation6_spill] sm:$0xff]  ;;  %v14921_v44 = vld [vmem:[#allocation7_spill] sm:$0xff]  ;;  %v14941_v39 = vld [vmem:[#allocation20_spill] sm:$0xff] }
 0x215   : > { %v4682_v18 = vsel %vm12380_vm5, %v4680_v13, %v4681_v58  ;;  %v4686_v62 = vsel %vm12380_vm5, %v9427_v19, %v4685_v26  ;;  %v4699_v25 = vrot.slane %v13636_v24, 5  ;;  %v9429_v37 = vrot.slane %v9413_v3, 9  ;;  %v11852_v26 = vld [vmem:[%s14758_s3 + $0x68] sm:$0xff]   ;;  %v13970_v19 = vld [vmem:[%s14758_s3] sm:$0xff]  }
 0x216   : > { %10586 = vmatmul.mubr.bf16.gmra.mrb[20].mxu0 %v9394_v34  ;;  %v9456_v34 = vcombine.low %v4665_v17, %v4668_v9  ;;  %v4689_v15 = vsel %vm12380_vm5, %v4687_v14, %v4688_v60  ;;  %v9458_v47 = vcombine.low %v4679_v29, %v4682_v18  ;;  %v4713_v8 = vrot.slane %v14916_v59, 5  ;;  %v14939_v17 = vld [vmem:[#allocation19_spill] sm:$0xff]  ;;  %11130 = vmatprep.subr.bf16.mxu1 %v11852_v26  ;;  %v13976_v14 = vld [vmem:[%s14757_s2] ss:$0 sm:$0xff] }
 0x217   : > { %10589 = vmatprep.mubr.bf16.mxu0 %v9395_v0  ;;  %v9457_v0 = vcombine.low %v4672_v22, %v4675_v31  ;;  %v9459_v52 = vcombine.low %v4686_v62, %v4689_v15  ;;  %v4701_v38 = vrot.slane %v4699_v25, 4  ;;  %v4700_v24 = vsel %vm12380_vm5, %v9429_v37, %v4699_v25  ;;  %v14942_v22 = vld [vmem:[#allocation21_spill] sm:$0xff]  ;;  %11138 = vmatpush3.bf16.msra.mxu1 %v11852_v26 }
 0x218   : > { %v4716_v46 = vrot.slane %v13770_v32, 5  ;;  %v14922_v5 = vcombine.low %v14920_v21, %v14921_v44  ;;  %v14928_v1 = vcombine.low %v14926_v2, %v14927_v50  ;;  %v14934_v20 = vcombine.low %v14932_v55, %v14933_v16 }
 0x219   : > { %v14937_v63 = vcombine.low %v14935_v61, %v14936_v30  ;;  %v14940_v9 = vcombine.low %v14938_v48, %v14939_v17  ;;  %v14943_v31 = vcombine.low %v14941_v39, %v14942_v22  ;;  %v11950_v10 = vmov 0.0  }
 0x21a   : > { %5166 = vst [vmem:[#allocation2 + $0x30] sm:$0xff] %v11950_v10  ;;  %5167 = vst [vmem:[#allocation2 + $0x38] sm:$0xff] %v11950_v10 }
 0x21b   : > { %5160 = vst [vmem:[#allocation2] sm:$0xff] %v11950_v10  ;;  %5161 = vst [vmem:[#allocation2 + $0x8] sm:$0xff] %v11950_v10 }
 0x21c   : > { %5162 = vst [vmem:[#allocation2 + $0x10] sm:$0x3] %v11950_v10  ;;  %5163 = vst [vmem:[#allocation2 + $0x18] sm:$0xff] %v11950_v10 }
 0x21d   : > { %5164 = vst [vmem:[#allocation2 + $0x20] sm:$0xff] %v11950_v10  ;;  %5165 = vst [vmem:[#allocation2 + $0x28] sm:$0x3] %v11950_v10 }
 0x21e   : > { %10590 = vmatmul.mubr.bf16.gmra.mrb[24].mxu0 %v9396_v43  ;;  %5168 = vst [vmem:[#allocation2 + $0x40] sm:$0x3] %v11950_v10  ;;  %5169 = vst [vmem:[#allocation2 + $0x48] sm:$0xff] %v11950_v10 }
 0x21f   : > { %10593 = vmatprep.mubr.bf16.mxu0 %v9397_v49  ;;  %v4715_v49 = vrot.slane %v4713_v8, 4  ;;  %5170 = vst [vmem:[#allocation2 + $0x50] sm:$0xff] %v11950_v10  ;;  %5171 = vst [vmem:[#allocation2 + $0x58] sm:$0x3] %v11950_v10 }
 0x220   : > { %5172 = vst [vmem:[#allocation2 + $0x60] sm:$0xff] %v11950_v10  ;;  %5173 = vst [vmem:[#allocation2 + $0x68] sm:$0xff] %v11950_v10 }
 0x221   : > { %v4717_v57 = vsel %vm12380_vm5, %v4715_v49, %v4716_v46  ;;  %5174 = vst [vmem:[#allocation2 + $0x70] sm:$0x3] %v11950_v10  ;;  %5175 = vst [vmem:[#allocation2 + $0x78] sm:$0xff] %v11950_v10 }
 0x222   : > { %5176 = vst [vmem:[#allocation2 + $0x80] sm:$0xff] %v11950_v10  ;;  %5177 = vst [vmem:[#allocation2 + $0x88] sm:$0x3] %v11950_v10  ;;  %v5311_v51 = vld [vmem:[#allocation2 + $0x1] sm:$0xff] }
 0x223   : > { %5178 = vst [vmem:[#allocation2 + $0x90] sm:$0xff] %v11950_v10  ;;  %5179 = vst [vmem:[#allocation2 + $0x98] sm:$0xff] %v11950_v10  ;;  %v5312_v13 = vld [vmem:[#allocation2 + $0x9] sm:$0xff] }
 0x224   : > { %5180 = vst [vmem:[#allocation2 + $0xa0] sm:$0x3] %v11950_v10  ;;  %5181 = vst [vmem:[#allocation2 + $0xa8] sm:$0xff] %v11950_v10  ;;  %v5343_v58 = vpack.c.bf16 %v5312_v13, %v5311_v51 }
 0x225   : > { %5182 = vst [vmem:[#allocation2 + $0xb0] sm:$0xff] %v11950_v10  ;;  %5183 = vst [vmem:[#allocation2 + $0xb8] sm:$0x3] %v11950_v10 }
 0x226   : > { %10594 = vmatmul.mubr.bf16.gmra.mrb[28].mxu0 %v9398_v53  ;;  %v14930_v53 = vld [vmem:[#allocation13_spill] sm:$0xff]  ;;  %5184 = vst [vmem:[#allocation2 + $0xc0] sm:$0xff] %v11950_v10  ;;  %5185 = vst [vmem:[#allocation2 + $0xc8] sm:$0xff] %v11950_v10 }
 0x227   : > { %10613 = vmatprep.mubr.bf16.mxu0 %v9455_v27  ;;  %v14931_v27 = vcombine.low %v14929_v23, %v14930_v53  ;;  %5186 = vst [vmem:[#allocation2 + $0xd0] sm:$0x3] %v11950_v10  ;;  %5187 = vst [vmem:[#allocation2 + $0xd8] sm:$0xff] %v11950_v10 }
 0x228   : > { %5188 = vst [vmem:[#allocation2 + $0xe0] sm:$0xff] %v11950_v10  ;;  %5189 = vst [vmem:[#allocation2 + $0xe8] sm:$0x3] %v11950_v10 }
 0x229   : > { %5190 = vst [vmem:[#allocation2 + $0xf0] sm:$0xff] %v11950_v10  ;;  %5191 = vst [vmem:[#allocation2 + $0xf8] sm:$0xff] %v11950_v10 }
 0x22a   : > { %5192 = vst [vmem:[#allocation2 + $0x100] sm:$0x3] %v11950_v10  ;;  %5193 = vst [vmem:[#allocation2 + $0x108] sm:$0xff] %v11950_v10 }
 0x22b   : > { %5194 = vst [vmem:[#allocation2 + $0x110] sm:$0xff] %v11950_v10  ;;  %5195 = vst [vmem:[#allocation2 + $0x118] sm:$0x3] %v11950_v10 }
 0x22c   : > { %5196 = vst [vmem:[#allocation2 + $0x120] sm:$0xff] %v11950_v10  ;;  %5197 = vst [vmem:[#allocation2 + $0x128] sm:$0xff] %v11950_v10 }
 0x22d   : > { %5198 = vst [vmem:[#allocation2 + $0x130] sm:$0x3] %v11950_v10  ;;  %5199 = vst [vmem:[#allocation2 + $0x138] sm:$0xff] %v11950_v10 }
 0x22e   : > { %10614 = vmatmul.mubr.bf16.vlgmr.msra.gmra.mrb[0].mxu0 %v9456_v34  ;;  %5200 = vst [vmem:[#allocation2 + $0x140] sm:$0xff] %v11950_v10  ;;  %5201 = vst [vmem:[#allocation2 + $0x148] sm:$0x3] %v11950_v10  ;;  %v11853_v34 = vld [vmem:[%s14758_s3 + $0x70] sm:$0xff]  }
 0x22f   : > { %10617 = vmatprep.mubr.bf16.mxu0 %v9457_v0  ;;  %10646 = vmatpush3.bf16.msra.mxu0 %v13680_v41  ;;  %v4702_v41 = vrot.slane %v14915_v33, 5  ;;  %5202 = vst [vmem:[#allocation2 + $0x150] sm:$0xff] %v11950_v10  ;;  %5203 = vst [vmem:[#allocation2 + $0x158] sm:$0xff] %v11950_v10  ;;  %v11854_v0 = vld [vmem:[%s14758_s3 + $0x78] sm:$0xff]  }
 0x230   : > { %10647 = vmatprep.subr.bf16.mxu0 %v13694_v40  ;;  %5204 = vst [vmem:[#allocation2 + $0x160] sm:$0x3] %v11950_v10  ;;  %5205 = vst [vmem:[#allocation2 + $0x168] sm:$0xff] %v11950_v10  ;;  %11131 = vmatprep.subr.bf16.mxu1 %v11853_v34 }
 0x231   : > { %v4703_v45 = vsel %vm12380_vm5, %v4701_v38, %v4702_v41  ;;  %5206 = vst [vmem:[#allocation2 + $0x170] sm:$0xff] %v11950_v10  ;;  %5207 = vst [vmem:[#allocation2 + $0x178] sm:$0x3] %v11950_v10  ;;  %11139 = vmatpush3.bf16.msra.mxu1 %v11853_v34 }
 0x232   : > { %v9461_v42 = vcombine.low %v4700_v24, %v4703_v45  ;;  %5208 = vst [vmem:[#allocation2 + $0x180] sm:$0xff] %v11950_v10  ;;  %5209 = vst [vmem:[#allocation2 + $0x188] sm:$0xff] %v11950_v10  ;;  %11132 = vmatprep.subr.bf16.mxu1 %v11854_v0 }
 0x233   : > { %10648 = vmatpush3.bf16.msra.mxu0 %v13694_v40  ;;  %v9415_v40 = vld [vmem:[%s12015_s12 + $0x78] sm:$0xe]  ;;  %5210 = vst [vmem:[#allocation2 + $0x190] sm:$0x3] %v11950_v10  ;;  %5211 = vst [vmem:[#allocation2 + $0x198] sm:$0xff] %v11950_v10 }
 0x234   : > { %10649 = vmatprep.subr.bf16.mxu0 %v13729_v36  ;;  %v9431_v43 = vrot.slane %v9415_v40, 9  ;;  %5212 = vst [vmem:[#allocation2 + $0x1a0] sm:$0xff] %v11950_v10  ;;  %5213 = vst [vmem:[#allocation2 + $0x1a8] sm:$0x3] %v11950_v10 }
 0x235   : > { %11140 = vmatpush3.bf16.msra.mxu1 %v11854_v0 }
 0x236   : > { %10618 = vmatmul.mubr.bf16.gmra.mrb[4].mxu0 %v9458_v47  ;;  %v4714_v28 = vsel %vm12380_vm5, %v9431_v43, %v4713_v8  ;;  %10693 = vmatprep.subr.bf16.mxu1 %v13970_v19 }
 0x237   : > { %10621 = vmatprep.mubr.bf16.mxu0 %v9459_v52  ;;  %10650 = vmatpush3.bf16.msra.mxu0 %v13729_v36  ;;  %v14918_v36 = vld [vmem:[#allocation9_spill] sm:$0xff]  ;;  %v9463_v54 = vcombine.low %v4714_v28, %v4717_v57 }
 0x238   : > { %10651 = vmatprep.subr.bf16.mxu0 %v13751_v12  ;;  %v14919_v56 = vcombine.low %v14917_v6, %v14918_v36 }
 0x23b   : > { %10652 = vmatpush3.bf16.msra.mxu0 %v13751_v12  ;;  %v14923_v12 = vld [vmem:[#allocation8_spill] sm:$0xff] }
 0x23c   : > { %v14925_v32 = vcombine.low %v14923_v12, %v14924_v4  ;;  %10653 = vmatprep.subr.bf16.mxu0 %v11851_v35 }
 0x23e   : > { %10622 = vmatmul.mubr.bf16.gmra.mrb[8].mxu0 %v14919_v56 }
 0x23f   : > { %10625 = vmatprep.mubr.bf16.mxu0 %v9461_v42  ;;  %10654 = vmatpush3.bf16.msra.mxu0 %v11851_v35 }
 0x240   : > { %10655 = vmatprep.subr.bf16.mxu0 %v11852_v26 }
 0x243   : > { %10656 = vmatpush3.bf16.msra.mxu0 %v11852_v26 }
 0x244   : > { %10657 = vmatprep.subr.bf16.mxu0 %v11853_v34 }
 0x246   : > { %10626 = vmatmul.mubr.bf16.gmra.mrb[12].mxu0 %v14922_v5 }
 0x247   : > { %10629 = vmatprep.mubr.bf16.mxu0 %v9463_v54  ;;  %10658 = vmatpush3.bf16.msra.mxu0 %v11853_v34 }
 0x248   : > { %10659 = vmatprep.subr.bf16.mxu0 %v11854_v0 }
 0x24b   : > { %10660 = vmatpush3.bf16.msra.mxu0 %v11854_v0 }
 0x24e   : > { %10630 = vmatmul.mubr.bf16.gmra.mrb[16].mxu0 %v14925_v32 }
 0x24f   : > { %10633 = vmatprep.mubr.bf16.mxu0 %v14928_v1 }
 0x256   : > { %10634 = vmatmul.mubr.bf16.gmra.mrb[20].mxu0 %v14931_v27 }
 0x257   : > { %10637 = vmatprep.mubr.bf16.mxu0 %v14934_v20 }
 0x25e   : > { %10638 = vmatmul.mubr.bf16.gmra.mrb[24].mxu0 %v14937_v63 }
 0x25f   : > { %10641 = vmatprep.mubr.bf16.mxu0 %v14940_v9 }
 0x266   : > { %10642 = vmatmul.mubr.bf16.gmra.mrb[28].mxu0 %v14943_v31 }
 0x267   : > { %10661 = vmatprep.mubr.bf16.mxu0 %v5343_v58 }
 0x301   : > { %v10615_v7 = vpop.f32.mrb[0].mxu0 }
 0x302   : > { %v5098_v60 = vadd.f32 %v10615_v7, %v13976_v14  ;;  %v4930_v29 = vpop.f32.mrb[1].mxu0 }
 0x303   : > { %v5096_v18 = vadd.f32 %v13976_v14, %v4930_v29  ;;  %v10616_v62 = vpop.f32.mrb[2].mxu0 }
 0x304   : > { %v5130_v15 = vmax.f32 %v5098_v60, 0.0  ;;  %v5099_v25 = vadd.f32 %v10616_v62, %v13976_v14  ;;  %v4933_v3 = vpop.f32.mrb[3].mxu0 }
 0x305   : > { %v5128_v47 = vmax.f32 %v5096_v18, 0.0  ;;  %v5097_v52 = vadd.f32 %v13976_v14, %v4933_v3 }
 0x306   : > { %5217 = vst [vmem:[#allocation2 + $0x31] sm:$0xff] %v5130_v15  ;;  %v5131_v37 = vmax.f32 %v5099_v25, 0.0 }
 0x307   : > { %5215 = vst [vmem:[#allocation2 + $0x19] sm:$0xff] %v5128_v47  ;;  %v5129_v38 = vmax.f32 %v5097_v52, 0.0 }
 0x308   : > { %5218 = vst [vmem:[#allocation2 + $0x39] sm:$0xff] %v5131_v37  ;;  %v5345_v33 = vpack.c.bf16 %v5131_v37, %v5130_v15  ;;  %v11856_v37 = vld [vmem:[%s14758_s3 + $0x8] sm:$0xff]  }
 0x309   : > { %5216 = vst [vmem:[#allocation2 + $0x21] sm:$0xff] %v5129_v38  ;;  %v10619_v41 = vpop.f32.mrb[4].mxu0  ;;  %v5344_v24 = vpack.c.bf16 %v5129_v38, %v5128_v47 }
 0x30a   : > { %v5102_v45 = vadd.f32 %v10619_v41, %v13976_v14  ;;  %v4946_v59 = vpop.f32.mrb[5].mxu0 }
 0x30b   : > { %v5100_v8 = vadd.f32 %v13976_v14, %v4946_v59  ;;  %v10620_v40 = vpop.f32.mrb[6].mxu0  ;;  %10662 = vmatmul.mubr.bf16.vlgmr.msra.gmra.mrb[32].mxu0 %v5344_v24 }
 0x30c   : > { %v5134_v42 = vmax.f32 %v5102_v45, 0.0  ;;  %v5103_v43 = vadd.f32 %v10620_v40, %v13976_v14  ;;  %v4949_v49 = vpop.f32.mrb[7].mxu0  ;;  %10665 = vmatprep.mubr.bf16.mxu0 %v5345_v33 }
 0x30d   : > { %v5132_v46 = vmax.f32 %v5100_v8, 0.0  ;;  %v5101_v6 = vadd.f32 %v13976_v14, %v4949_v49 }
 0x30e   : > { %5221 = vst [vmem:[#allocation2 + $0x61] sm:$0xff] %v5134_v42  ;;  %v5135_v36 = vmax.f32 %v5103_v43, 0.0  ;;  %v11857_v43 = vld [vmem:[%s14758_s3 + $0x10] sm:$0xff]  }
 0x30f   : > { %5219 = vst [vmem:[#allocation2 + $0x49] sm:$0xff] %v5132_v46  ;;  %v5133_v56 = vmax.f32 %v5101_v6, 0.0 }
 0x310   : > { %5222 = vst [vmem:[#allocation2 + $0x69] sm:$0xff] %v5135_v36  ;;  %v5347_v28 = vpack.c.bf16 %v5135_v36, %v5134_v42 }
 0x311   : > { %5220 = vst [vmem:[#allocation2 + $0x51] sm:$0xff] %v5133_v56  ;;  %v10623_v57 = vpop.f32.mrb[8].mxu0  ;;  %v5346_v54 = vpack.c.bf16 %v5133_v56, %v5132_v46 }
 0x312   : > { %v5106_v21 = vadd.f32 %v10623_v57, %v13976_v14  ;;  %v4962_v44 = vpop.f32.mrb[9].mxu0 }
 0x313   : > { %v5104_v5 = vadd.f32 %v13976_v14, %v4962_v44  ;;  %v10624_v12 = vpop.f32.mrb[10].mxu0  ;;  %10666 = vmatmul.mubr.bf16.gmra.mrb[36].mxu0 %v5346_v54 }
 0x314   : > { %v5138_v4 = vmax.f32 %v5106_v21, 0.0  ;;  %v5107_v32 = vadd.f32 %v10624_v12, %v13976_v14  ;;  %v4965_v2 = vpop.f32.mrb[11].mxu0  ;;  %10669 = vmatprep.mubr.bf16.mxu0 %v5347_v28 }
 0x315   : > { %v5136_v50 = vmax.f32 %v5104_v5, 0.0  ;;  %v5105_v1 = vadd.f32 %v13976_v14, %v4965_v2  ;;  %v11859_v2 = vld [vmem:[%s14758_s3 + $0x20] sm:$0xff]  }
 0x316   : > { %5225 = vst [vmem:[#allocation2 + $0x91] sm:$0xff] %v5138_v4  ;;  %v5139_v23 = vmax.f32 %v5107_v32, 0.0 }
 0x317   : > { %5223 = vst [vmem:[#allocation2 + $0x79] sm:$0xff] %v5136_v50  ;;  %v5137_v53 = vmax.f32 %v5105_v1, 0.0 }
 0x318   : > { %5226 = vst [vmem:[#allocation2 + $0x99] sm:$0xff] %v5139_v23  ;;  %v5349_v27 = vpack.c.bf16 %v5139_v23, %v5138_v4 }
 0x319   : > { %5224 = vst [vmem:[#allocation2 + $0x81] sm:$0xff] %v5137_v53  ;;  %v10627_v55 = vpop.f32.mrb[12].mxu0  ;;  %v5348_v16 = vpack.c.bf16 %v5137_v53, %v5136_v50 }
 0x31a   : > { %v5110_v20 = vadd.f32 %v10627_v55, %v13976_v14  ;;  %v4978_v61 = vpop.f32.mrb[13].mxu0  ;;  %v11860_v55 = vld [vmem:[%s14758_s3 + $0x28] sm:$0xff]  }
 0x31b   : > { %v5108_v30 = vadd.f32 %v13976_v14, %v4978_v61  ;;  %v10628_v63 = vpop.f32.mrb[14].mxu0  ;;  %10670 = vmatmul.mubr.bf16.gmra.mrb[40].mxu0 %v5348_v16 }
 0x31c   : > { %v5142_v48 = vmax.f32 %v5110_v20, 0.0  ;;  %v5111_v17 = vadd.f32 %v10628_v63, %v13976_v14  ;;  %v4981_v9 = vpop.f32.mrb[15].mxu0  ;;  %10673 = vmatprep.mubr.bf16.mxu0 %v5349_v27 }
 0x31d   : > { %v5140_v39 = vmax.f32 %v5108_v30, 0.0  ;;  %v5109_v22 = vadd.f32 %v13976_v14, %v4981_v9 }
 0x31e   : > { %5229 = vst [vmem:[#allocation2 + $0xc1] sm:$0xff] %v5142_v48  ;;  %v5143_v31 = vmax.f32 %v5111_v17, 0.0 }
 0x31f   : > { %5227 = vst [vmem:[#allocation2 + $0xa9] sm:$0xff] %v5140_v39  ;;  %v5141_v35 = vmax.f32 %v5109_v22, 0.0  ;;  %v11861_v22 = vld [vmem:[%s14758_s3 + $0x30] sm:$0xff]  }
 0x320   : > { %5230 = vst [vmem:[#allocation2 + $0xc9] sm:$0xff] %v5143_v31  ;;  %v5351_v26 = vpack.c.bf16 %v5143_v31, %v5142_v48 }
 0x321   : > { %5228 = vst [vmem:[#allocation2 + $0xb1] sm:$0xff] %v5141_v35  ;;  %v10631_v10 = vpop.f32.mrb[16].mxu0  ;;  %v5350_v34 = vpack.c.bf16 %v5141_v35, %v5140_v39 }
 0x322   : > { %v5114_v0 = vadd.f32 %v10631_v10, %v13976_v14  ;;  %v4994_v51 = vpop.f32.mrb[17].mxu0  ;;  %10677 = vmatprep.mubr.bf16.mxu1 %v5351_v26 }
 0x323   : > { %v5112_v13 = vadd.f32 %v13976_v14, %v4994_v51  ;;  %v10632_v58 = vpop.f32.mrb[18].mxu0  ;;  %10674 = vmatmul.mubr.bf16.gmra.mrb[44].mxu0 %v5350_v34  ;;  %v11951_v34 = vmov 0.0|0.0   ;;  %v5250_v51 = vld [vmem:[#allocation2 + $0x20] sm:$0xff] }
 0x324   : > { %v5146_v7 = vmax.f32 %v5114_v0, 0.0  ;;  %v5115_v60 = vadd.f32 %v10632_v58, %v13976_v14  ;;  %v4997_v29 = vpop.f32.mrb[19].mxu0  ;;  %v11863_v0 = vld [vmem:[%s14758_s3 + $0x80] sm:$0xff]   ;;  %v5249_v58 = vld [vmem:[#allocation2 + $0x18] sm:$0xff] }
 0x325   : > { %v5144_v18 = vmax.f32 %v5112_v13, 0.0  ;;  %v5113_v62 = vadd.f32 %v13976_v14, %v4997_v29  ;;  %v5252_v13 = vld [vmem:[#allocation2 + $0x38] sm:$0xff]  ;;  %v11864_v29 = vld [vmem:[%s14758_s3 + $0x88] sm:$0xff]  }
 0x326   : > { %5233 = vst [vmem:[#allocation2 + $0xf1] sm:$0xff] %v5146_v7  ;;  %v5147_v15 = vmax.f32 %v5115_v60, 0.0  ;;  %v5251_v60 = vld [vmem:[#allocation2 + $0x30] sm:$0xff] }
 0x327   : > { %5231 = vst [vmem:[#allocation2 + $0xd9] sm:$0xff] %v5144_v18  ;;  %v5145_v25 = vmax.f32 %v5113_v62, 0.0  ;;  %v11865_v62 = vld [vmem:[%s14758_s3 + $0x90] sm:$0xff]  }
 0x328   : > { %5234 = vst [vmem:[#allocation2 + $0xf9] sm:$0xff] %v5147_v15  ;;  %v5353_v3 = vpack.c.bf16 %v5147_v15, %v5146_v7  ;;  %v14044_v7 = vpack.c.bf16 %v5250_v51, %v5249_v58  ;;  %v5254_v15 = vld [vmem:[#allocation2 + $0x50] sm:$0xff] }
 0x329   : > { %5232 = vst [vmem:[#allocation2 + $0xe1] sm:$0xff] %v5145_v25  ;;  %v10635_v47 = vpop.f32.mrb[20].mxu0  ;;  %v5352_v52 = vpack.c.bf16 %v5145_v25, %v5144_v18  ;;  %v14049_v18 = vpack.c.bf16 %v5252_v13, %v5251_v60  ;;  %v5256_v25 = vld [vmem:[#allocation2 + $0x68] sm:$0xff]  ;;  %v11873_v60 = vld [vmem:[%s14758_s3 + $0xd0] sm:$0xff]  }
 0x32a   : > { %v5118_v38 = vadd.f32 %v10635_v47, %v13976_v14  ;;  %v5010_v33 = vpop.f32.mrb[21].mxu0  ;;  %v11872_v13 = vld [vmem:[%s14758_s3 + $0xc8] sm:$0xff]  }
 0x32b   : > { %v5116_v41 = vadd.f32 %v13976_v14, %v5010_v33  ;;  %v10636_v24 = vpop.f32.mrb[22].mxu0  ;;  %10678 = vmatmul.mubr.bf16.vlgmr.msra.gmra.mrb[0].mxu1 %v5352_v52  ;;  %v5255_v52 = vld [vmem:[#allocation2 + $0x60] sm:$0xff] }
 0x32c   : > { %v5150_v45 = vmax.f32 %v5118_v38, 0.0  ;;  %v5119_v59 = vadd.f32 %v10636_v24, %v13976_v14  ;;  %v5013_v8 = vpop.f32.mrb[23].mxu0  ;;  %10681 = vmatprep.mubr.bf16.mxu1 %v5353_v3  ;;  %10694 = vmatpush3.bf16.msra.mxu1 %v13970_v19  ;;  %v11858_v19 = vld [vmem:[%s14758_s3 + $0x18] sm:$0xff]   ;;  %v5253_v3 = vld [vmem:[#allocation2 + $0x48] sm:$0xff]  ;;  %v14061_v38 = vpack.c.bf16 %v5256_v25, %v5255_v52  ;;  %v11867_v33 = vld [vmem:[%s14758_s3 + $0xa0] sm:$0xff]  }
 0x32d   : > { %v5148_v40 = vmax.f32 %v5116_v41, 0.0  ;;  %v5117_v42 = vadd.f32 %v13976_v14, %v5013_v8  ;;  %10695 = vmatprep.subr.bf16.mxu1 %v11856_v37  ;;  %v14056_v47 = vpack.c.bf16 %v5254_v15, %v5253_v3  ;;  %v5258_v41 = vld [vmem:[#allocation2 + $0x80] sm:$0xff]  ;;  %v5260_v24 = vld [vmem:[#allocation2 + $0x98] sm:$0xff]  ;;  %v5259_v8 = vld [vmem:[#allocation2 + $0x90] sm:$0xff] }
 0x32e   : > { %5237 = vst [vmem:[#allocation2 + $0x121] sm:$0xff] %v5150_v45  ;;  %v5151_v49 = vmax.f32 %v5119_v59, 0.0  ;;  %v5802_v15 = vld [vmem:[#allocation2 + $0x62] sm:$0xff]  ;;  %v5803_v25 = vld [vmem:[#allocation2 + $0x6a] sm:$0xff]  ;;  %v11874_v52 = vld [vmem:[%s14758_s3 + $0xd8] sm:$0xff]  }
 0x32f   : > { %5235 = vst [vmem:[#allocation2 + $0x109] sm:$0xff] %v5148_v40  ;;  %v5149_v46 = vmax.f32 %v5117_v42, 0.0  ;;  %v14073_v42 = vpack.c.bf16 %v5260_v24, %v5259_v8  ;;  %v5805_v24 = vld [vmem:[#allocation2 + $0x82] sm:$0xff]  ;;  %v5807_v8 = vld [vmem:[#allocation2 + $0x9a] sm:$0xff] }
 0x330   : > { %5238 = vst [vmem:[#allocation2 + $0x129] sm:$0xff] %v5151_v49  ;;  %10696 = vmatpush3.bf16.msra.mxu1 %v11856_v37  ;;  %v5355_v6 = vpack.c.bf16 %v5151_v49, %v5150_v45  ;;  %v11866_v37 = vld [vmem:[%s14758_s3 + $0x98] sm:$0xff]   ;;  %v5262_v49 = vld [vmem:[#allocation2 + $0xb0] sm:$0xff] }
 0x331   : > { %5236 = vst [vmem:[#allocation2 + $0x111] sm:$0xff] %v5149_v46  ;;  %v10639_v36 = vpop.f32.mrb[24].mxu0  ;;  %v5354_v56 = vpack.c.bf16 %v5149_v46, %v5148_v40  ;;  %10697 = vmatprep.subr.bf16.mxu1 %v11857_v43  ;;  %v5257_v45 = vld [vmem:[#allocation2 + $0x78] sm:$0xff]  ;;  %v11868_v40 = vld [vmem:[%s14758_s3 + $0xa8] sm:$0xff]  }
 0x332   : > { %v5122_v28 = vadd.f32 %v10639_v36, %v13976_v14  ;;  %v5026_v57 = vpop.f32.mrb[25].mxu0  ;;  %v14068_v59 = vpack.c.bf16 %v5258_v41, %v5257_v45  ;;  %v5264_v46 = vld [vmem:[#allocation2 + $0xc8] sm:$0xff]  ;;  %v5804_v41 = vld [vmem:[#allocation2 + $0x7a] sm:$0xff]  ;;  %v5806_v45 = vld [vmem:[#allocation2 + $0x92] sm:$0xff] }
 0x333   : > { %v5120_v54 = vadd.f32 %v13976_v14, %v5026_v57  ;;  %v10640_v21 = vpop.f32.mrb[26].mxu0  ;;  %10682 = vmatmul.mubr.bf16.gmra.mrb[4].mxu1 %v5354_v56  ;;  %v5263_v56 = vld [vmem:[#allocation2 + $0xc0] sm:$0xff] }
 0x334   : > { %v5154_v44 = vmax.f32 %v5122_v28, 0.0  ;;  %v5123_v5 = vadd.f32 %v10640_v21, %v13976_v14  ;;  %v5029_v12 = vpop.f32.mrb[27].mxu0  ;;  %10685 = vmatprep.mubr.bf16.mxu1 %v5355_v6  ;;  %10698 = vmatpush3.bf16.msra.mxu1 %v11857_v43  ;;  %v11869_v43 = vld [vmem:[%s14758_s3 + $0xb0] sm:$0xff]   ;;  %v5261_v6 = vld [vmem:[#allocation2 + $0xa8] sm:$0xff]  ;;  %v14085_v28 = vpack.c.bf16 %v5264_v46, %v5263_v56  ;;  %v11871_v57 = vld [vmem:[%s14758_s3 + $0xc0] sm:$0xff]  }
 0x335   : > { %v5152_v4 = vmax.f32 %v5120_v54, 0.0  ;;  %v5121_v32 = vadd.f32 %v13976_v14, %v5029_v12  ;;  %10699 = vmatprep.subr.bf16.mxu1 %v11858_v19  ;;  %v14080_v36 = vpack.c.bf16 %v5262_v49, %v5261_v6  ;;  %v5266_v54 = vld [vmem:[#allocation2 + $0xe0] sm:$0xff]  ;;  %v5268_v21 = vld [vmem:[#allocation2 + $0xf8] sm:$0xff]  ;;  %v5267_v12 = vld [vmem:[#allocation2 + $0xf0] sm:$0xff]  ;;  %v14142_v49 = vpack.c.bf16 %v5807_v8, %v5806_v45 }
 0x336   : > { %5241 = vst [vmem:[#allocation2 + $0x151] sm:$0xff] %v5154_v44  ;;  %v5155_v50 = vmax.f32 %v5123_v5, 0.0  ;;  %v11877_v46 = vld [vmem:[%s14758_s3 + $0xf0] sm:$0xff]  }
 0x337   : > { %5239 = vst [vmem:[#allocation2 + $0x139] sm:$0xff] %v5152_v4  ;;  %v14019_v1 = vmax.f32 %v5121_v32, 0.0  ;;  %v5808_v6 = vld [vmem:[#allocation2 + $0xaa] sm:$0xff]  ;;  %v5809_v56 = vld [vmem:[#allocation2 + $0xb2] sm:$0xff] }
 0x338   : > { %5242 = vst [vmem:[#allocation2 + $0x159] sm:$0xff] %v5155_v50  ;;  %10700 = vmatpush3.bf16.msra.mxu1 %v11858_v19  ;;  %v5357_v23 = vpack.c.bf16 %v5155_v50, %v5154_v44  ;;  %v11870_v19 = vld [vmem:[%s14758_s3 + $0xb8] sm:$0xff]   ;;  %v5270_v32 = vld [vmem:[#allocation2 + $0x110] sm:$0xff]  ;;  %v5269_v50 = vld [vmem:[#allocation2 + $0x108] sm:$0xff] }
 0x339   : > { %5240 = vst [vmem:[#allocation2 + $0x141] sm:$0xff] %v14019_v1  ;;  %v10643_v53 = vpop.f32.mrb[28].mxu0  ;;  %v5356_v27 = vpack.c.bf16 %v14019_v1, %v5152_v4  ;;  %10701 = vmatprep.subr.bf16.mxu1 %v11859_v2  ;;  %v5265_v44 = vld [vmem:[#allocation2 + $0xd8] sm:$0xff]  ;;  %v14094_v4 = vpack.c.bf16 %v5268_v21, %v5267_v12  ;;  %v11879_v12 = vld [vmem:[%s14758_s3 + $0x100] sm:$0xff]  }
 0x33a   : > { %v5126_v16 = vadd.f32 %v10643_v53, %v13976_v14  ;;  %v5042_v20 = vpop.f32.mrb[29].mxu0  ;;  %v14092_v5 = vpack.c.bf16 %v5266_v54, %v5265_v44  ;;  %v5271_v53 = vld [vmem:[#allocation2 + $0x120] sm:$0xff]  ;;  %v14149_v54 = vpack.c.bf16 %v5809_v56, %v5808_v6  ;;  %v11878_v21 = vld [vmem:[%s14758_s3 + $0xf8] sm:$0xff]  }
 0x33b   : > { %v5124_v61 = vadd.f32 %v13976_v14, %v5042_v20  ;;  %v10644_v30 = vpop.f32.mrb[30].mxu0  ;;  %10686 = vmatmul.mubr.bf16.gmra.mrb[8].mxu1 %v5356_v27 }
 0x33c   : > { %v5158_v63 = vmax.f32 %v5126_v16, 0.0  ;;  %v5127_v48 = vadd.f32 %v10644_v30, %v13976_v14  ;;  %v5045_v17 = vpop.f32.mrb[31].mxu0  ;;  %10689 = vmatprep.mubr.bf16.mxu1 %v5357_v23  ;;  %10702 = vmatpush3.bf16.msra.mxu1 %v11859_v2  ;;  %v5272_v2 = vld [vmem:[#allocation2 + $0x128] sm:$0xff]  ;;  %v14098_v23 = vpack.c.bf16 %v5270_v32, %v5269_v50  ;;  %v5812_v32 = vld [vmem:[#allocation2 + $0xda] sm:$0xff]  ;;  %v5814_v50 = vld [vmem:[#allocation2 + $0xf2] sm:$0xff] }
 0x33d   : > { %v5156_v9 = vmax.f32 %v5124_v61, 0.0  ;;  %v5125_v39 = vadd.f32 %v13976_v14, %v5045_v17  ;;  %10703 = vmatprep.subr.bf16.mxu1 %v11860_v55  ;;  %v11862_v14 = vld [vmem:[%s14758_s3 + $0x38] sm:$0xff]   ;;  %v14100_v27 = vpack.c.bf16 %v5272_v2, %v5271_v53  ;;  %v5275_v30 = vld [vmem:[#allocation2 + $0x150] sm:$0xff]  ;;  %v5813_v2 = vld [vmem:[#allocation2 + $0xe2] sm:$0xff] }
 0x33e   : > { %5245 = vst [vmem:[#allocation2 + $0x181] sm:$0xff] %v5158_v63  ;;  %v5159_v31 = vmax.f32 %v5127_v48, 0.0  ;;  %v5273_v20 = vld [vmem:[#allocation2 + $0x138] sm:$0xff]  ;;  %v5794_v48 = vld [vmem:[#allocation2 + $0x2] sm:$0xff]  ;;  %v5795_v17 = vld [vmem:[#allocation2 + $0xa] sm:$0xff] }
 0x33f   : > { %5243 = vst [vmem:[#allocation2 + $0x169] sm:$0xff] %v5156_v9  ;;  %v5157_v35 = vmax.f32 %v5125_v39, 0.0  ;;  %v5276_v16 = vld [vmem:[#allocation2 + $0x158] sm:$0xff] }
 0x340   : > { %5246 = vst [vmem:[#allocation2 + $0x189] sm:$0xff] %v5159_v31  ;;  %10704 = vmatpush3.bf16.msra.mxu1 %v11860_v55  ;;  %v14033_v26 = vpack.c.bf16 %v5159_v31, %v5158_v63  ;;  %v5274_v55 = vld [vmem:[#allocation2 + $0x140] sm:$0xff]  ;;  %v14106_v63 = vpack.c.bf16 %v5276_v16, %v5275_v30  ;;  %v5817_v30 = vld [vmem:[#allocation2 + $0x112] sm:$0xff] }
 0x341   : > { %5244 = vst [vmem:[#allocation2 + $0x171] sm:$0xff] %v5157_v35  ;;  %v14035_v10 = vpack.c.bf16 %v5157_v35, %v5156_v9  ;;  %10705 = vmatprep.subr.bf16.mxu1 %v11861_v22  ;;  %v14104_v61 = vpack.c.bf16 %v5274_v55, %v5273_v20  ;;  %v5796_v35 = vld [vmem:[#allocation2 + $0x1a] sm:$0xff]  ;;  %v14161_v55 = vpack.c.bf16 %v5813_v2, %v5812_v32  ;;  %v5816_v20 = vld [vmem:[#allocation2 + $0x10a] sm:$0xff] }
 0x342   : > { %v5815_v53 = vld [vmem:[#allocation2 + $0xfa] sm:$0xff] }
 0x343   : > { %10690 = vmatmul.mubr.bf16.gmra.mrb[12].mxu1 %v14035_v10  ;;  %v14163_v16 = vpack.c.bf16 %v5815_v53, %v5814_v50  ;;  %v6411_v50 = vld [vmem:[#allocation2 + $0x51] sm:$0xff] }
 0x344   : > { %10706 = vmatpush3.bf16.msra.mxu1 %v11861_v22  ;;  %10709 = vmatprep.mubr.bf16.mxu1 %v11951_v34  ;;  %v5826_v22 = vpack.c.bf16 %v5795_v17, %v5794_v48  ;;  %v5798_v34 = vld [vmem:[#allocation2 + $0x32] sm:$0xff]  ;;  %v5818_v48 = vld [vmem:[#allocation2 + $0x122] sm:$0xff]  ;;  %v5819_v17 = vld [vmem:[#allocation2 + $0x12a] sm:$0xff] }
 0x345   : > { %10707 = vmatprep.subr.bf16.mxu1 %v11862_v14  ;;  %v6408_v53 = vld [vmem:[#allocation2 + $0x31] sm:$0xff] }
 0x346   : > { %v5277_v39 = vld [vmem:[#allocation2 + $0x168] sm:$0xff] }
 0x348   : > { %10708 = vmatpush3.bf16.msra.mxu1 %v11862_v14  ;;  %v5278_v9 = vld [vmem:[#allocation2 + $0x170] sm:$0xff]  ;;  %v5797_v14 = vld [vmem:[#allocation2 + $0x22] sm:$0xff] }
 0x349   : > { %10741 = vmatprep.subr.bf16.mxu1 %v11863_v0  ;;  %v14110_v31 = vpack.c.bf16 %v5278_v9, %v5277_v39  ;;  %v14113_v51 = vpack.c.bf16 %v5797_v14, %v5796_v35  ;;  %v14167_v9 = vpack.c.bf16 %v5817_v30, %v5816_v20  ;;  %v14169_v39 = vpack.c.bf16 %v5819_v17, %v5818_v48  ;;  %v5821_v35 = vld [vmem:[#allocation2 + $0x142] sm:$0xff]  ;;  %v5822_v14 = vld [vmem:[#allocation2 + $0x152] sm:$0xff] }
 0x34a   : > { %v6410_v30 = vld [vmem:[#allocation2 + $0x49] sm:$0xff] }
 0x34b   : > { %10710 = vmatmul.mubr.bf16.vlgmr.msra.gmra.mrb[16].mxu1 %v14044_v7  ;;  %v11889_v48 = vld [vmem:[%s14758_s3 + $0x150] sm:$0xff]  }
 0x34c   : > { %10713 = vmatprep.mubr.bf16.mxu1 %v14049_v18  ;;  %10742 = vmatpush3.bf16.msra.mxu1 %v11863_v0  ;;  %v5799_v0 = vld [vmem:[#allocation2 + $0x3a] sm:$0xff]  ;;  %v6413_v17 = vld [vmem:[#allocation2 + $0x69] sm:$0xff] }
 0x34d   : > { %10743 = vmatprep.subr.bf16.mxu1 %v11864_v29  ;;  %v14118_v58 = vpack.c.bf16 %v5799_v0, %v5798_v34  ;;  %v5823_v34 = vld [vmem:[#allocation2 + $0x15a] sm:$0xff] }
 0x350   : > { %10744 = vmatpush3.bf16.msra.mxu1 %v11864_v29  ;;  %v5800_v29 = vld [vmem:[#allocation2 + $0x4a] sm:$0xff] }
 0x351   : > { %10745 = vmatprep.subr.bf16.mxu1 %v11865_v62 }
 0x353   : > { %10714 = vmatmul.mubr.bf16.gmra.mrb[20].mxu1 %v14056_v47 }
 0x354   : > { %10717 = vmatprep.mubr.bf16.mxu1 %v14061_v38  ;;  %10746 = vmatpush3.bf16.msra.mxu1 %v11865_v62  ;;  %v5801_v62 = vld [vmem:[#allocation2 + $0x52] sm:$0xff] }
 0x355   : > { %10747 = vmatprep.subr.bf16.mxu1 %v11866_v37  ;;  %v14125_v3 = vpack.c.bf16 %v5801_v62, %v5800_v29  ;;  %v5825_v29 = vld [vmem:[#allocation2 + $0x172] sm:$0xff] }
 0x358   : > { %10748 = vmatpush3.bf16.msra.mxu1 %v11866_v37  ;;  %v14130_v37 = vpack.c.bf16 %v5803_v25, %v5802_v15  ;;  %v11880_v15 = vld [vmem:[%s14758_s3 + $0x108] sm:$0xff]   ;;  %v11881_v25 = vld [vmem:[%s14758_s3 + $0x110] sm:$0xff]  }
 0x359   : > { %10749 = vmatprep.subr.bf16.mxu1 %v11867_v33 }
 0x35b   : > { %10718 = vmatmul.mubr.bf16.gmra.mrb[24].mxu1 %v14068_v59 }
 0x35c   : > { %10721 = vmatprep.mubr.bf16.mxu1 %v14073_v42  ;;  %10750 = vmatpush3.bf16.msra.mxu1 %v11867_v33  ;;  %v11875_v33 = vld [vmem:[%s14758_s3 + $0xe0] sm:$0xff]  }
 0x35d   : > { %10751 = vmatprep.subr.bf16.mxu1 %v11868_v40 }
 0x360   : > { %10752 = vmatpush3.bf16.msra.mxu1 %v11868_v40  ;;  %v14137_v40 = vpack.c.bf16 %v5805_v24, %v5804_v41 }
 0x361   : > { %10753 = vmatprep.subr.bf16.mxu1 %v11869_v43 }
 0x363   : > { %10722 = vmatmul.mubr.bf16.gmra.mrb[28].mxu1 %v14080_v36 }
 0x364   : > { %10725 = vmatprep.mubr.bf16.mxu1 %v14085_v28  ;;  %10754 = vmatpush3.bf16.msra.mxu1 %v11869_v43  ;;  %v11876_v43 = vld [vmem:[%s14758_s3 + $0xe8] sm:$0xff]  }
 0x365   : > { %10755 = vmatprep.subr.bf16.mxu1 %v11870_v19 }
 0x368   : > { %10756 = vmatpush3.bf16.msra.mxu1 %v11870_v19  ;;  %v5810_v19 = vld [vmem:[#allocation2 + $0xc2] sm:$0xff] }
 0x369   : > { %10789 = vmatprep.subr.bf16.mxu1 %v11871_v57 }
 0x36b   : > { %10726 = vmatmul.mubr.bf16.gmra.mrb[0].mxu1 %v14092_v5 }
 0x36c   : > { %10729 = vmatprep.mubr.bf16.mxu1 %v14094_v4 }
 0x373   : > { %10730 = vmatmul.mubr.bf16.gmra.mrb[4].mxu1 %v14098_v23 }
 0x374   : > { %10733 = vmatprep.mubr.bf16.mxu1 %v14100_v27 }
 0x37b   : > { %10734 = vmatmul.mubr.bf16.gmra.mrb[8].mxu1 %v14104_v61 }
 0x37c   : > { %10737 = vmatprep.mubr.bf16.mxu1 %v14106_v63 }
 0x383   : > { %10738 = vmatmul.mubr.bf16.gmra.mrb[12].mxu1 %v14110_v31 }
 0x384   : > { %10757 = vmatprep.mubr.bf16.mxu1 %v5826_v22  ;;  %v5820_v22 = vld [vmem:[#allocation2 + $0x13a] sm:$0xff] }
 0x385   : > { %v14173_v0 = vpack.c.bf16 %v5821_v35, %v5820_v22  ;;  %v6415_v22 = vld [vmem:[#allocation2 + $0x81] sm:$0xff] }
 0x386   : > { %v6412_v35 = vld [vmem:[#allocation2 + $0x61] sm:$0xff] }
 0x38b   : > { %10758 = vmatmul.mubr.bf16.vlgmr.msra.gmra.mrb[16].mxu1 %v14113_v51 }
 0x38c   : > { %10761 = vmatprep.mubr.bf16.mxu1 %v14118_v58  ;;  %10790 = vmatpush3.bf16.msra.mxu1 %v11871_v57  ;;  %v5811_v57 = vld [vmem:[#allocation2 + $0xca] sm:$0xff] }
 0x38d   : > { %10791 = vmatprep.subr.bf16.mxu1 %v11872_v13  ;;  %v14154_v44 = vpack.c.bf16 %v5811_v57, %v5810_v19 }
 0x390   : > { %10792 = vmatpush3.bf16.msra.mxu1 %v11872_v13  ;;  %v14175_v13 = vpack.c.bf16 %v5823_v34, %v5822_v14  ;;  %v14268_v14 = vpack.c.bf16 %v6413_v17, %v6412_v35  ;;  %v6414_v34 = vld [vmem:[#allocation2 + $0x79] sm:$0xff]  ;;  %v6424_v17 = vld [vmem:[#allocation2 + $0xf1] sm:$0xff]  ;;  %v6426_v35 = vld [vmem:[#allocation2 + $0x109] sm:$0xff] }
 0x391   : > { %10793 = vmatprep.subr.bf16.mxu1 %v11873_v60 }
 0x393   : > { %10762 = vmatmul.mubr.bf16.gmra.mrb[20].mxu1 %v14125_v3 }
 0x394   : > { %10765 = vmatprep.mubr.bf16.mxu1 %v14130_v37  ;;  %10794 = vmatpush3.bf16.msra.mxu1 %v11873_v60  ;;  %v5824_v60 = vld [vmem:[#allocation2 + $0x16a] sm:$0xff] }
 0x395   : > { %10795 = vmatprep.subr.bf16.mxu1 %v11874_v52  ;;  %v14179_v62 = vpack.c.bf16 %v5825_v29, %v5824_v60  ;;  %v11890_v60 = vld [vmem:[%s14758_s3 + $0x158] sm:$0xff]   ;;  %v14273_v29 = vpack.c.bf16 %v6415_v22, %v6414_v34 }
 0x398   : > { %10796 = vmatpush3.bf16.msra.mxu1 %v11874_v52 }
 0x399   : > { %10797 = vmatprep.subr.bf16.mxu1 %v11875_v33 }
 0x39b   : > { %10766 = vmatmul.mubr.bf16.gmra.mrb[24].mxu1 %v14137_v40 }
 0x39c   : > { %10769 = vmatprep.mubr.bf16.mxu1 %v14142_v49  ;;  %10798 = vmatpush3.bf16.msra.mxu1 %v11875_v33 }
 0x39d   : > { %10799 = vmatprep.subr.bf16.mxu1 %v11876_v43 }
 0x3a0   : > { %10800 = vmatpush3.bf16.msra.mxu1 %v11876_v43 }
 0x3a1   : > { %10801 = vmatprep.subr.bf16.mxu1 %v11877_v46 }
 0x3a3   : > { %10770 = vmatmul.mubr.bf16.gmra.mrb[28].mxu1 %v14149_v54 }
 0x3a4   : > { %10773 = vmatprep.mubr.bf16.mxu1 %v14154_v44  ;;  %10802 = vmatpush3.bf16.msra.mxu1 %v11877_v46 }
 0x3a5   : > { %10803 = vmatprep.subr.bf16.mxu1 %v11878_v21 }
 0x3a8   : > { %10804 = vmatpush3.bf16.msra.mxu1 %v11878_v21  ;;  %v6407_v21 = vld [vmem:[#allocation2 + $0x21] sm:$0xff] }
 0x3a9   : > { %10837 = vmatprep.subr.bf16.mxu1 %v11879_v12 }
 0x3ab   : > { %10774 = vmatmul.mubr.bf16.gmra.mrb[0].mxu1 %v14161_v55 }
 0x3ac   : > { %10777 = vmatprep.mubr.bf16.mxu1 %v14163_v16 }
 0x3b3   : > { %10778 = vmatmul.mubr.bf16.gmra.mrb[4].mxu1 %v14167_v9 }
 0x3b4   : > { %10781 = vmatprep.mubr.bf16.mxu1 %v14169_v39 }
 0x3bb   : > { %10782 = vmatmul.mubr.bf16.gmra.mrb[8].mxu1 %v14173_v0 }
 0x3bc   : > { %10785 = vmatprep.mubr.bf16.mxu1 %v14175_v13 }
 0x3c3   : > { %10786 = vmatmul.mubr.bf16.gmra.mrb[12].mxu1 %v14179_v62 }
 0x3c4   : > { %10805 = vmatprep.mubr.bf16.mxu1 %v14044_v7  ;;  %v11882_v7 = vld [vmem:[%s14758_s3 + $0x118] sm:$0xff]  }
 0x3cb   : > { %10806 = vmatmul.mubr.bf16.vlgmr.msra.gmra.mrb[16].mxu1 %v14049_v18  ;;  %v11883_v18 = vld [vmem:[%s14758_s3 + $0x120] sm:$0xff]  }
 0x3cc   : > { %10809 = vmatprep.mubr.bf16.mxu1 %v14056_v47  ;;  %10838 = vmatpush3.bf16.msra.mxu1 %v11879_v12  ;;  %v11884_v47 = vld [vmem:[%s14758_s3 + $0x128] sm:$0xff]   ;;  %v6130_v12 = vld [vmem:[#allocation2 + $0x180] sm:$0xff] }
 0x3cd   : > { %10839 = vmatprep.subr.bf16.mxu1 %v11880_v15 }
 0x3d0   : > { %10840 = vmatpush3.bf16.msra.mxu1 %v11880_v15  ;;  %v11891_v15 = vld [vmem:[%s14758_s3 + $0x160] sm:$0xff]  }
 0x3d1   : > { %10841 = vmatprep.subr.bf16.mxu1 %v11881_v25 }
 0x3d3   : > { %10810 = vmatmul.mubr.bf16.gmra.mrb[20].mxu1 %v14061_v38  ;;  %v11885_v38 = vld [vmem:[%s14758_s3 + $0x130] sm:$0xff]  }
 0x3d4   : > { %10813 = vmatprep.mubr.bf16.mxu1 %v14068_v59  ;;  %10842 = vmatpush3.bf16.msra.mxu1 %v11881_v25  ;;  %v6417_v25 = vld [vmem:[#allocation2 + $0x99] sm:$0xff] }
 0x3d5   : > { %10843 = vmatprep.subr.bf16.mxu1 %v11882_v7 }
 0x3d8   : > { %10844 = vmatpush3.bf16.msra.mxu1 %v11882_v7  ;;  %v6419_v7 = vld [vmem:[#allocation2 + $0xb1] sm:$0xff] }
 0x3d9   : > { %10845 = vmatprep.subr.bf16.mxu1 %v11883_v18 }
 0x3db   : > { %10814 = vmatmul.mubr.bf16.gmra.mrb[24].mxu1 %v14073_v42  ;;  %v11886_v42 = vld [vmem:[%s14758_s3 + $0x138] sm:$0xff]  }
 0x3dc   : > { %10817 = vmatprep.mubr.bf16.mxu1 %v14080_v36  ;;  %10846 = vmatpush3.bf16.msra.mxu1 %v11883_v18  ;;  %v11887_v36 = vld [vmem:[%s14758_s3 + $0x140] sm:$0xff]   ;;  %v6416_v18 = vld [vmem:[#allocation2 + $0x91] sm:$0xff] }
 0x3dd   : > { %10847 = vmatprep.subr.bf16.mxu1 %v11884_v47 }
 0x3de   : > { %v14207_v59 = vpop.f32.mrb[32].mxu0 }
 0x3df   : > { %v14209_v52 = vpop.f32.mrb[33].mxu0 }
 0x3e0   : > { %v14211_v33 = vpop.f32.mrb[34].mxu0  ;;  %10848 = vmatpush3.bf16.msra.mxu1 %v11884_v47  ;;  %v14280_v47 = vpack.c.bf16 %v6417_v25, %v6416_v18  ;;  %v6428_v25 = vld [vmem:[#allocation2 + $0x121] sm:$0xff] }
 0x3e1   : > { %v14213_v41 = vpop.f32.mrb[35].mxu0  ;;  %10849 = vmatprep.subr.bf16.mxu1 %v11885_v38 }
 0x3e3   : > { %10818 = vmatmul.mubr.bf16.gmra.mrb[28].mxu1 %v14085_v28 }
 0x3e4   : > { %10821 = vmatprep.mubr.bf16.mxu1 %v14092_v5  ;;  %10850 = vmatpush3.bf16.msra.mxu1 %v11885_v38  ;;  %v6418_v38 = vld [vmem:[#allocation2 + $0xa9] sm:$0xff] }
 0x3e5   : > { %10851 = vmatprep.subr.bf16.mxu1 %v11886_v42 }
 0x3e6   : > { %v14223_v24 = vpop.f32.mrb[36].mxu0 }
 0x3e7   : > { %v14225_v45 = vpop.f32.mrb[37].mxu0 }
 0x3e8   : > { %v14227_v8 = vpop.f32.mrb[38].mxu0  ;;  %10852 = vmatpush3.bf16.msra.mxu1 %v11886_v42  ;;  %v11892_v42 = vld [vmem:[%s14758_s3 + $0x168] sm:$0xff]  }
 0x3e9   : > { %v14229_v43 = vpop.f32.mrb[39].mxu0  ;;  %10885 = vmatprep.subr.bf16.mxu1 %v11887_v36 }
 0x3eb   : > { %10822 = vmatmul.mubr.bf16.gmra.mrb[0].mxu1 %v14094_v4 }
 0x3ec   : > { %10825 = vmatprep.mubr.bf16.mxu1 %v14098_v23  ;;  %v6131_v23 = vld [vmem:[#allocation2 + $0x188] sm:$0xff] }
 0x3ed   : > { %v14253_v32 = vpack.c.bf16 %v6131_v23, %v6130_v12  ;;  %v11893_v23 = vld [vmem:[%s14758_s3 + $0x170] sm:$0xff]   ;;  %v6423_v12 = vld [vmem:[#allocation2 + $0xe1] sm:$0xff] }
 0x3ee   : > { %v14233_v28 = vpop.f32.mrb[40].mxu0 }
 0x3ef   : > { %v14235_v5 = vpop.f32.mrb[41].mxu0 }
 0x3f0   : > { %v14237_v46 = vpop.f32.mrb[42].mxu0 }
 0x3f1   : > { %v14239_v6 = vpop.f32.mrb[43].mxu0 }
 0x3f3   : > { %10826 = vmatmul.mubr.bf16.gmra.mrb[4].mxu1 %v14100_v27  ;;  %v6406_v27 = vld [vmem:[#allocation2 + $0x19] sm:$0xff] }
 0x3f4   : > { %10829 = vmatprep.mubr.bf16.mxu1 %v14104_v61  ;;  %v6438_v2 = vpack.c.bf16 %v6407_v21, %v6406_v27  ;;  %v6409_v61 = vld [vmem:[#allocation2 + $0x39] sm:$0xff]  ;;  %v6421_v21 = vld [vmem:[#allocation2 + $0xc9] sm:$0xff]  ;;  %v6420_v27 = vld [vmem:[#allocation2 + $0xc1] sm:$0xff] }
 0x3f5   : > { %v14256_v20 = vpack.c.bf16 %v6409_v61, %v6408_v53  ;;  %v6422_v61 = vld [vmem:[#allocation2 + $0xd9] sm:$0xff] }
 0x3f6   : > { %v14243_v56 = vpop.f32.mrb[44].mxu0  ;;  %v14297_v53 = vpack.c.bf16 %v6423_v12, %v6422_v61  ;;  %v7023_v61 = vld [vmem:[#allocation2 + $0x60] sm:$0xff] }
 0x3f7   : > { %v14245_v19 = vpop.f32.mrb[45].mxu0 }
 0x3f8   : > { %v14247_v57 = vpop.f32.mrb[46].mxu0 }
 0x3f9   : > { %v14249_v4 = vpop.f32.mrb[47].mxu0 }
 0x3fb   : > { %10830 = vmatmul.mubr.bf16.gmra.mrb[8].mxu1 %v14106_v63  ;;  %v11888_v63 = vld [vmem:[%s14758_s3 + $0x148] sm:$0xff]  }
 0x3fc   : > { %10833 = vmatprep.mubr.bf16.mxu1 %v14110_v31  ;;  %v14261_v31 = vpack.c.bf16 %v6411_v50, %v6410_v30  ;;  %v11894_v50 = vld [vmem:[%s14758_s3 + $0x178] sm:$0xff]   ;;  %v11895_v30 = vld [vmem:[%s14758_s3 + $0x180] sm:$0xff]  }
 0x403   : > { %10834 = vmatmul.mubr.bf16.gmra.mrb[12].mxu1 %v14253_v32 }
 0x404   : > { %10853 = vmatprep.mubr.bf16.mxu1 %v6438_v2  ;;  %v14292_v2 = vpack.c.bf16 %v6421_v21, %v6420_v27  ;;  %v11896_v21 = vld [vmem:[%s14758_s3 + $0x188] sm:$0xff]  }
 0x405   : > { %v7021_v27 = vld [vmem:[#allocation2 + $0x48] sm:$0xff] }
 0x40b   : > { %10854 = vmatmul.mubr.bf16.vlgmr.msra.gmra.mrb[16].mxu1 %v14256_v20 }
 0x40c   : > { %10857 = vmatprep.mubr.bf16.mxu1 %v14261_v31  ;;  %10886 = vmatpush3.bf16.msra.mxu1 %v11887_v36  ;;  %v14285_v36 = vpack.c.bf16 %v6419_v7, %v6418_v38  ;;  %v6433_v38 = vld [vmem:[#allocation2 + $0x159] sm:$0xff] }
 0x40d   : > { %10887 = vmatprep.subr.bf16.mxu1 %v11888_v63 }
 0x410   : > { %10888 = vmatpush3.bf16.msra.mxu1 %v11888_v63  ;;  %v6425_v63 = vld [vmem:[#allocation2 + $0xf9] sm:$0xff] }
 0x411   : > { %10889 = vmatprep.subr.bf16.mxu1 %v11889_v48  ;;  %v14304_v22 = vpack.c.bf16 %v6425_v63, %v6424_v17  ;;  %v7025_v63 = vld [vmem:[#allocation2 + $0x78] sm:$0xff]  ;;  %v7027_v17 = vld [vmem:[#allocation2 + $0x90] sm:$0xff] }
 0x413   : > { %10858 = vmatmul.mubr.bf16.gmra.mrb[20].mxu1 %v14268_v14 }
 0x414   : > { %10861 = vmatprep.mubr.bf16.mxu1 %v14273_v29  ;;  %10890 = vmatpush3.bf16.msra.mxu1 %v11889_v48  ;;  %v6427_v48 = vld [vmem:[#allocation2 + $0x111] sm:$0xff] }
 0x415   : > { %10891 = vmatprep.subr.bf16.mxu1 %v11890_v60  ;;  %v14306_v34 = vpack.c.bf16 %v6427_v48, %v6426_v35  ;;  %v11906_v35 = vld [vmem:[%s14758_s3 + $0x1d8] sm:$0xff]  }
 0x418   : > { %10892 = vmatpush3.bf16.msra.mxu1 %v11890_v60  ;;  %v6429_v60 = vld [vmem:[#allocation2 + $0x129] sm:$0xff] }
 0x419   : > { %10893 = vmatprep.subr.bf16.mxu1 %v11891_v15  ;;  %v14312_v7 = vpack.c.bf16 %v6429_v60, %v6428_v25  ;;  %v11907_v25 = vld [vmem:[%s14758_s3 + $0x1e0] sm:$0xff]  }
 0x41b   : > { %10862 = vmatmul.mubr.bf16.gmra.mrb[24].mxu1 %v14280_v47 }
 0x41c   : > { %10865 = vmatprep.mubr.bf16.mxu1 %v14285_v36  ;;  %10894 = vmatpush3.bf16.msra.mxu1 %v11891_v15  ;;  %v14310_v15 = vld [vmem:[#allocation2 + $0x139] sm:$0xff] }
 0x41d   : > { %10895 = vmatprep.subr.bf16.mxu1 %v11892_v42  ;;  %v6450_v18 = vpack.c.bf16 %v14019_v1, %v14310_v15  ;;  %v11897_v1 = vld [vmem:[%s14758_s3 + $0x190] sm:$0xff]  }
 0x420   : > { %10896 = vmatpush3.bf16.msra.mxu1 %v11892_v42  ;;  %v6432_v42 = vld [vmem:[#allocation2 + $0x151] sm:$0xff] }
 0x421   : > { %10897 = vmatprep.subr.bf16.mxu1 %v11893_v23 }
 0x423   : > { %10866 = vmatmul.mubr.bf16.gmra.mrb[28].mxu1 %v14292_v2 }
 0x424   : > { %10869 = vmatprep.mubr.bf16.mxu1 %v14297_v53  ;;  %10898 = vmatpush3.bf16.msra.mxu1 %v11893_v23  ;;  %v14317_v23 = vpack.c.bf16 %v6433_v38, %v6432_v42  ;;  %v7032_v38 = vld [vmem:[#allocation2 + $0xc8] sm:$0xff] }
 0x425   : > { %10899 = vmatprep.subr.bf16.mxu1 %v11894_v50  ;;  %v7029_v42 = vld [vmem:[#allocation2 + $0xa8] sm:$0xff] }
 0x428   : > { %10900 = vmatpush3.bf16.msra.mxu1 %v11894_v50  ;;  %v7026_v50 = vld [vmem:[#allocation2 + $0x80] sm:$0xff] }
 0x429   : > { %10933 = vmatprep.subr.bf16.mxu1 %v11895_v30  ;;  %v7054_v48 = vpack.c.bf16 %v7026_v50, %v7025_v63  ;;  %v7041_v50 = vld [vmem:[#allocation2 + $0x138] sm:$0xff]  ;;  %v7043_v63 = vld [vmem:[#allocation2 + $0x150] sm:$0xff] }
 0x42b   : > { %10870 = vmatmul.mubr.bf16.gmra.mrb[0].mxu1 %v14304_v22 }
 0x42c   : > { %10873 = vmatprep.mubr.bf16.mxu1 %v14306_v34 }
 0x433   : > { %10874 = vmatmul.mubr.bf16.gmra.mrb[4].mxu1 %v14312_v7 }
 0x434   : > { %10877 = vmatprep.mubr.bf16.mxu1 %v6450_v18  ;;  %v7030_v18 = vld [vmem:[#allocation2 + $0xb0] sm:$0xff] }
 0x43b   : > { %10878 = vmatmul.mubr.bf16.gmra.mrb[8].mxu1 %v14317_v23 }
 0x43c   : > { %10881 = vmatprep.mubr.bf16.mxu1 %v14035_v10  ;;  %v11899_v10 = vld [vmem:[%s14758_s3 + $0x1a0] sm:$0xff]  }
 0x443   : > { %10882 = vmatmul.mubr.bf16.gmra.mrb[12].mxu1 %v14033_v26  ;;  %v11898_v26 = vld [vmem:[%s14758_s3 + $0x198] sm:$0xff]  }
 0x444   : > { %10901 = vmatprep.mubr.bf16.mxu1 %v14113_v51  ;;  %v11900_v51 = vld [vmem:[%s14758_s3 + $0x1a8] sm:$0xff]  }
 0x44b   : > { %10902 = vmatmul.mubr.bf16.vlgmr.msra.gmra.mrb[16].mxu1 %v14118_v58  ;;  %v11901_v58 = vld [vmem:[%s14758_s3 + $0x1b0] sm:$0xff]  }
 0x44c   : > { %10905 = vmatprep.mubr.bf16.mxu1 %v14125_v3  ;;  %10934 = vmatpush3.bf16.msra.mxu1 %v11895_v30  ;;  %v11902_v3 = vld [vmem:[%s14758_s3 + $0x1b8] sm:$0xff]  }
 0x44d   : > { %10935 = vmatprep.subr.bf16.mxu1 %v11896_v21  ;;  %v7028_v30 = vld [vmem:[#allocation2 + $0x98] sm:$0xff] }
 0x44e   : > { %v7055_v60 = vpack.c.bf16 %v7028_v30, %v7027_v17  ;;  %v7046_v17 = vld [vmem:[#allocation2 + $0x170] sm:$0xff] }
 0x450   : > { %10936 = vmatpush3.bf16.msra.mxu1 %v11896_v21  ;;  %v7056_v21 = vpack.c.bf16 %v7030_v18, %v7029_v42  ;;  %v11913_v42 = vld [vmem:[%s14758_s3 + $0x210] sm:$0xff]  }
 0x451   : > { %10937 = vmatprep.subr.bf16.mxu1 %v11897_v1 }
 0x453   : > { %10906 = vmatmul.mubr.bf16.gmra.mrb[20].mxu1 %v14130_v37  ;;  %v11903_v37 = vld [vmem:[%s14758_s3 + $0x1c0] sm:$0xff]  }
 0x454   : > { %10909 = vmatprep.mubr.bf16.mxu1 %v14137_v40  ;;  %10938 = vmatpush3.bf16.msra.mxu1 %v11897_v1  ;;  %v6742_v40 = vld [vmem:[#allocation2 + $0x182] sm:$0xff] }
 0x455   : > { %10939 = vmatprep.subr.bf16.mxu1 %v11898_v26  ;;  %v7031_v1 = vld [vmem:[#allocation2 + $0xc0] sm:$0xff] }
 0x458   : > { %10940 = vmatpush3.bf16.msra.mxu1 %v11898_v26  ;;  %v11908_v26 = vld [vmem:[%s14758_s3 + $0x1e8] sm:$0xff]  }
 0x459   : > { %10941 = vmatprep.subr.bf16.mxu1 %v11899_v10 }
 0x45b   : > { %10910 = vmatmul.mubr.bf16.gmra.mrb[24].mxu1 %v14142_v49  ;;  %v6743_v49 = vld [vmem:[#allocation2 + $0x18a] sm:$0xff] }
 0x45c   : > { %10913 = vmatprep.mubr.bf16.mxu1 %v14149_v54  ;;  %10942 = vmatpush3.bf16.msra.mxu1 %v11899_v10  ;;  %v7020_v54 = vld [vmem:[#allocation2 + $0x38] sm:$0xff]  ;;  %v7057_v10 = vpack.c.bf16 %v7032_v38, %v7031_v1  ;;  %v11912_v38 = vld [vmem:[%s14758_s3 + $0x208] sm:$0xff]  }
 0x45d   : > { %10943 = vmatprep.subr.bf16.mxu1 %v11900_v51 }
 0x460   : > { %10944 = vmatpush3.bf16.msra.mxu1 %v11900_v51  ;;  %v11909_v51 = vld [vmem:[%s14758_s3 + $0x1f0] sm:$0xff]  }
 0x461   : > { %10945 = vmatprep.subr.bf16.mxu1 %v11901_v58 }
 0x463   : > { %10914 = vmatmul.mubr.bf16.gmra.mrb[28].mxu1 %v14154_v44  ;;  %v14361_v44 = vpack.c.bf16 %v6743_v49, %v6742_v40  ;;  %v7035_v49 = vld [vmem:[#allocation2 + $0xf0] sm:$0xff] }
 0x464   : > { %10917 = vmatprep.mubr.bf16.mxu1 %v14161_v55  ;;  %10946 = vmatpush3.bf16.msra.mxu1 %v11901_v58  ;;  %v7019_v55 = vld [vmem:[#allocation2 + $0x30] sm:$0xff]  ;;  %v7034_v58 = vld [vmem:[#allocation2 + $0xe0] sm:$0xff] }
 0x465   : > { %10947 = vmatprep.subr.bf16.mxu1 %v11902_v3  ;;  %v7051_v12 = vpack.c.bf16 %v7020_v54, %v7019_v55  ;;  %v11910_v54 = vld [vmem:[%s14758_s3 + $0x1f8] sm:$0xff]  }
 0x468   : > { %10948 = vmatpush3.bf16.msra.mxu1 %v11902_v3  ;;  %v7036_v3 = vld [vmem:[#allocation2 + $0xf8] sm:$0xff] }
 0x469   : > { %10981 = vmatprep.subr.bf16.mxu1 %v11903_v37  ;;  %v7059_v55 = vpack.c.bf16 %v7036_v3, %v7035_v49  ;;  %v7635_v49 = vld [vmem:[#allocation2 + $0x62] sm:$0xff] }
 0x46b   : > { %10918 = vmatmul.mubr.bf16.gmra.mrb[0].mxu1 %v14163_v16  ;;  %v7022_v16 = vld [vmem:[#allocation2 + $0x50] sm:$0xff] }
 0x46c   : > { %10921 = vmatprep.mubr.bf16.mxu1 %v14167_v9  ;;  %v7024_v9 = vld [vmem:[#allocation2 + $0x68] sm:$0xff] }
 0x473   : > { %10922 = vmatmul.mubr.bf16.gmra.mrb[4].mxu1 %v14169_v39  ;;  %v7052_v39 = vpack.c.bf16 %v7022_v16, %v7021_v27  ;;  %v7038_v16 = vld [vmem:[#allocation2 + $0x110] sm:$0xff]  ;;  %v7037_v27 = vld [vmem:[#allocation2 + $0x108] sm:$0xff] }
 0x474   : > { %10925 = vmatprep.mubr.bf16.mxu1 %v14173_v0  ;;  %v11904_v0 = vld [vmem:[%s14758_s3 + $0x1c8] sm:$0xff]  }
 0x47b   : > { %10926 = vmatmul.mubr.bf16.gmra.mrb[8].mxu1 %v14175_v13  ;;  %v7053_v13 = vpack.c.bf16 %v7024_v9, %v7023_v61  ;;  %v7040_v9 = vld [vmem:[#allocation2 + $0x128] sm:$0xff]  ;;  %v7039_v61 = vld [vmem:[#allocation2 + $0x120] sm:$0xff] }
 0x47c   : > { %10929 = vmatprep.mubr.bf16.mxu1 %v14179_v62  ;;  %v11905_v62 = vld [vmem:[%s14758_s3 + $0x1d0] sm:$0xff]  }
 0x483   : > { %10930 = vmatmul.mubr.bf16.gmra.mrb[12].mxu1 %v14361_v44 }
 0x484   : > { %10949 = vmatprep.mubr.bf16.mxu1 %v7051_v12  ;;  %v11911_v12 = vld [vmem:[%s14758_s3 + $0x200] sm:$0xff]  }
 0x48b   : > { %10950 = vmatmul.mubr.bf16.vlgmr.msra.gmra.mrb[16].mxu1 %v7052_v39  ;;  %v7060_v39 = vpack.c.bf16 %v7038_v16, %v7037_v27  ;;  %v11921_v16 = vld [vmem:[%s14760_s5 + $0x10] sm:$0xff]   ;;  %v7638_v27 = vld [vmem:[#allocation2 + $0x82] sm:$0xff] }
 0x48c   : > { %10953 = vmatprep.mubr.bf16.mxu1 %v7053_v13  ;;  %10982 = vmatpush3.bf16.msra.mxu1 %v11903_v37  ;;  %v7033_v37 = vld [vmem:[#allocation2 + $0xd8] sm:$0xff]  ;;  %v7042_v13 = vld [vmem:[#allocation2 + $0x140] sm:$0xff] }
 0x48d   : > { %10983 = vmatprep.subr.bf16.mxu1 %v11904_v0  ;;  %v7058_v40 = vpack.c.bf16 %v7034_v58, %v7033_v37  ;;  %v7062_v30 = vpack.c.bf16 %v7042_v13, %v7041_v50  ;;  %v7356_v58 = vld [vmem:[#allocation2 + $0x1a1] sm:$0xff]  ;;  %v11922_v13 = vld [vmem:[%s14760_s5 + $0x18] sm:$0xff]  }
 0x48e   : > { %v7632_v37 = vld [vmem:[#allocation2 + $0x3a] sm:$0xff] }
 0x48f   : > { %v11923_v50 = vld [vmem:[%s14760_s5 + $0x20] sm:$0xff]  }
 0x490   : > { %10984 = vmatpush3.bf16.msra.mxu1 %v11904_v0  ;;  %v7061_v0 = vpack.c.bf16 %v7040_v9, %v7039_v61  ;;  %v7637_v9 = vld [vmem:[#allocation2 + $0x7a] sm:$0xff] }
 0x491   : > { %10985 = vmatprep.subr.bf16.mxu1 %v11905_v62  ;;  %v7640_v61 = vld [vmem:[#allocation2 + $0x9a] sm:$0xff] }
 0x493   : > { %10954 = vmatmul.mubr.bf16.gmra.mrb[20].mxu1 %v7054_v48 }
 0x494   : > { %10957 = vmatprep.mubr.bf16.mxu1 %v7055_v60  ;;  %10986 = vmatpush3.bf16.msra.mxu1 %v11905_v62  ;;  %v7044_v62 = vld [vmem:[#allocation2 + $0x158] sm:$0xff] }
 0x495   : > { %10987 = vmatprep.subr.bf16.mxu1 %v11906_v35  ;;  %v7063_v48 = vpack.c.bf16 %v7044_v62, %v7043_v63  ;;  %v7642_v63 = vld [vmem:[#allocation2 + $0xb2] sm:$0xff] }
 0x498   : > { %10988 = vmatpush3.bf16.msra.mxu1 %v11906_v35  ;;  %v7045_v35 = vld [vmem:[#allocation2 + $0x168] sm:$0xff] }
 0x499   : > { %10989 = vmatprep.subr.bf16.mxu1 %v11907_v25  ;;  %v7064_v60 = vpack.c.bf16 %v7046_v17, %v7045_v35  ;;  %v7644_v17 = vld [vmem:[#allocation2 + $0xca] sm:$0xff] }
 0x49b   : > { %10958 = vmatmul.mubr.bf16.gmra.mrb[24].mxu1 %v7056_v21  ;;  %v7351_v21 = vld [vmem:[#allocation2 + $0x169] sm:$0xff] }
 0x49c   : > { %10961 = vmatprep.mubr.bf16.mxu1 %v7057_v10  ;;  %10990 = vmatpush3.bf16.msra.mxu1 %v11907_v25  ;;  %v11941_v25 = vld [vmem:[#allocation2] sm:$0xff] }
 0x49d   : > { %10991 = vmatprep.subr.bf16.mxu1 %v11908_v26  ;;  %v7066_v18 = vpack.c.bf16 %v11941_v25, %v11941_v25 }
 0x4a0   : > { %10992 = vmatpush3.bf16.msra.mxu1 %v11908_v26  ;;  %v7353_v26 = vld [vmem:[#allocation2 + $0x181] sm:$0xff] }
 0x4a1   : > { %10993 = vmatprep.subr.bf16.mxu1 %v11909_v51 }
 0x4a3   : > { %10962 = vmatmul.mubr.bf16.gmra.mrb[28].mxu1 %v7058_v40  ;;  %v7634_v40 = vld [vmem:[#allocation2 + $0x52] sm:$0xff] }
 0x4a4   : > { %10965 = vmatprep.mubr.bf16.mxu1 %v7059_v55  ;;  %10994 = vmatpush3.bf16.msra.mxu1 %v11909_v51  ;;  %v7355_v51 = vld [vmem:[#allocation2 + $0x199] sm:$0xff]  ;;  %v11920_v55 = vld [vmem:[%s14760_s5 + $0x8] sm:$0xff]  }
 0x4a5   : > { %10995 = vmatprep.subr.bf16.mxu1 %v11910_v54  ;;  %v7372_v3 = vpack.c.bf16 %v7356_v58, %v7355_v51 }
 0x4a8   : > { %10996 = vmatpush3.bf16.msra.mxu1 %v11910_v54 }
 0x4a9   : > { %11029 = vmatprep.subr.bf16.mxu1 %v11911_v12 }
 0x4ab   : > { %10966 = vmatmul.mubr.bf16.gmra.mrb[0].mxu1 %v7060_v39  ;;  %v7639_v39 = vld [vmem:[#allocation2 + $0x92] sm:$0xff] }
 0x4ac   : > { %10969 = vmatprep.mubr.bf16.mxu1 %v7061_v0  ;;  %v7666_v0 = vpack.c.bf16 %v7638_v27, %v7637_v9  ;;  %v7667_v62 = vpack.c.bf16 %v7640_v61, %v7639_v39 }
 0x4b3   : > { %10970 = vmatmul.mubr.bf16.gmra.mrb[4].mxu1 %v7062_v30  ;;  %v7641_v30 = vld [vmem:[#allocation2 + $0xaa] sm:$0xff] }
 0x4b4   : > { %10973 = vmatprep.mubr.bf16.mxu1 %v7063_v48  ;;  %v7643_v48 = vld [vmem:[#allocation2 + $0xc2] sm:$0xff]  ;;  %v7668_v35 = vpack.c.bf16 %v7642_v63, %v7641_v30 }
 0x4b5   : > { %v7669_v25 = vpack.c.bf16 %v7644_v17, %v7643_v48 }
 0x4bb   : > { %10974 = vmatmul.mubr.bf16.gmra.mrb[8].mxu1 %v7064_v60  ;;  %v11924_v60 = vld [vmem:[%s14760_s5 + $0x28] sm:$0xff]  }
 0x4bc   : > { %10977 = vmatprep.mubr.bf16.mxu1 %v14253_v32  ;;  %v11914_v32 = vld [vmem:[%s14758_s3 + $0x218] sm:$0xff]  }
 0x4c3   : > { %10978 = vmatmul.mubr.bf16.gmra.mrb[12].mxu1 %v7066_v18  ;;  %v11925_v18 = vld [vmem:[%s14760_s5 + $0x30] sm:$0xff]  }
 0x4c4   : > { %10997 = vmatprep.mubr.bf16.mxu1 %v14256_v20  ;;  %v11915_v20 = vld [vmem:[%s14758_s3 + $0x220] sm:$0xff]  }
 0x4cb   : > { %10998 = vmatmul.mubr.bf16.vlgmr.msra.gmra.mrb[16].mxu1 %v14261_v31  ;;  %v11916_v31 = vld [vmem:[%s14758_s3 + $0x228] sm:$0xff]  }
 0x4cc   : > { %11001 = vmatprep.mubr.bf16.mxu1 %v14268_v14  ;;  %11030 = vmatpush3.bf16.msra.mxu1 %v11911_v12  ;;  %v11917_v14 = vld [vmem:[%s14758_s3 + $0x230] sm:$0xff]  }
 0x4cd   : > { %11031 = vmatprep.subr.bf16.mxu1 %v11912_v38 }
 0x4d0   : > { %11032 = vmatpush3.bf16.msra.mxu1 %v11912_v38  ;;  %v7645_v38 = vld [vmem:[#allocation2 + $0xda] sm:$0xff] }
 0x4d1   : > { %11033 = vmatprep.subr.bf16.mxu1 %v11913_v42 }
 0x4d3   : > { %11002 = vmatmul.mubr.bf16.gmra.mrb[20].mxu1 %v14273_v29  ;;  %v11918_v29 = vld [vmem:[%s14758_s3 + $0x238] sm:$0xff]  }
 0x4d4   : > { %11005 = vmatprep.mubr.bf16.mxu1 %v14280_v47  ;;  %11034 = vmatpush3.bf16.msra.mxu1 %v11913_v42  ;;  %v11919_v47 = vld [vmem:[%s14760_s5] sm:$0xff]  }
 0x4d5   : > { %11035 = vmatprep.subr.bf16.mxu1 %v11914_v32  ;;  %v7646_v42 = vld [vmem:[#allocation2 + $0xe2] sm:$0xff] }
 0x4d8   : > { %11036 = vmatpush3.bf16.msra.mxu1 %v11914_v32  ;;  %v7647_v32 = vld [vmem:[#allocation2 + $0xf2] sm:$0xff] }
 0x4d9   : > { %11037 = vmatprep.subr.bf16.mxu1 %v11915_v20 }
 0x4db   : > { %11006 = vmatmul.mubr.bf16.gmra.mrb[24].mxu1 %v14285_v36  ;;  %v7348_v36 = vld [vmem:[#allocation2 + $0x141] sm:$0xff] }
 0x4dc   : > { %11009 = vmatprep.mubr.bf16.mxu1 %v14292_v2  ;;  %11038 = vmatpush3.bf16.msra.mxu1 %v11915_v20  ;;  %v7368_v2 = vpack.c.bf16 %v7348_v36, %v14310_v15  ;;  %v7633_v15 = vld [vmem:[#allocation2 + $0x4a] sm:$0xff]  ;;  %v7648_v20 = vld [vmem:[#allocation2 + $0xfa] sm:$0xff] }
 0x4dd   : > { %11039 = vmatprep.subr.bf16.mxu1 %v11916_v31  ;;  %v7664_v54 = vpack.c.bf16 %v7634_v40, %v7633_v15  ;;  %v7649_v36 = vld [vmem:[#allocation2 + $0x10a] sm:$0xff]  ;;  %v9685_v15 = vld [vmem:[%s12015_s12 + $0x1c] sm:$0xf]  ;;  %v9687_v40 = vld [vmem:[%s12015_s12 + $0x24] sm:$0xf] }
 0x4e0   : > { %11040 = vmatpush3.bf16.msra.mxu1 %v11916_v31  ;;  %v7670_v31 = vpack.c.bf16 %v7646_v42, %v7645_v38 }
 0x4e1   : > { %11041 = vmatprep.subr.bf16.mxu1 %v11917_v14 }
 0x4e3   : > { %11010 = vmatmul.mubr.bf16.gmra.mrb[28].mxu1 %v14297_v53  ;;  %v7352_v53 = vld [vmem:[#allocation2 + $0x171] sm:$0xff] }
 0x4e4   : > { %11013 = vmatprep.mubr.bf16.mxu1 %v14304_v22  ;;  %11042 = vmatpush3.bf16.msra.mxu1 %v11917_v14  ;;  %v7354_v22 = vld [vmem:[#allocation2 + $0x189] sm:$0xff]  ;;  %v7370_v1 = vpack.c.bf16 %v7352_v53, %v7351_v21  ;;  %v11926_v14 = vld [vmem:[%s14760_s5 + $0x38] sm:$0xff]  }
 0x4e5   : > { %11043 = vmatprep.subr.bf16.mxu1 %v11918_v29  ;;  %v7371_v10 = vpack.c.bf16 %v7354_v22, %v7353_v26  ;;  %v9682_v53 = vld [vmem:[%s12015_s12 + $0x10] sm:$0xf]  ;;  %v7651_v22 = vld [vmem:[#allocation2 + $0x122] sm:$0xff] }
 0x4e6   : > { %v7652_v21 = vld [vmem:[#allocation2 + $0x12a] sm:$0xff]  ;;  %v8034_v51 = vshll.u32 %v9682_v53, 16  ;;  %v8038_v58 = vshrl.u32 %v9682_v53, 16 }
 0x4e8   : > { %11044 = vmatpush3.bf16.msra.mxu1 %v11918_v29  ;;  %v7671_v29 = vpack.c.bf16 %v7648_v20, %v7647_v32  ;;  %v14454_v9 = vrot.slane %v8034_v51, 5  ;;  %v8040_v27 = vrot.slane %v8038_v58, 4  ;;  %v9691_v32 = vld [vmem:[%s12015_s12 + $0x34] sm:$0xf]  ;;  %v9686_v20 = vld [vmem:[%s12015_s12 + $0x20] sm:$0x1] }
 0x4e9   : > { %11077 = vmatprep.subr.bf16.mxu1 %v11919_v47  ;;  %v8068_v58 = vshll.u32 %v9686_v20, 16 }
 0x4eb   : > { %11014 = vmatmul.mubr.bf16.gmra.mrb[0].mxu1 %v14306_v34  ;;  %v7631_v34 = vld [vmem:[#allocation2 + $0x32] sm:$0xff] }
 0x4ec   : > { %11017 = vmatprep.mubr.bf16.mxu1 %v14312_v7  ;;  %v7663_v7 = vpack.c.bf16 %v7632_v37, %v7631_v34  ;;  %v9684_v34 = vld [vmem:[%s12015_s12 + $0x18] sm:$0xf] }
 0x4ed   : > { %v7653_v37 = vld [vmem:[#allocation2 + $0x13a] sm:$0xff]  ;;  %v8049_v39 = vshrl.u32 %v9684_v34, 16  ;;  %v8052_v61 = vshll.u32 %v9684_v34, 16  ;;  %v7657_v34 = vld [vmem:[#allocation2 + $0x16a] sm:$0xff] }
 0x4ef   : > { %v8051_v38 = vrot.slane %v8049_v39, 4  ;;  %v8054_v42 = vrot.slane %v8052_v61, 5 }
 0x4f3   : > { %11018 = vmatmul.mubr.bf16.gmra.mrb[4].mxu1 %v7368_v2  ;;  %v7650_v2 = vld [vmem:[#allocation2 + $0x112] sm:$0xff] }
 0x4f4   : > { %11021 = vmatprep.mubr.bf16.mxu1 %v14317_v23  ;;  %v7636_v23 = vld [vmem:[#allocation2 + $0x6a] sm:$0xff] }
 0x4f5   : > { %v7665_v12 = vpack.c.bf16 %v7636_v23, %v7635_v49  ;;  %v7655_v49 = vld [vmem:[#allocation2 + $0x152] sm:$0xff]  ;;  %v7656_v23 = vld [vmem:[#allocation2 + $0x15a] sm:$0xff] }
 0x4f6   : > { %v7675_v17 = vpack.c.bf16 %v7656_v23, %v7655_v49  ;;  %v9694_v23 = vld [vmem:[%s12015_s12 + $0x40] sm:$0xf] }
 0x4fb   : > { %11022 = vmatmul.mubr.bf16.gmra.mrb[8].mxu1 %v7370_v1 }
 0x4fc   : > { %11025 = vmatprep.mubr.bf16.mxu1 %v7371_v10  ;;  %v7672_v10 = vpack.c.bf16 %v7650_v2, %v7649_v36  ;;  %v9689_v36 = vld [vmem:[%s12015_s12 + $0x2c] sm:$0x1] }
 0x4fd   : > { %v8092_v49 = vshll.u32 %v9689_v36, 16 }
 0x4ff   : > { %v8094_v20 = vrot.slane %v8092_v49, 5  ;;  %v9700_v49 = vld [vmem:[%s12015_s12 + $0x58] sm:$0xf] }
 0x503   : > { %11026 = vmatmul.mubr.bf16.gmra.mrb[12].mxu1 %v7372_v3  ;;  %v7673_v3 = vpack.c.bf16 %v7652_v21, %v7651_v22 }
 0x504   : > { %11045 = vmatprep.mubr.bf16.mxu1 %v7663_v7  ;;  %v7654_v7 = vld [vmem:[#allocation2 + $0x142] sm:$0xff] }
 0x505   : > { %v7674_v48 = vpack.c.bf16 %v7654_v7, %v7653_v37  ;;  %v7658_v37 = vld [vmem:[#allocation2 + $0x172] sm:$0xff] }
 0x50b   : > { %11046 = vmatmul.mubr.bf16.vlgmr.msra.gmra.mrb[16].mxu1 %v7664_v54 }
 0x50c   : > { %11049 = vmatprep.mubr.bf16.mxu1 %v7665_v12  ;;  %11078 = vmatpush3.bf16.msra.mxu1 %v11919_v47  ;;  %v9681_v47 = vld [vmem:[%s12015_s12 + $0xc] sm:$0xf]  ;;  %v9688_v12 = vld [vmem:[%s12015_s12 + $0x28] sm:$0xf] }
 0x50d   : > { %11079 = vmatprep.subr.bf16.mxu1 %v11920_v55  ;;  %v8025_v1 = vshrl.u32 %v9681_v47, 16  ;;  %v8028_v26 = vshll.u32 %v9681_v47, 16  ;;  %v8082_v30 = vshll.u32 %v9688_v12, 16  ;;  %v8086_v63 = vshrl.u32 %v9688_v12, 16 }
 0x50f   : > { %v8027_v54 = vrot.slane %v8025_v1, 4  ;;  %v14463_v2 = vrot.slane %v8082_v30, 5  ;;  %v8088_v53 = vrot.slane %v8086_v63, 4  ;;  %v8106_v1 = vshll.u32 %v9691_v32, 16 }
 0x510   : > { %11080 = vmatpush3.bf16.msra.mxu1 %v11920_v55  ;;  %v8030_v55 = vrot.slane %v8028_v26, 5  ;;  %v8110_v26 = vshrl.u32 %v9691_v32, 16  ;;  %v8130_v30 = vshll.u32 %v9694_v23, 16  ;;  %v8134_v63 = vshrl.u32 %v9694_v23, 16 }
 0x511   : > { %11081 = vmatprep.subr.bf16.mxu1 %v11921_v16  ;;  %v14470_v39 = vrot.slane %v8106_v1, 5 }
 0x512   : > { %v8112_v61 = vrot.slane %v8110_v26, 4  ;;  %v8136_v1 = vrot.slane %v8134_v63, 4 }
 0x513   : > { %11050 = vmatmul.mubr.bf16.gmra.mrb[20].mxu1 %v7666_v0  ;;  %v8058_v0 = vshll.u32 %v9685_v15, 16 }
 0x514   : > { %11053 = vmatprep.mubr.bf16.mxu1 %v7667_v62  ;;  %11082 = vmatpush3.bf16.msra.mxu1 %v11921_v16  ;;  %v9683_v16 = vld [vmem:[%s12015_s12 + $0x14] sm:$0x1]  ;;  %v8073_v62 = vshrl.u32 %v9687_v40, 16 }
 0x515   : > { %11083 = vmatprep.subr.bf16.mxu1 %v11922_v13 }
 0x518   : > { %11084 = vmatpush3.bf16.msra.mxu1 %v11922_v13  ;;  %v8062_v13 = vshrl.u32 %v9685_v15, 16  ;;  %v8055_v15 = vor.u32 %v8054_v42, %v8051_v38  ;;  %v7662_v38 = vld [vmem:[#allocation2 + $0x1a2] sm:$0xff] }
 0x519   : > { %11085 = vmatprep.subr.bf16.mxu1 %v11923_v50 }
 0x51b   : > { %11054 = vmatmul.mubr.bf16.gmra.mrb[24].mxu1 %v7668_v35  ;;  %v8044_v35 = vshll.u32 %v9683_v16, 16 }
 0x51c   : > { %11057 = vmatprep.mubr.bf16.mxu1 %v7669_v25  ;;  %11086 = vmatpush3.bf16.msra.mxu1 %v11923_v50  ;;  %v8076_v50 = vshll.u32 %v9687_v40, 16  ;;  %v8031_v25 = vor.u32 %v8030_v55, %v8027_v54  ;;  %v8089_v55 = vor.u32 %v8088_v53, %v14463_v2  ;;  %v9697_v53 = vld [vmem:[%s12015_s12 + $0x4c] sm:$0xf] }
 0x51d   : > { %11087 = vmatprep.subr.bf16.mxu1 %v11924_v60  ;;  %v8046_v51 = vrot.slane %v8044_v35, 5  ;;  %v8056_v35 = vrot.slane %v8055_v15, 4  ;;  %v8158_v15 = vshrl.u32 %v9697_v53, 16 }
 0x51e   : > { %v8078_v47 = vrot.slane %v8076_v50, 5  ;;  %v8070_v50 = vrot.slane %v8068_v58, 5  ;;  %v8090_v32 = vrot.slane %v8089_v55, 4 }
 0x520   : > { %11088 = vmatpush3.bf16.msra.mxu1 %v11924_v60  ;;  %v9690_v60 = vld [vmem:[%s12015_s12 + $0x30] sm:$0xf] }
 0x521   : > { %11089 = vmatprep.subr.bf16.mxu1 %v11925_v18  ;;  %v8097_v22 = vshrl.u32 %v9690_v60, 16  ;;  %v8100_v21 = vshll.u32 %v9690_v60, 16 }
 0x523   : > { %11058 = vmatmul.mubr.bf16.gmra.mrb[28].mxu1 %v7670_v31  ;;  %v14460_v31 = vrot.slane %v8058_v0, 5  ;;  %v8099_v12 = vrot.slane %v8097_v22, 4  ;;  %v8102_v16 = vrot.slane %v8100_v21, 5  ;;  %v9695_v22 = vld [vmem:[%s12015_s12 + $0x44] sm:$0x1]  ;;  %v14482_v21 = vrot.slane %v8130_v30, 5 }
 0x524   : > { %11061 = vmatprep.mubr.bf16.mxu1 %v7671_v29  ;;  %11090 = vmatpush3.bf16.msra.mxu1 %v11925_v18  ;;  %v8041_v18 = vor.u32 %v8040_v27, %v14454_v9  ;;  %v8075_v29 = vrot.slane %v8073_v62, 4  ;;  %v9692_v27 = vld [vmem:[%s12015_s12 + $0x38] sm:$0x1]  ;;  %v7676_v62 = vpack.c.bf16 %v7658_v37, %v7657_v34  ;;  %v8095_v37 = vsel %vm12047_vm2, %v8090_v32, %v8094_v20 }
 0x525   : > { %11091 = vmatprep.subr.bf16.mxu1 %v11926_v14  ;;  %v8140_v55 = vshll.u32 %v9695_v22, 16 }
 0x526   : > { %v8042_v7 = vrot.slane %v8041_v18, 4  ;;  %v8079_v54 = vor.u32 %v8078_v47, %v8075_v29  ;;  %v7661_v18 = vld [vmem:[#allocation2 + $0x19a] sm:$0xff]  ;;  %v8103_v29 = vor.u32 %v8102_v16, %v8099_v12  ;;  %v8137_v16 = vor.u32 %v8136_v1, %v14482_v21 }
 0x528   : > { %11092 = vmatpush3.bf16.msra.mxu1 %v11926_v14  ;;  %v8064_v14 = vrot.slane %v8062_v13, 4  ;;  %v8080_v42 = vrot.slane %v8079_v54, 4  ;;  %v14496_v23 = vrot.slane %v8103_v29, 4  ;;  %v8138_v32 = vrot.slane %v8137_v16, 4  ;;  %v9703_v29 = vld [vmem:[%s12015_s12 + $0x64] sm:$0xf] }
 0x52a   : > { %v8065_v40 = vor.u32 %v8064_v14, %v14460_v31  ;;  %v8116_v14 = vshll.u32 %v9692_v27, 16  ;;  %v8085_v34 = vsel %vm12047_vm2, %v8080_v42, %v14463_v2 }
 0x52b   : > { %11062 = vmatmul.mubr.bf16.gmra.mrb[0].mxu1 %v7672_v10  ;;  %v8032_v10 = vrot.slane %v8031_v25, 4  ;;  %v9696_v25 = vld [vmem:[%s12015_s12 + $0x48] sm:$0xf] }
 0x52c   : > { %11065 = vmatprep.mubr.bf16.mxu1 %v7673_v3  ;;  %v9693_v3 = vld [vmem:[%s12015_s12 + $0x3c] sm:$0xf]  ;;  %v8066_v60 = vrot.slane %v8065_v40, 4  ;;  %v8145_v26 = vshrl.u32 %v9696_v25, 16  ;;  %v9699_v40 = vld [vmem:[%s12015_s12 + $0x54] sm:$0xf] }
 0x52d   : > { %v8121_v0 = vshrl.u32 %v9693_v3, 16  ;;  %v8124_v13 = vshll.u32 %v9693_v3, 16  ;;  %v14498_v54 = vrot.slane %v8116_v14, 5 }
 0x52e   : > { %v8071_v3 = vsel %vm12047_vm2, %v8066_v60, %v8070_v50  ;;  %v8147_v27 = vrot.slane %v8145_v26, 4  ;;  %v8182_v50 = vshrl.u32 %v9700_v49, 16 }
 0x52f   : > { %v8123_v47 = vrot.slane %v8121_v0, 4  ;;  %v8126_v36 = vrot.slane %v8124_v13, 5  ;;  %v8169_v0 = vshrl.u32 %v9699_v40, 16  ;;  %v8172_v13 = vshll.u32 %v9699_v40, 16 }
 0x530   : > { %v8184_v22 = vrot.slane %v8182_v50, 4  ;;  %v9704_v50 = vld [vmem:[%s12015_s12 + $0x68] sm:$0x1] }
 0x533   : > { %11066 = vmatmul.mubr.bf16.gmra.mrb[4].mxu1 %v7674_v48  ;;  %v8037_v48 = vsel %vm12047_vm2, %v8032_v10, %v14454_v9  ;;  %v8113_v9 = vor.u32 %v8112_v61, %v14470_v39  ;;  %v8148_v10 = vshll.u32 %v9696_v25, 16  ;;  %v9698_v61 = vld [vmem:[%s12015_s12 + $0x50] sm:$0x1]  ;;  %v8142_v25 = vrot.slane %v8140_v55, 5  ;;  %v9708_v55 = vld [vmem:[%s12015_s12 + $0x78] sm:$0xf] }
 0x534   : > { %11069 = vmatprep.mubr.bf16.mxu1 %v7675_v17  ;;  %v8047_v17 = vsel %vm12047_vm2, %v8042_v7, %v8046_v51  ;;  %v7678_v51 = vpack.c.bf16 %v7662_v38, %v7661_v18  ;;  %v8154_v7 = vshll.u32 %v9697_v53, 16  ;;  %v9701_v18 = vld [vmem:[%s12015_s12 + $0x5c] sm:$0x1]  ;;  %v9702_v38 = vld [vmem:[%s12015_s12 + $0x60] sm:$0xf]  ;;  %v8164_v14 = vshll.u32 %v9698_v61, 16 }
 0x535   : > { %v9729_v58 = vcombine.low %v8037_v48, %v8047_v17  ;;  %v14500_v12 = vrot.slane %v8113_v9, 4  ;;  %v8150_v2 = vrot.slane %v8148_v10, 5  ;;  %v8160_v48 = vrot.slane %v8158_v15, 4  ;;  %v9705_v9 = vld [vmem:[%s12015_s12 + $0x6c] sm:$0xf] }
 0x536   : > { %v14504_v63 = vrot.slane %v8154_v7, 5  ;;  %v9731_v17 = vcombine.low %v8085_v34, %v8095_v37  ;;  %v8188_v26 = vshll.u32 %v9701_v18, 16  ;;  %v8193_v10 = vshrl.u32 %v9702_v38, 16 }
 0x537   : > { %v8119_v42 = vsel %vm12047_vm2, %v14500_v12, %v14498_v54  ;;  %v8151_v20 = vor.u32 %v8150_v2, %v8147_v27  ;;  %v8220_v34 = vshll.u32 %v9705_v9, 16 }
 0x538   : > { %v8161_v1 = vor.u32 %v8160_v48, %v14504_v63  ;;  %v8190_v16 = vrot.slane %v8188_v26, 5  ;;  %v8195_v27 = vrot.slane %v8193_v10, 4  ;;  %v9711_v26 = vld [vmem:[%s12015_s12 + $0x84] sm:$0xf]  ;;  %v9712_v10 = vld [vmem:[%s12015_s12 + $0x88] sm:$0xf] }
 0x539   : > { %v14525_v7 = vrot.slane %v8151_v20, 4 }
 0x53a   : > { %v8162_v12 = vrot.slane %v8161_v1, 4 }
 0x53b   : > { %11070 = vmatmul.mubr.bf16.gmra.mrb[8].mxu1 %v7676_v62  ;;  %v8178_v62 = vshll.u32 %v9700_v49, 16  ;;  %v8143_v49 = vsel %vm12047_vm2, %v8138_v32, %v8142_v25  ;;  %v8241_v25 = vshrl.u32 %v9708_v55, 16  ;;  %v9707_v32 = vld [vmem:[%s12015_s12 + $0x74] sm:$0x1] }
 0x53c   : > { %11073 = vmatprep.mubr.bf16.mxu1 %v14361_v44  ;;  %v8061_v44 = vsel %vm12047_vm2, %v8056_v35, %v14460_v31  ;;  %v8127_v31 = vor.u32 %v8126_v36, %v8123_v47  ;;  %v8109_v35 = vsel %vm12047_vm2, %v14496_v23, %v14470_v39  ;;  %v8171_v47 = vrot.slane %v8169_v0, 4  ;;  %v9706_v39 = vld [vmem:[%s12015_s12 + $0x70] sm:$0xf] }
 0x53d   : > { %v9730_v30 = vcombine.low %v8061_v44, %v8071_v3  ;;  %v8174_v36 = vrot.slane %v8172_v13, 5  ;;  %v14518_v53 = vrot.slane %v8178_v62, 5  ;;  %v8206_v44 = vshrl.u32 %v9703_v29, 16 }
 0x53e   : > { %v8128_v60 = vrot.slane %v8127_v31, 4  ;;  %v8217_v3 = vshrl.u32 %v9705_v9, 16  ;;  %v8226_v15 = vshll.u32 %v9706_v39, 16  ;;  %v8230_v40 = vshrl.u32 %v9706_v39, 16 }
 0x53f   : > { %v8166_v23 = vrot.slane %v8164_v14, 5  ;;  %v8175_v54 = vor.u32 %v8174_v36, %v8171_v47  ;;  %v8185_v31 = vor.u32 %v8184_v22, %v14518_v53  ;;  %v8208_v0 = vrot.slane %v8206_v44, 4 }
 0x540   : > { %v8133_v37 = vsel %vm12047_vm2, %v8128_v60, %v14482_v21  ;;  %v9709_v21 = vld [vmem:[%s12015_s12 + $0x7c] sm:$0xf]  ;;  %v8219_v13 = vrot.slane %v8217_v3, 4  ;;  %v8222_v62 = vrot.slane %v8220_v34, 5  ;;  %v14535_v48 = vrot.slane %v8226_v15, 5 }
 0x541   : > { %v8232_v60 = vrot.slane %v8230_v40, 4  ;;  %v8176_v18 = vrot.slane %v8175_v54, 4  ;;  %v8250_v20 = vshll.u32 %v9709_v21, 16  ;;  %v8254_v14 = vshrl.u32 %v9709_v21, 16  ;;  %v9710_v3 = vld [vmem:[%s12015_s12 + $0x80] sm:$0x1] }
 0x542   : > { %v8157_v9 = vsel %vm12047_vm2, %v14525_v7, %v14504_v63  ;;  %v8167_v47 = vsel %vm12047_vm2, %v8162_v12, %v8166_v23  ;;  %v8212_v39 = vshll.u32 %v9704_v50, 16  ;;  %v8223_v1 = vor.u32 %v8222_v62, %v8219_v13  ;;  %v9713_v62 = vld [vmem:[%s12015_s12 + $0x8c] sm:$0x1] }
 0x543   : > { %11074 = vmatmul.mubr.bf16.gmra.mrb[12].mxu1 %v7678_v51  ;;  %v8196_v51 = vshll.u32 %v9702_v38, 16  ;;  %v8186_v38 = vrot.slane %v8185_v31, 4  ;;  %v8181_v44 = vsel %vm12047_vm2, %v8176_v18, %v14518_v53  ;;  %v14554_v34 = vrot.slane %v8250_v20, 5  ;;  %v9715_v18 = vld [vmem:[%s12015_s12 + $0x94] sm:$0xf] }
 0x544   : > { %11093 = vmatprep.mubr.bf16.mxu1 %v9729_v58  ;;  %v8202_v58 = vshll.u32 %v9703_v29, 16  ;;  %v9732_v29 = vcombine.low %v8109_v35, %v8119_v42  ;;  %v8236_v35 = vshll.u32 %v9707_v32, 16  ;;  %v8243_v42 = vrot.slane %v8241_v25, 4 }
 0x545   : > { %v8198_v2 = vrot.slane %v8196_v51, 5  ;;  %v8233_v51 = vor.u32 %v8232_v60, %v14535_v48  ;;  %v8191_v63 = vsel %vm12047_vm2, %v8186_v38, %v8190_v16  ;;  %v8265_v7 = vshrl.u32 %v9711_v26, 16 }
 0x546   : > { %v14532_v61 = vrot.slane %v8202_v58, 5  ;;  %v8268_v15 = vshll.u32 %v9711_v26, 16  ;;  %v8274_v40 = vshll.u32 %v9712_v10, 16  ;;  %v8214_v31 = vrot.slane %v8212_v39, 5 }
 0x547   : > { %v8199_v36 = vor.u32 %v8198_v2, %v8195_v27  ;;  %v8224_v53 = vrot.slane %v8223_v1, 4  ;;  %v8238_v12 = vrot.slane %v8236_v35, 5  ;;  %v8260_v27 = vshll.u32 %v9710_v3, 16  ;;  %v9714_v2 = vld [vmem:[%s12015_s12 + $0x90] sm:$0xf] }
 0x548   : > { %v8209_v22 = vor.u32 %v8208_v0, %v14532_v61  ;;  %v9734_v21 = vcombine.low %v8157_v9, %v8167_v47  ;;  %v9735_v0 = vcombine.low %v8181_v44, %v8191_v63  ;;  %v8267_v50 = vrot.slane %v8265_v7, 4 }
 0x549   : > { %v8200_v23 = vrot.slane %v8199_v36, 4  ;;  %v8270_v60 = vrot.slane %v8268_v15, 5  ;;  %v14559_v25 = vrot.slane %v8274_v40, 5  ;;  %v8289_v20 = vshrl.u32 %v9714_v2, 16  ;;  %v9716_v15 = vld [vmem:[%s12015_s12 + $0x98] sm:$0x1] }
 0x54a   : > { %v8210_v54 = vrot.slane %v8209_v22, 4  ;;  %v8229_v9 = vsel %vm12047_vm2, %v8224_v53, %v14535_v48  ;;  %v8262_v22 = vrot.slane %v8260_v27, 5  ;;  %v8284_v1 = vshll.u32 %v9713_v62, 16  ;;  %v9720_v27 = vld [vmem:[%s12015_s12 + $0xa8] sm:$0xf] }
 0x54b   : > { %11094 = vmatmul.mubr.bf16.vlgmr.msra.gmra.mrb[16].mxu1 %v9730_v30  ;;  %v8244_v30 = vshll.u32 %v9708_v55, 16  ;;  %v8234_v55 = vrot.slane %v8233_v51, 4  ;;  %v8205_v38 = vsel %vm12047_vm2, %v8200_v23, %v14532_v61  ;;  %v8298_v61 = vshll.u32 %v9715_v18, 16 }
 0x54c   : > { %11097 = vmatprep.mubr.bf16.mxu1 %v9731_v17  ;;  %v9733_v17 = vcombine.low %v8133_v37, %v8143_v49  ;;  %v8256_v37 = vrot.slane %v8254_v14, 4  ;;  %v8278_v49 = vshrl.u32 %v9712_v10, 16  ;;  %v8215_v32 = vsel %vm12047_vm2, %v8210_v54, %v8214_v31  ;;  %v9719_v31 = vld [vmem:[%s12015_s12 + $0xa4] sm:$0x1] }
 0x54d   : > { %v8246_v58 = vrot.slane %v8244_v30, 5  ;;  %v8292_v14 = vshll.u32 %v9714_v2, 16  ;;  %v8239_v47 = vsel %vm12047_vm2, %v8234_v55, %v8238_v12  ;;  %v8302_v26 = vshrl.u32 %v9715_v18, 16 }
 0x54e   : > { %v8257_v13 = vor.u32 %v8256_v37, %v14554_v34  ;;  %v8280_v30 = vrot.slane %v8278_v49, 4  ;;  %v8291_v44 = vrot.slane %v8289_v20, 4  ;;  %v9736_v3 = vcombine.low %v8205_v38, %v8215_v32  ;;  %v9723_v38 = vld [vmem:[%s12015_s12 + $0xb4] sm:$0xf]  ;;  %v9724_v32 = vld [vmem:[%s12015_s12 + $0xb8] sm:$0xf] }
 0x54f   : > { %v8247_v16 = vor.u32 %v8246_v58, %v8243_v42  ;;  %v8271_v58 = vor.u32 %v8270_v60, %v8267_v50  ;;  %v8294_v63 = vrot.slane %v8292_v14, 5  ;;  %v9737_v37 = vcombine.low %v8229_v9, %v8239_v47 }
 0x550   : > { %v8258_v39 = vrot.slane %v8257_v13, 4  ;;  %v8281_v48 = vor.u32 %v8280_v30, %v14559_v25  ;;  %v8286_v49 = vrot.slane %v8284_v1, 5  ;;  %v14581_v23 = vrot.slane %v8298_v61, 5  ;;  %v9721_v13 = vld [vmem:[%s12015_s12 + $0xac] sm:$0xf] }
 0x551   : > { %v8248_v36 = vrot.slane %v8247_v16, 4  ;;  %v8304_v54 = vrot.slane %v8302_v26, 4  ;;  %v8272_v2 = vrot.slane %v8271_v58, 4  ;;  %v8332_v62 = vshll.u32 %v9719_v31, 16 }
 0x552   : > { %v8263_v40 = vsel %vm12047_vm2, %v8258_v39, %v8262_v22  ;;  %v8337_v30 = vshrl.u32 %v9720_v27, 16  ;;  %v8340_v18 = vshll.u32 %v9720_v27, 16  ;;  %v8361_v39 = vshrl.u32 %v9723_v38, 16 }
 0x553   : > { %11098 = vmatmul.mubr.bf16.gmra.mrb[20].mxu1 %v9732_v29  ;;  %v9717_v29 = vld [vmem:[%s12015_s12 + $0x9c] sm:$0xf]  ;;  %v8253_v7 = vsel %vm12047_vm2, %v8248_v36, %v14554_v34  ;;  %v8282_v34 = vrot.slane %v8281_v48, 4  ;;  %v8305_v60 = vor.u32 %v8304_v54, %v14581_v23  ;;  %v8277_v9 = vsel %vm12047_vm2, %v8272_v2, %v14559_v25  ;;  %v9727_v54 = vld [vmem:[%s12015_s12 + $0xc4] sm:$0xf] }
 0x554   : > { %11101 = vmatprep.mubr.bf16.mxu1 %v9733_v17  ;;  %v9718_v17 = vld [vmem:[%s12015_s12 + $0xa0] sm:$0xf]  ;;  %v8313_v10 = vshrl.u32 %v9717_v29, 16  ;;  %v8316_v51 = vshll.u32 %v9717_v29, 16  ;;  %v9738_v50 = vcombine.low %v8253_v7, %v8263_v40  ;;  %v8346_v29 = vshll.u32 %v9721_v13, 16 }
 0x555   : > { %v8322_v35 = vshll.u32 %v9718_v17, 16  ;;  %v8326_v42 = vshrl.u32 %v9718_v17, 16  ;;  %v8350_v17 = vshrl.u32 %v9721_v13, 16  ;;  %v8287_v47 = vsel %vm12047_vm2, %v8282_v34, %v8286_v49 }
 0x556   : > { %v8315_v53 = vrot.slane %v8313_v10, 4  ;;  %v8318_v55 = vrot.slane %v8316_v51, 5  ;;  %v8364_v1 = vshll.u32 %v9723_v38, 16  ;;  %v8370_v61 = vshll.u32 %v9724_v32, 16 }
 0x557   : > { %v14584_v12 = vrot.slane %v8322_v35, 5  ;;  %v8328_v16 = vrot.slane %v8326_v42, 4  ;;  %v8374_v26 = vshrl.u32 %v9724_v32, 16  ;;  %v8306_v10 = vrot.slane %v8305_v60, 4 }
 0x558   : > { %v8319_v20 = vor.u32 %v8318_v55, %v8315_v53  ;;  %v8334_v51 = vrot.slane %v8332_v62, 5  ;;  %v8339_v35 = vrot.slane %v8337_v30, 4  ;;  %v8342_v42 = vrot.slane %v8340_v18, 5 }
 0x559   : > { %v8329_v14 = vor.u32 %v8328_v16, %v14584_v12  ;;  %v8348_v25 = vrot.slane %v8346_v29, 5  ;;  %v8363_v7 = vrot.slane %v8361_v39, 4  ;;  %v8372_v40 = vrot.slane %v8370_v61, 5  ;;  %v9725_v16 = vld [vmem:[%s12015_s12 + $0xbc] sm:$0x1] }
 0x55a   : > { %v8320_v58 = vrot.slane %v8319_v20, 4  ;;  %v8376_v49 = vrot.slane %v8374_v26, 4  ;;  %v8343_v55 = vor.u32 %v8342_v42, %v8339_v35  ;;  %v8394_v62 = vshll.u32 %v9727_v54, 16  ;;  %v9728_v39 = vld [vmem:[%s12015_s12 + $0xc8] sm:$0x1] }
 0x55b   : > { %11102 = vmatmul.mubr.bf16.gmra.mrb[24].mxu1 %v9734_v21  ;;  %v8295_v21 = vor.u32 %v8294_v63, %v8291_v44  ;;  %v8330_v48 = vrot.slane %v8329_v14, 4  ;;  %v8352_v44 = vrot.slane %v8350_v17, 4  ;;  %v9739_v63 = vcombine.low %v8277_v9, %v8287_v47 }
 0x55c   : > { %11105 = vmatprep.mubr.bf16.mxu1 %v9735_v0  ;;  %v8308_v0 = vshll.u32 %v9716_v15, 16  ;;  %v8366_v15 = vrot.slane %v8364_v1, 5  ;;  %v8325_v27 = vsel %vm12047_vm2, %v8320_v58, %v14584_v12  ;;  %v8377_v30 = vor.u32 %v8376_v49, %v8372_v40 }
 0x55d   : > { %v8296_v36 = vrot.slane %v8295_v21, 4  ;;  %v8335_v2 = vsel %vm12047_vm2, %v8330_v48, %v8334_v51  ;;  %v8353_v34 = vor.u32 %v8352_v44, %v8348_v25  ;;  %v8380_v18 = vshll.u32 %v9725_v16, 16 }
 0x55e   : > { %v8310_v22 = vrot.slane %v8308_v0, 5  ;;  %v8367_v60 = vor.u32 %v8366_v15, %v8363_v7  ;;  %v8344_v32 = vrot.slane %v8343_v55, 4  ;;  %v8396_v17 = vrot.slane %v8394_v62, 5  ;;  %v14627_v15 = vld [vmem:[%s14759_s4] ss:$0 sm:$0xff] }
 0x55f   : > { %v8301_v31 = vsel %vm12047_vm2, %v8296_v36, %v14581_v23  ;;  %v8398_v23 = vshrl.u32 %v9727_v54, 16  ;;  %v8354_v20 = vrot.slane %v8353_v34, 4  ;;  %v8378_v36 = vrot.slane %v8377_v30, 4 }
 0x560   : > { %v8311_v53 = vsel %vm12047_vm2, %v8306_v10, %v8310_v22  ;;  %v8368_v47 = vrot.slane %v8367_v60, 4  ;;  %v8382_v22 = vrot.slane %v8380_v18, 5  ;;  %v8349_v1 = vsel %vm12047_vm2, %v8344_v32, %v8348_v25 }
 0x561   : > { %v9740_v38 = vcombine.low %v8301_v31, %v8311_v53  ;;  %v8400_v9 = vrot.slane %v8398_v23, 4  ;;  %v8404_v51 = vshll.u32 %v9728_v39, 16  ;;  %v11143_v49 = vadd.f32 %v14627_v15, %v14209_v52  ;;  %v14636_v31 = vld [vmem:[%s14761_s6] ss:$0 sm:$0xff] }
 0x562   : > { %v8373_v35 = vsel %vm12047_vm2, %v8368_v47, %v8372_v40  ;;  %v8383_v42 = vsel %vm12047_vm2, %v8378_v36, %v8382_v22  ;;  %v11141_v40 = vadd.f32 %v14207_v59, %v14627_v15  ;;  %v11145_v11 = vadd.f32 %v14211_v33, %v14627_v15 }
 0x563   : > { %11106 = vmatmul.mubr.bf16.gmra.mrb[28].mxu1 %v9736_v3  ;;  %v9722_v3 = vld [vmem:[%s12015_s12 + $0xb0] sm:$0x1]  ;;  %v8401_v10 = vor.u32 %v8400_v9, %v8396_v17  ;;  %v9743_v48 = vcombine.low %v8373_v35, %v8383_v42  ;;  %v11147_v16 = vadd.f32 %v14627_v15, %v14213_v41  ;;  %v11149_v23 = vadd.f32 %v14223_v24, %v14627_v15 }
 0x564   : > { %11109 = vmatprep.mubr.bf16.mxu1 %v9737_v37  ;;  %v9726_v37 = vld [vmem:[%s12015_s12 + $0xc0] sm:$0xf]  ;;  %v8356_v21 = vshll.u32 %v9722_v3, 16  ;;  %v8406_v3 = vrot.slane %v8404_v51, 5  ;;  %v11151_v30 = vadd.f32 %v14627_v15, %v14225_v45  ;;  %v11161_v51 = vadd.f32 %v14237_v46, %v14627_v15 }
 0x565   : > { %v8385_v0 = vshrl.u32 %v9726_v37, 16  ;;  %v8388_v13 = vshll.u32 %v9726_v37, 16 }
 0x566   : > { %v8358_v14 = vrot.slane %v8356_v21, 5 }
 0x567   : > { %v8387_v12 = vrot.slane %v8385_v0, 4  ;;  %v8390_v29 = vrot.slane %v8388_v13, 5 }
 0x568   : > { %v8359_v61 = vsel %vm12047_vm2, %v8354_v20, %v8358_v14  ;;  %v11155_v14 = vadd.f32 %v14627_v15, %v14229_v43  ;;  %v11157_v43 = vadd.f32 %v14233_v28, %v14627_v15 }
 0x569   : > { %v8391_v26 = vor.u32 %v8390_v29, %v8387_v12  ;;  %v9742_v58 = vcombine.low %v8349_v1, %v8359_v61  ;;  %v11159_v61 = vadd.f32 %v14627_v15, %v14235_v5 }
 0x56b   : > { %11110 = vmatmul.mubr.bf16.gmra.mrb[0].mxu1 %v9738_v50  ;;  %v9741_v50 = vcombine.low %v8325_v27, %v8335_v2  ;;  %v8392_v44 = vrot.slane %v8391_v26, 4 }
 0x56c   : > { %11113 = vmatprep.mubr.bf16.mxu1 %v9739_v63  ;;  %v8402_v63 = vrot.slane %v8401_v10, 4 }
 0x56d   : > { %v8397_v25 = vsel %vm12047_vm2, %v8392_v44, %v8396_v17 }
 0x56e   : > { %v8407_v37 = vsel %vm12047_vm2, %v8402_v63, %v8406_v3 }
 0x56f   : > { %v9744_v7 = vcombine.low %v8397_v25, %v8407_v37 }
 0x573   : > { %11114 = vmatmul.mubr.bf16.gmra.mrb[4].mxu1 %v9740_v38 }
 0x574   : > { %11117 = vmatprep.mubr.bf16.mxu1 %v9741_v50  ;;  %v11153_v50 = vadd.f32 %v14227_v8, %v14627_v15 }
 0x57b   : > { %11118 = vmatmul.mubr.bf16.gmra.mrb[8].mxu1 %v9742_v58  ;;  %v11163_v58 = vadd.f32 %v14627_v15, %v14239_v6  ;;  %v11165_v6 = vadd.f32 %v14243_v56, %v14627_v15 }
 0x57c   : > { %11121 = vmatprep.mubr.bf16.mxu1 %v9743_v48 }
 0x583   : > { %11122 = vmatmul.mubr.bf16.gmra.mrb[12].mxu1 %v9744_v7 }
 0x61e   : > { %v11095_v54 = vpop.f32.mrb[16].mxu1 }
 0x61f   : > { %v11142_v53 = vadd.f32 %v11141_v40, %v11095_v54  ;;  %v8570_v55 = vpop.f32.mrb[17].mxu1  ;;  %v11167_v54 = vadd.f32 %v14627_v15, %v14245_v19 }
 0x620   : > { %v11144_v27 = vadd.f32 %v11143_v49, %v8570_v55  ;;  %v11096_v59 = vpop.f32.mrb[18].mxu1  ;;  %v11169_v55 = vadd.f32 %v14247_v57, %v14627_v15 }
 0x621   : > { %v8738_v2 = vadd.f32 %v11142_v53, %v14636_v31  ;;  %v11146_v52 = vadd.f32 %v11145_v11, %v11096_v59  ;;  %v8573_v34 = vpop.f32.mrb[19].mxu1  ;;  %v11171_v59 = vadd.f32 %v14627_v15, %v14249_v4 }
 0x622   : > { %v8736_v33 = vadd.f32 %v11144_v27, %v14636_v31  ;;  %v11148_v21 = vadd.f32 %v11147_v16, %v8573_v34 }
 0x623   : > { %v8770_v0 = vmax.f32 %v8738_v2, 0.0  ;;  %v8739_v41 = vadd.f32 %v11146_v52, %v14636_v31 }
 0x624   : > { %v8768_v13 = vmax.f32 %v8736_v33, 0.0  ;;  %v8737_v62 = vadd.f32 %v11148_v21, %v14636_v31 }
 0x625   : > { %8802 = vst [vmem:[%s14647_s19 + $0x10] sm:$0xff] %v8770_v0  ;;  %v8771_v60 = vmax.f32 %v8739_v41, 0.0 }
 0x626   : > { %8800 = vst [vmem:[%s14647_s19] sm:$0xff] %v8768_v13  ;;  %v8769_v18 = vmax.f32 %v8737_v62, 0.0  ;;  %v11099_v38 = vpop.f32.mrb[20].mxu1 }
 0x627   : > { %8803 = vst [vmem:[%s14647_s19 + $0x18] sm:$0xff] %v8771_v60  ;;  %v11150_v32 = vadd.f32 %v11149_v23, %v11099_v38  ;;  %v8586_v20 = vpop.f32.mrb[21].mxu1 }
 0x628   : > { %8801 = vst [vmem:[%s14647_s19 + $0x8] sm:$0xff] %v8769_v18  ;;  %v11152_v24 = vadd.f32 %v11151_v30, %v8586_v20  ;;  %v11100_v12 = vpop.f32.mrb[22].mxu1 }
 0x629   : > { %v8742_v29 = vadd.f32 %v11150_v32, %v14636_v31  ;;  %v11154_v45 = vadd.f32 %v11153_v50, %v11100_v12  ;;  %v8589_v17 = vpop.f32.mrb[23].mxu1 }
 0x62a   : > { %v8740_v9 = vadd.f32 %v11152_v24, %v14636_v31  ;;  %v11156_v47 = vadd.f32 %v11155_v14, %v8589_v17 }
 0x62b   : > { %v8774_v8 = vmax.f32 %v8742_v29, 0.0  ;;  %v8743_v36 = vadd.f32 %v11154_v45, %v14636_v31 }
 0x62c   : > { %v8772_v22 = vmax.f32 %v8740_v9, 0.0  ;;  %v8741_v39 = vadd.f32 %v11156_v47, %v14636_v31 }
 0x62d   : > { %8806 = vst [vmem:[%s14647_s19 + $0x30] sm:$0xff] %v8774_v8  ;;  %v8775_v1 = vmax.f32 %v8743_v36, 0.0 }
 0x62e   : > { %8804 = vst [vmem:[%s14647_s19 + $0x20] sm:$0xff] %v8772_v22  ;;  %v8773_v26 = vmax.f32 %v8741_v39, 0.0  ;;  %v11103_v10 = vpop.f32.mrb[24].mxu1 }
 0x62f   : > { %8807 = vst [vmem:[%s14647_s19 + $0x38] sm:$0xff] %v8775_v1  ;;  %v11158_v35 = vadd.f32 %v11157_v43, %v11103_v10  ;;  %v8602_v42 = vpop.f32.mrb[25].mxu1 }
 0x630   : > { %8805 = vst [vmem:[%s14647_s19 + $0x28] sm:$0xff] %v8773_v26  ;;  %v11160_v28 = vadd.f32 %v11159_v61, %v8602_v42  ;;  %v11104_v48 = vpop.f32.mrb[26].mxu1 }
 0x631   : > { %v8746_v44 = vadd.f32 %v11158_v35, %v14636_v31  ;;  %v11162_v5 = vadd.f32 %v11161_v51, %v11104_v48  ;;  %v8605_v63 = vpop.f32.mrb[27].mxu1 }
 0x632   : > { %v8744_v3 = vadd.f32 %v11160_v28, %v14636_v31  ;;  %v11164_v25 = vadd.f32 %v11163_v58, %v8605_v63 }
 0x633   : > { %v8778_v46 = vmax.f32 %v8746_v44, 0.0  ;;  %v8747_v37 = vadd.f32 %v11162_v5, %v14636_v31 }
 0x634   : > { %v8776_v7 = vmax.f32 %v8744_v3, 0.0  ;;  %v8745_v40 = vadd.f32 %v11164_v25, %v14636_v31 }
 0x635   : > { %8810 = vst [vmem:[%s14647_s19 + $0x50] sm:$0xff] %v8778_v46  ;;  %v8779_v49 = vmax.f32 %v8747_v37, 0.0 }
 0x636   : > { %8808 = vst [vmem:[%s14647_s19 + $0x40] sm:$0xff] %v8776_v7  ;;  %v8777_v11 = vmax.f32 %v8745_v40, 0.0  ;;  %v11107_v53 = vpop.f32.mrb[28].mxu1 }
 0x637   : > { %8811 = vst [vmem:[%s14647_s19 + $0x58] sm:$0xff] %v8779_v49  ;;  %v11166_v16 = vadd.f32 %v11165_v6, %v11107_v53  ;;  %v8618_v27 = vpop.f32.mrb[29].mxu1 }
 0x638   : > { %8809 = vst [vmem:[%s14647_s19 + $0x48] sm:$0xff] %v8777_v11  ;;  %v11168_v56 = vadd.f32 %v11167_v54, %v8618_v27  ;;  %v11108_v2 = vpop.f32.mrb[30].mxu1 }
 0x639   : > { %v8750_v19 = vadd.f32 %v11166_v16, %v14636_v31  ;;  %v11170_v52 = vadd.f32 %v11169_v55, %v11108_v2  ;;  %v8621_v34 = vpop.f32.mrb[31].mxu1 }
 0x63a   : > { %v8748_v33 = vadd.f32 %v11168_v56, %v14636_v31  ;;  %v11172_v57 = vadd.f32 %v11171_v59, %v8621_v34 }
 0x63b   : > { %v8782_v21 = vmax.f32 %v8750_v19, 0.0  ;;  %v8751_v0 = vadd.f32 %v11170_v52, %v14636_v31 }
 0x63c   : > { %v8780_v41 = vmax.f32 %v8748_v33, 0.0  ;;  %v8749_v13 = vadd.f32 %v11172_v57, %v14636_v31 }
 0x63d   : > { %8814 = vst [vmem:[%s14647_s19 + $0x70] sm:$0xff] %v8782_v21  ;;  %v8783_v4 = vmax.f32 %v8751_v0, 0.0 }
 0x63e   : > { %8812 = vst [vmem:[%s14647_s19 + $0x60] sm:$0xff] %v8780_v41  ;;  %v8781_v62 = vmax.f32 %v8749_v13, 0.0  ;;  %v11111_v23 = vpop.f32.mrb[0].mxu1 }
 0x63f   : > { %8815 = vst [vmem:[%s14647_s19 + $0x78] sm:$0xff] %v8783_v4  ;;  %v11173_v60 = vadd.f32 %v11111_v23, %v14627_v15  ;;  %v8634_v30 = vpop.f32.mrb[1].mxu1 }
 0x640   : > { %8813 = vst [vmem:[%s14647_s19 + $0x68] sm:$0xff] %v8781_v62  ;;  %v11174_v18 = vadd.f32 %v14627_v15, %v8634_v30  ;;  %v11112_v38 = vpop.f32.mrb[2].mxu1 }
 0x641   : > { %v8754_v50 = vadd.f32 %v11173_v60, %v14636_v31  ;;  %v11175_v32 = vadd.f32 %v11112_v38, %v14627_v15  ;;  %v8637_v20 = vpop.f32.mrb[3].mxu1 }
 0x642   : > { %v8752_v14 = vadd.f32 %v11174_v18, %v14636_v31  ;;  %v11176_v24 = vadd.f32 %v14627_v15, %v8637_v20 }
 0x643   : > { %v8786_v12 = vmax.f32 %v8754_v50, 0.0  ;;  %v8755_v29 = vadd.f32 %v11175_v32, %v14636_v31 }
 0x644   : > { %v8784_v45 = vmax.f32 %v8752_v14, 0.0  ;;  %v8753_v17 = vadd.f32 %v11176_v24, %v14636_v31 }
 0x645   : > { %8818 = vst [vmem:[%s14647_s19 + $0x90] sm:$0xff] %v8786_v12  ;;  %v8787_v9 = vmax.f32 %v8755_v29, 0.0 }
 0x646   : > { %8816 = vst [vmem:[%s14647_s19 + $0x80] sm:$0xff] %v8784_v45  ;;  %v8785_v47 = vmax.f32 %v8753_v17, 0.0  ;;  %v11115_v8 = vpop.f32.mrb[4].mxu1 }
 0x647   : > { %8819 = vst [vmem:[%s14647_s19 + $0x98] sm:$0xff] %v8787_v9  ;;  %v11177_v36 = vadd.f32 %v11115_v8, %v14627_v15  ;;  %v8650_v22 = vpop.f32.mrb[5].mxu1 }
 0x648   : > { %8817 = vst [vmem:[%s14647_s19 + $0x88] sm:$0xff] %v8785_v47  ;;  %v11178_v39 = vadd.f32 %v14627_v15, %v8650_v22  ;;  %v11116_v43 = vpop.f32.mrb[6].mxu1 }
 0x649   : > { %v8758_v1 = vadd.f32 %v11177_v36, %v14636_v31  ;;  %v11179_v61 = vadd.f32 %v11116_v43, %v14627_v15  ;;  %v8653_v26 = vpop.f32.mrb[7].mxu1 }
 0x64a   : > { %v8756_v10 = vadd.f32 %v11178_v39, %v14636_v31  ;;  %v11180_v51 = vadd.f32 %v14627_v15, %v8653_v26 }
 0x64b   : > { %v8790_v35 = vmax.f32 %v8758_v1, 0.0  ;;  %v8759_v42 = vadd.f32 %v11179_v61, %v14636_v31 }
 0x64c   : > { %v8788_v58 = vmax.f32 %v8756_v10, 0.0  ;;  %v8757_v28 = vadd.f32 %v11180_v51, %v14636_v31 }
 0x64d   : > { %8822 = vst [vmem:[%s14647_s19 + $0xb0] sm:$0xff] %v8790_v35  ;;  %v8791_v48 = vmax.f32 %v8759_v42, 0.0 }
 0x64e   : > { %8820 = vst [vmem:[%s14647_s19 + $0xa0] sm:$0xff] %v8788_v58  ;;  %v8789_v44 = vmax.f32 %v8757_v28, 0.0  ;;  %v11119_v5 = vpop.f32.mrb[8].mxu1 }
 0x64f   : > { %8823 = vst [vmem:[%s14647_s19 + $0xb8] sm:$0xff] %v8791_v48  ;;  %v11181_v63 = vadd.f32 %v11119_v5, %v14627_v15  ;;  %v8666_v3 = vpop.f32.mrb[9].mxu1 }
 0x650   : > { %8821 = vst [vmem:[%s14647_s19 + $0xa8] sm:$0xff] %v8789_v44  ;;  %v11182_v25 = vadd.f32 %v14627_v15, %v8666_v3  ;;  %v11120_v46 = vpop.f32.mrb[10].mxu1 }
 0x651   : > { %v8762_v37 = vadd.f32 %v11181_v63, %v14636_v31  ;;  %v11183_v7 = vadd.f32 %v11120_v46, %v14627_v15  ;;  %v8669_v40 = vpop.f32.mrb[11].mxu1 }
 0x652   : > { %v8760_v6 = vadd.f32 %v11182_v25, %v14636_v31  ;;  %v11184_v49 = vadd.f32 %v14627_v15, %v8669_v40 }
 0x653   : > { %v8794_v54 = vmax.f32 %v8762_v37, 0.0  ;;  %v8763_v11 = vadd.f32 %v11183_v7, %v14636_v31 }
 0x654   : > { %v8792_v53 = vmax.f32 %v8760_v6, 0.0  ;;  %v8761_v55 = vadd.f32 %v11184_v49, %v14636_v31 }
 0x655   : > { %8826 = vst [vmem:[%s14647_s19 + $0xd0] sm:$0xff] %v8794_v54  ;;  %v8795_v16 = vmax.f32 %v8763_v11, 0.0 }
 0x656   : > { %8824 = vst [vmem:[%s14647_s19 + $0xc0] sm:$0xff] %v8792_v53  ;;  %v8793_v27 = vmax.f32 %v8761_v55, 0.0  ;;  %v11123_v59 = vpop.f32.mrb[12].mxu1 }
 0x657   : > { %8827 = vst [vmem:[%s14647_s19 + $0xd8] sm:$0xff] %v8795_v16  ;;  %v11185_v56 = vadd.f32 %v11123_v59, %v14627_v15  ;;  %v8682_v2 = vpop.f32.mrb[13].mxu1 }
 0x658   : > { %8825 = vst [vmem:[%s14647_s19 + $0xc8] sm:$0xff] %v8793_v27  ;;  %v11186_v19 = vadd.f32 %v14627_v15, %v8682_v2  ;;  %v11124_v52 = vpop.f32.mrb[14].mxu1 }
 0x659   : > { %v8766_v34 = vadd.f32 %v11185_v56, %v14636_v31  ;;  %v11187_v33 = vadd.f32 %v11124_v52, %v14627_v15  ;;  %v8685_v57 = vpop.f32.mrb[15].mxu1 }
 0x65a   : > { %v8764_v21 = vadd.f32 %v11186_v19, %v14636_v31  ;;  %v11188_v0 = vadd.f32 %v14627_v15, %v8685_v57 }
 0x65b   : > { %v8798_v41 = vmax.f32 %v8766_v34, 0.0  ;;  %v8767_v13 = vadd.f32 %v11187_v33, %v14636_v31 }
 0x65c   : > { %v8796_v4 = vmax.f32 %v8764_v21, 0.0  ;;  %v8765_v62 = vadd.f32 %v11188_v0, %v14636_v31 }
 0x65d   : > { %8830 = vst [vmem:[%s14647_s19 + $0xf0] sm:$0xff] %v8798_v41  ;;  %v8799_v23 = vmax.f32 %v8767_v13, 0.0 }
 0x65e   : > { %8828 = vst [vmem:[%s14647_s19 + $0xe0] sm:$0xff] %v8796_v4  ;;  %v8797_v60 = vmax.f32 %v8765_v62, 0.0 }
 0x65f   : > { %8831 = vst [vmem:[%s14647_s19 + $0xf8] sm:$0xff] %v8799_v23 }
 0x660   : > { %8829 = vst [vmem:[%s14647_s19 + $0xe8] sm:$0xff] %v8797_v60 }
 0x661 PF: > { %s17_s24 = sadd.s32 1, %s11948_s24  }
 0x662   : > { %p14_p4 = scmp.ge.s32.totalorder %s17_s24, 4  }
 0x664   :  { %16 = sbr.rel (!%p14_p4) target bundleno = 1 (0x1), region = 98 }

</bundles_post_ra>
